<compile_context>
chip_gen: v7x
topology: tpu7x:2x2x1
jax: 0.10.0
libtpu: 0.0.40
codegen_flags: <defaults>
</compile_context>

<pallas_src>
import jax
import jax.numpy as jnp
from jax.experimental import pallas as pl
from jax.experimental.pallas import tpu as pltpu


# ---------------------------------------------------------------------------
# Fused BasicBlock kernel: one batch element per grid step.
#   xp_ref : (1, H+2, W+2, C)   zero-padded NHWC input
#   w*_ref : (9*C, C)           conv weights, row block (3*ky+kx) = tap (ky,kx)
#   s*/b*  : (1, C)             folded BN scale / bias
#   o_ref  : (1, H, W, C)       output
#   y1p_ref: (H+2, W+2, C)      VMEM scratch holding the padded intermediate
# ---------------------------------------------------------------------------
def _basic_block_kernel(xp_ref, w1_ref, s1_ref, b1_ref,
                        w2_ref, s2_ref, b2_ref, o_ref, y1p_ref):
    Hp, Wp, C = y1p_ref.shape
    H, W = Hp - 2, Wp - 2

    # Zero the scratch once: only its 1-pixel border is ever consumed as
    # padding, and the interior is fully overwritten on every grid step.
    @pl.when(pl.program_id(0) == 0)
    def _():
        y1p_ref[...] = jnp.zeros_like(y1p_ref)

    xp = xp_ref[0]                                  # (Hp, Wp, C)

    def conv3x3(src, w_ref):
        # 3x3 "same" conv on a padded NHWC tile as 9 shifted MXU matmuls.
        acc = jnp.zeros((H * W, C), jnp.float32)
        for ky in range(3):
            for kx in range(3):
                patch = src[ky:ky + H, kx:kx + W, :].reshape(H * W, C)
                wk = w_ref[(3 * ky + kx) * C:(3 * ky + kx + 1) * C, :]
                acc = acc + jnp.dot(patch, wk,
                                    preferred_element_type=jnp.float32)
        return acc

    # conv1 -> bn1 (folded) -> relu
    y1 = jnp.maximum(conv3x3(xp, w1_ref) * s1_ref[...] + b1_ref[...], 0.0)
    y1p_ref[1:1 + H, 1:1 + W, :] = y1.reshape(H, W, C)

    # conv2 -> bn2 (folded) -> + identity -> relu
    acc2 = conv3x3(y1p_ref[...], w2_ref) * s2_ref[...] + b2_ref[...]
    identity = xp[1:1 + H, 1:1 + W, :].reshape(H * W, C).astype(jnp.float32)
    out = jnp.maximum(acc2 + identity, 0.0)
    o_ref[...] = out.reshape(1, H, W, C).astype(o_ref.dtype)


# ---------------------------------------------------------------------------
# Wrapper: NCHW in/out (PyTorch layout), eval-mode BN folded to scale/bias.
# ---------------------------------------------------------------------------
def basic_block_forward(x_nchw, params, eps=1e-5):
    N, C, H, W = x_nchw.shape
    Hp, Wp = H + 2, W + 2

    x_nhwc = jnp.transpose(x_nchw, (0, 2, 3, 1))
    xp = jnp.pad(x_nhwc, ((0, 0), (1, 1), (1, 1), (0, 0)))

    def pack_w(w_oihw):
        # (Cout, Cin, 3, 3) -> HWIO -> (9*Cin, Cout); row block k = tap (ky,kx)
        return jnp.transpose(w_oihw, (2, 3, 1, 0)).reshape(9 * C, C)

    def fold_bn(g, b, m, v):
        s = g / jnp.sqrt(v + eps)
        return s.reshape(1, C), (b - m * s).reshape(1, C)

    w1 = pack_w(params["conv1_w"])
    w2 = pack_w(params["conv2_w"])
    s1, b1 = fold_bn(params["bn1_gamma"], params["bn1_beta"],
                     params["bn1_mean"], params["bn1_var"])
    s2, b2 = fold_bn(params["bn2_gamma"], params["bn2_beta"],
                     params["bn2_mean"], params["bn2_var"])

    out_nhwc = pl.pallas_call(
        _basic_block_kernel,
        out_shape=jax.ShapeDtypeStruct((N, H, W, C), x_nchw.dtype),
        grid=(N,),
        in_specs=[
            pl.BlockSpec((1, Hp, Wp, C), lambda n: (n, 0, 0, 0)),
            pl.BlockSpec((9 * C, C), lambda n: (0, 0)),
            pl.BlockSpec((1, C), lambda n: (0, 0)),
            pl.BlockSpec((1, C), lambda n: (0, 0)),
            pl.BlockSpec((9 * C, C), lambda n: (0, 0)),
            pl.BlockSpec((1, C), lambda n: (0, 0)),
            pl.BlockSpec((1, C), lambda n: (0, 0)),
        ],
        out_specs=pl.BlockSpec((1, H, W, C), lambda n: (n, 0, 0, 0)),
        scratch_shapes=[pltpu.VMEM((Hp, Wp, C), jnp.float32)],
        compiler_params=pltpu.CompilerParams(
            dimension_semantics=("parallel",),
        ),
    )(xp, w1, s1, b1, w2, s2, b2)

    return jnp.transpose(out_nhwc, (0, 3, 1, 2))


# ---------------------------------------------------------------------------
# Plain-JAX reference mirroring the PyTorch forward (eval mode, stride=1,
# downsample=None).
# ---------------------------------------------------------------------------
def _ref_forward(x, params, eps=1e-5):
    def conv(inp, w):
        return jax.lax.conv_general_dilated(
            inp, w, window_strides=(1, 1), padding=((1, 1), (1, 1)),
            dimension_numbers=("NCHW", "OIHW", "NCHW"),
            precision=jax.lax.Precision.HIGHEST)

    def bn(y, g, b, m, v):
        s = g / jnp.sqrt(v + eps)
        return y * s[None, :, None, None] + (b - m * s)[None, :, None, None]

    out = jnp.maximum(
        bn(conv(x, params["conv1_w"]), params["bn1_gamma"],
           params["bn1_beta"], params["bn1_mean"], params["bn1_var"]), 0.0)
    out = bn(conv(out, params["conv2_w"]), params["bn2_gamma"],
             params["bn2_beta"], params["bn2_mean"], params["bn2_var"])
    return jnp.maximum(out + x, 0.0)


if __name__ == "__main__":
    key = jax.random.PRNGKey(0)
    keys = jax.random.split(key, 12)

    N, C, H, W = 2, 32, 16, 16   # small BasicBlock: inplanes = planes = 32
    x = jax.random.normal(keys[0], (N, C, H, W), jnp.float32)

    params = {
        "conv1_w": 0.1 * jax.random.normal(keys[1], (C, C, 3, 3), jnp.float32),
        "conv2_w": 0.1 * jax.random.normal(keys[2], (C, C, 3, 3), jnp.float32),
        "bn1_gamma": 1.0 + 0.1 * jax.random.normal(keys[3], (C,), jnp.float32),
        "bn1_beta": 0.1 * jax.random.normal(keys[4], (C,), jnp.float32),
        "bn1_mean": 0.1 * jax.random.normal(keys[5], (C,), jnp.float32),
        "bn1_var": jax.random.uniform(keys[6], (C,), jnp.float32, 0.5, 1.5),
        "bn2_gamma": 1.0 + 0.1 * jax.random.normal(keys[7], (C,), jnp.float32),
        "bn2_beta": 0.1 * jax.random.normal(keys[8], (C,), jnp.float32),
        "bn2_mean": 0.1 * jax.random.normal(keys[9], (C,), jnp.float32),
        "bn2_var": jax.random.uniform(keys[10], (C,), jnp.float32, 0.5, 1.5),
    }

    out = basic_block_forward(x, params)
    out = jax.block_until_ready(out)
    assert out.shape == (N, C, H, W) and out.dtype == jnp.float32

    ref = _ref_forward(x, params)
    max_err = float(jnp.max(jnp.abs(out - ref)))
    assert jnp.allclose(out, ref, rtol=1e-2, atol=1e-2), max_err

    print("KERNEL_OK")
</pallas_src>

<mosaic_0001>
module attributes {stable_mosaic.version = 11 : i64} {
  func.func @_basic_block_kernel(%arg0: i32, %arg1: memref<1x18x18x32xf32, #tpu.memory_space<vmem>>, %arg2: memref<288x32xf32, #tpu.memory_space<vmem>>, %arg3: memref<1x32xf32, #tpu.memory_space<vmem>>, %arg4: memref<1x32xf32, #tpu.memory_space<vmem>>, %arg5: memref<288x32xf32, #tpu.memory_space<vmem>>, %arg6: memref<1x32xf32, #tpu.memory_space<vmem>>, %arg7: memref<1x32xf32, #tpu.memory_space<vmem>>, %arg8: memref<1x16x16x32xf32, #tpu.memory_space<vmem>>, %arg9: memref<18x18x32xf32, #tpu.memory_space<vmem>>) attributes {dimension_semantics = [#tpu.dimension_semantics<parallel>], iteration_bounds = array<i64: 2>, scalar_prefetch = 0 : i64, scratch_operands = 1 : i64, tpu.core_type = #tpu.core_type<tc>, window_params = [{transform_indices = @transform_0, window_bounds = array<i64: 1, 18, 18, 32>}, {pipeline_mode = #tpu.pipeline_mode<synchronous>, transform_indices = @transform_1, window_bounds = array<i64: 288, 32>}, {pipeline_mode = #tpu.pipeline_mode<synchronous>, transform_indices = @transform_2, window_bounds = array<i64: 1, 32>}, {pipeline_mode = #tpu.pipeline_mode<synchronous>, transform_indices = @transform_3, window_bounds = array<i64: 1, 32>}, {pipeline_mode = #tpu.pipeline_mode<synchronous>, transform_indices = @transform_4, window_bounds = array<i64: 288, 32>}, {pipeline_mode = #tpu.pipeline_mode<synchronous>, transform_indices = @transform_5, window_bounds = array<i64: 1, 32>}, {pipeline_mode = #tpu.pipeline_mode<synchronous>, transform_indices = @transform_6, window_bounds = array<i64: 1, 32>}, {transform_indices = @transform_7, window_bounds = array<i64: 1, 16, 16, 32>}]} {
    %c0_i32 = arith.constant 0 : i32
    %0 = arith.cmpi eq, %arg0, %c0_i32 : i32
    %1 = arith.extui %0 : i1 to i32
    %c0_i32_0 = arith.constant 0 : i32
    %2 = arith.cmpi ne, %1, %c0_i32_0 : i32
    scf.if %2 {
      %cst_70 = arith.constant 0.000000e+00 : f32
      %121 = vector.broadcast %cst_70 : f32 to vector<18x18x32xf32>
      %c0_71 = arith.constant 0 : index
      %c0_72 = arith.constant 0 : index
      %c0_73 = arith.constant 0 : index
      %122 = vector.load %arg9[%c0_71, %c0_72, %c0_73] : memref<18x18x32xf32, #tpu.memory_space<vmem>>, vector<18x18x32xf32>
      tpu.vector_store %arg9[%c0_71, %c0_72, %c0_73], %121 {strides = array<i32>} : memref<18x18x32xf32, #tpu.memory_space<vmem>>, vector<18x18x32xf32>,
    } else {
    }
    %c0 = arith.constant 0 : index
    %c0_1 = arith.constant 0 : index
    %c0_2 = arith.constant 0 : index
    %c0_3 = arith.constant 0 : index
    %3 = vector.load %arg1[%c0, %c0_1, %c0_2, %c0_3] : memref<1x18x18x32xf32, #tpu.memory_space<vmem>>, vector<1x18x18x32xf32>
    %4 = vector.shape_cast %3 : vector<1x18x18x32xf32> to vector<18x18x32xf32>
    %cst = arith.constant 0.000000e+00 : f32
    %5 = vector.broadcast %cst : f32 to vector<256x32xf32>
    %6 = vector.extract_strided_slice %4 {offsets = [0, 0, 0], sizes = [16, 16, 32], strides = [1, 1, 1]} : vector<18x18x32xf32> to vector<16x16x32xf32>
    %7 = vector.shape_cast %6 : vector<16x16x32xf32> to vector<256x32xf32>
    %c0_4 = arith.constant 0 : index
    %c0_5 = arith.constant 0 : index
    %8 = vector.load %arg2[%c0_4, %c0_5] : memref<288x32xf32, #tpu.memory_space<vmem>>, vector<32x32xf32>
    %cst_6 = arith.constant dense<0.000000e+00> : vector<256x32xf32>
    %9 = tpu.matmul %7, %8, %cst_6 {dimension_numbers = #tpu.dot_dimension_numbers<[1], [0], [0], [1], [0, 0, 1, 1], [], []>} : vector<256x32xf32>, vector<32x32xf32>, vector<256x32xf32> -> vector<256x32xf32>
    %10 = arith.addf %5, %9 : vector<256x32xf32>
    %11 = vector.extract_strided_slice %4 {offsets = [0, 1, 0], sizes = [16, 16, 32], strides = [1, 1, 1]} : vector<18x18x32xf32> to vector<16x16x32xf32>
    %12 = vector.shape_cast %11 : vector<16x16x32xf32> to vector<256x32xf32>
    %c32 = arith.constant 32 : index
    %c0_7 = arith.constant 0 : index
    %13 = vector.load %arg2[%c32, %c0_7] : memref<288x32xf32, #tpu.memory_space<vmem>>, vector<32x32xf32>
    %cst_8 = arith.constant dense<0.000000e+00> : vector<256x32xf32>
    %14 = tpu.matmul %12, %13, %cst_8 {dimension_numbers = #tpu.dot_dimension_numbers<[1], [0], [0], [1], [0, 0, 1, 1], [], []>} : vector<256x32xf32>, vector<32x32xf32>, vector<256x32xf32> -> vector<256x32xf32>
    %15 = arith.addf %10, %14 : vector<256x32xf32>
    %16 = vector.extract_strided_slice %4 {offsets = [0, 2, 0], sizes = [16, 16, 32], strides = [1, 1, 1]} : vector<18x18x32xf32> to vector<16x16x32xf32>
    %17 = vector.shape_cast %16 : vector<16x16x32xf32> to vector<256x32xf32>
    %c64 = arith.constant 64 : index
    %c0_9 = arith.constant 0 : index
    %18 = vector.load %arg2[%c64, %c0_9] : memref<288x32xf32, #tpu.memory_space<vmem>>, vector<32x32xf32>
    %cst_10 = arith.constant dense<0.000000e+00> : vector<256x32xf32>
    %19 = tpu.matmul %17, %18, %cst_10 {dimension_numbers = #tpu.dot_dimension_numbers<[1], [0], [0], [1], [0, 0, 1, 1], [], []>} : vector<256x32xf32>, vector<32x32xf32>, vector<256x32xf32> -> vector<256x32xf32>
    %20 = arith.addf %15, %19 : vector<256x32xf32>
    %21 = vector.extract_strided_slice %4 {offsets = [1, 0, 0], sizes = [16, 16, 32], strides = [1, 1, 1]} : vector<18x18x32xf32> to vector<16x16x32xf32>
    %22 = vector.shape_cast %21 : vector<16x16x32xf32> to vector<256x32xf32>
    %c96 = arith.constant 96 : index
    %c0_11 = arith.constant 0 : index
    %23 = vector.load %arg2[%c96, %c0_11] : memref<288x32xf32, #tpu.memory_space<vmem>>, vector<32x32xf32>
    %cst_12 = arith.constant dense<0.000000e+00> : vector<256x32xf32>
    %24 = tpu.matmul %22, %23, %cst_12 {dimension_numbers = #tpu.dot_dimension_numbers<[1], [0], [0], [1], [0, 0, 1, 1], [], []>} : vector<256x32xf32>, vector<32x32xf32>, vector<256x32xf32> -> vector<256x32xf32>
    %25 = arith.addf %20, %24 : vector<256x32xf32>
    %26 = vector.extract_strided_slice %4 {offsets = [1, 1, 0], sizes = [16, 16, 32], strides = [1, 1, 1]} : vector<18x18x32xf32> to vector<16x16x32xf32>
    %27 = vector.shape_cast %26 : vector<16x16x32xf32> to vector<256x32xf32>
    %c128 = arith.constant 128 : index
    %c0_13 = arith.constant 0 : index
    %28 = vector.load %arg2[%c128, %c0_13] : memref<288x32xf32, #tpu.memory_space<vmem>>, vector<32x32xf32>
    %cst_14 = arith.constant dense<0.000000e+00> : vector<256x32xf32>
    %29 = tpu.matmul %27, %28, %cst_14 {dimension_numbers = #tpu.dot_dimension_numbers<[1], [0], [0], [1], [0, 0, 1, 1], [], []>} : vector<256x32xf32>, vector<32x32xf32>, vector<256x32xf32> -> vector<256x32xf32>
    %30 = arith.addf %25, %29 : vector<256x32xf32>
    %31 = vector.extract_strided_slice %4 {offsets = [1, 2, 0], sizes = [16, 16, 32], strides = [1, 1, 1]} : vector<18x18x32xf32> to vector<16x16x32xf32>
    %32 = vector.shape_cast %31 : vector<16x16x32xf32> to vector<256x32xf32>
    %c160 = arith.constant 160 : index
    %c0_15 = arith.constant 0 : index
    %33 = vector.load %arg2[%c160, %c0_15] : memref<288x32xf32, #tpu.memory_space<vmem>>, vector<32x32xf32>
    %cst_16 = arith.constant dense<0.000000e+00> : vector<256x32xf32>
    %34 = tpu.matmul %32, %33, %cst_16 {dimension_numbers = #tpu.dot_dimension_numbers<[1], [0], [0], [1], [0, 0, 1, 1], [], []>} : vector<256x32xf32>, vector<32x32xf32>, vector<256x32xf32> -> vector<256x32xf32>
    %35 = arith.addf %30, %34 : vector<256x32xf32>
    %36 = vector.extract_strided_slice %4 {offsets = [2, 0, 0], sizes = [16, 16, 32], strides = [1, 1, 1]} : vector<18x18x32xf32> to vector<16x16x32xf32>
    %37 = vector.shape_cast %36 : vector<16x16x32xf32> to vector<256x32xf32>
    %c192 = arith.constant 192 : index
    %c0_17 = arith.constant 0 : index
    %38 = vector.load %arg2[%c192, %c0_17] : memref<288x32xf32, #tpu.memory_space<vmem>>, vector<32x32xf32>
    %cst_18 = arith.constant dense<0.000000e+00> : vector<256x32xf32>
    %39 = tpu.matmul %37, %38, %cst_18 {dimension_numbers = #tpu.dot_dimension_numbers<[1], [0], [0], [1], [0, 0, 1, 1], [], []>} : vector<256x32xf32>, vector<32x32xf32>, vector<256x32xf32> -> vector<256x32xf32>
    %40 = arith.addf %35, %39 : vector<256x32xf32>
    %41 = vector.extract_strided_slice %4 {offsets = [2, 1, 0], sizes = [16, 16, 32], strides = [1, 1, 1]} : vector<18x18x32xf32> to vector<16x16x32xf32>
    %42 = vector.shape_cast %41 : vector<16x16x32xf32> to vector<256x32xf32>
    %c224 = arith.constant 224 : index
    %c0_19 = arith.constant 0 : index
    %43 = vector.load %arg2[%c224, %c0_19] : memref<288x32xf32, #tpu.memory_space<vmem>>, vector<32x32xf32>
    %cst_20 = arith.constant dense<0.000000e+00> : vector<256x32xf32>
    %44 = tpu.matmul %42, %43, %cst_20 {dimension_numbers = #tpu.dot_dimension_numbers<[1], [0], [0], [1], [0, 0, 1, 1], [], []>} : vector<256x32xf32>, vector<32x32xf32>, vector<256x32xf32> -> vector<256x32xf32>
    %45 = arith.addf %40, %44 : vector<256x32xf32>
    %46 = vector.extract_strided_slice %4 {offsets = [2, 2, 0], sizes = [16, 16, 32], strides = [1, 1, 1]} : vector<18x18x32xf32> to vector<16x16x32xf32>
    %47 = vector.shape_cast %46 : vector<16x16x32xf32> to vector<256x32xf32>
    %c256 = arith.constant 256 : index
    %c0_21 = arith.constant 0 : index
    %48 = vector.load %arg2[%c256, %c0_21] : memref<288x32xf32, #tpu.memory_space<vmem>>, vector<32x32xf32>
    %cst_22 = arith.constant dense<0.000000e+00> : vector<256x32xf32>
    %49 = tpu.matmul %47, %48, %cst_22 {dimension_numbers = #tpu.dot_dimension_numbers<[1], [0], [0], [1], [0, 0, 1, 1], [], []>} : vector<256x32xf32>, vector<32x32xf32>, vector<256x32xf32> -> vector<256x32xf32>
    %50 = arith.addf %45, %49 : vector<256x32xf32>
    %c0_23 = arith.constant 0 : index
    %c0_24 = arith.constant 0 : index
    %51 = vector.load %arg3[%c0_23, %c0_24] : memref<1x32xf32, #tpu.memory_space<vmem>>, vector<1x32xf32>
    %52 = vector.broadcast %51 : vector<1x32xf32> to vector<256x32xf32>
    %53 = arith.mulf %50, %52 : vector<256x32xf32>
    %c0_25 = arith.constant 0 : index
    %c0_26 = arith.constant 0 : index
    %54 = vector.load %arg4[%c0_25, %c0_26] : memref<1x32xf32, #tpu.memory_space<vmem>>, vector<1x32xf32>
    %55 = vector.broadcast %54 : vector<1x32xf32> to vector<256x32xf32>
    %56 = arith.addf %53, %55 : vector<256x32xf32>
    %cst_27 = arith.constant 0.000000e+00 : f32
    %57 = vector.broadcast %cst_27 : f32 to vector<256x32xf32>
    %58 = arith.maximumf %56, %57 : vector<256x32xf32>
    %59 = vector.shape_cast %58 : vector<256x32xf32> to vector<16x16x32xf32>
    %c1 = arith.constant 1 : index
    %c1_28 = arith.constant 1 : index
    %c0_29 = arith.constant 0 : index
    %60 = vector.load %arg9[%c1, %c1_28, %c0_29] : memref<18x18x32xf32, #tpu.memory_space<vmem>>, vector<16x16x32xf32>
    tpu.vector_store %arg9[%c1, %c1_28, %c0_29], %59 {strides = array<i32>} : memref<18x18x32xf32, #tpu.memory_space<vmem>>, vector<16x16x32xf32>,
    %c0_30 = arith.constant 0 : index
    %c0_31 = arith.constant 0 : index
    %c0_32 = arith.constant 0 : index
    %61 = vector.load %arg9[%c0_30, %c0_31, %c0_32] : memref<18x18x32xf32, #tpu.memory_space<vmem>>, vector<18x18x32xf32>
    %cst_33 = arith.constant 0.000000e+00 : f32
    %62 = vector.broadcast %cst_33 : f32 to vector<256x32xf32>
    %63 = vector.extract_strided_slice %61 {offsets = [0, 0, 0], sizes = [16, 16, 32], strides = [1, 1, 1]} : vector<18x18x32xf32> to vector<16x16x32xf32>
    %64 = vector.shape_cast %63 : vector<16x16x32xf32> to vector<256x32xf32>
    %c0_34 = arith.constant 0 : index
    %c0_35 = arith.constant 0 : index
    %65 = vector.load %arg5[%c0_34, %c0_35] : memref<288x32xf32, #tpu.memory_space<vmem>>, vector<32x32xf32>
    %cst_36 = arith.constant dense<0.000000e+00> : vector<256x32xf32>
    %66 = tpu.matmul %64, %65, %cst_36 {dimension_numbers = #tpu.dot_dimension_numbers<[1], [0], [0], [1], [0, 0, 1, 1], [], []>} : vector<256x32xf32>, vector<32x32xf32>, vector<256x32xf32> -> vector<256x32xf32>
    %67 = arith.addf %62, %66 : vector<256x32xf32>
    %68 = vector.extract_strided_slice %61 {offsets = [0, 1, 0], sizes = [16, 16, 32], strides = [1, 1, 1]} : vector<18x18x32xf32> to vector<16x16x32xf32>
    %69 = vector.shape_cast %68 : vector<16x16x32xf32> to vector<256x32xf32>
    %c32_37 = arith.constant 32 : index
    %c0_38 = arith.constant 0 : index
    %70 = vector.load %arg5[%c32_37, %c0_38] : memref<288x32xf32, #tpu.memory_space<vmem>>, vector<32x32xf32>
    %cst_39 = arith.constant dense<0.000000e+00> : vector<256x32xf32>
    %71 = tpu.matmul %69, %70, %cst_39 {dimension_numbers = #tpu.dot_dimension_numbers<[1], [0], [0], [1], [0, 0, 1, 1], [], []>} : vector<256x32xf32>, vector<32x32xf32>, vector<256x32xf32> -> vector<256x32xf32>
    %72 = arith.addf %67, %71 : vector<256x32xf32>
    %73 = vector.extract_strided_slice %61 {offsets = [0, 2, 0], sizes = [16, 16, 32], strides = [1, 1, 1]} : vector<18x18x32xf32> to vector<16x16x32xf32>
    %74 = vector.shape_cast %73 : vector<16x16x32xf32> to vector<256x32xf32>
    %c64_40 = arith.constant 64 : index
    %c0_41 = arith.constant 0 : index
    %75 = vector.load %arg5[%c64_40, %c0_41] : memref<288x32xf32, #tpu.memory_space<vmem>>, vector<32x32xf32>
    %cst_42 = arith.constant dense<0.000000e+00> : vector<256x32xf32>
    %76 = tpu.matmul %74, %75, %cst_42 {dimension_numbers = #tpu.dot_dimension_numbers<[1], [0], [0], [1], [0, 0, 1, 1], [], []>} : vector<256x32xf32>, vector<32x32xf32>, vector<256x32xf32> -> vector<256x32xf32>
    %77 = arith.addf %72, %76 : vector<256x32xf32>
    %78 = vector.extract_strided_slice %61 {offsets = [1, 0, 0], sizes = [16, 16, 32], strides = [1, 1, 1]} : vector<18x18x32xf32> to vector<16x16x32xf32>
    %79 = vector.shape_cast %78 : vector<16x16x32xf32> to vector<256x32xf32>
    %c96_43 = arith.constant 96 : index
    %c0_44 = arith.constant 0 : index
    %80 = vector.load %arg5[%c96_43, %c0_44] : memref<288x32xf32, #tpu.memory_space<vmem>>, vector<32x32xf32>
    %cst_45 = arith.constant dense<0.000000e+00> : vector<256x32xf32>
    %81 = tpu.matmul %79, %80, %cst_45 {dimension_numbers = #tpu.dot_dimension_numbers<[1], [0], [0], [1], [0, 0, 1, 1], [], []>} : vector<256x32xf32>, vector<32x32xf32>, vector<256x32xf32> -> vector<256x32xf32>
    %82 = arith.addf %77, %81 : vector<256x32xf32>
    %83 = vector.extract_strided_slice %61 {offsets = [1, 1, 0], sizes = [16, 16, 32], strides = [1, 1, 1]} : vector<18x18x32xf32> to vector<16x16x32xf32>
    %84 = vector.shape_cast %83 : vector<16x16x32xf32> to vector<256x32xf32>
    %c128_46 = arith.constant 128 : index
    %c0_47 = arith.constant 0 : index
    %85 = vector.load %arg5[%c128_46, %c0_47] : memref<288x32xf32, #tpu.memory_space<vmem>>, vector<32x32xf32>
    %cst_48 = arith.constant dense<0.000000e+00> : vector<256x32xf32>
    %86 = tpu.matmul %84, %85, %cst_48 {dimension_numbers = #tpu.dot_dimension_numbers<[1], [0], [0], [1], [0, 0, 1, 1], [], []>} : vector<256x32xf32>, vector<32x32xf32>, vector<256x32xf32> -> vector<256x32xf32>
    %87 = arith.addf %82, %86 : vector<256x32xf32>
    %88 = vector.extract_strided_slice %61 {offsets = [1, 2, 0], sizes = [16, 16, 32], strides = [1, 1, 1]} : vector<18x18x32xf32> to vector<16x16x32xf32>
    %89 = vector.shape_cast %88 : vector<16x16x32xf32> to vector<256x32xf32>
    %c160_49 = arith.constant 160 : index
    %c0_50 = arith.constant 0 : index
    %90 = vector.load %arg5[%c160_49, %c0_50] : memref<288x32xf32, #tpu.memory_space<vmem>>, vector<32x32xf32>
    %cst_51 = arith.constant dense<0.000000e+00> : vector<256x32xf32>
    %91 = tpu.matmul %89, %90, %cst_51 {dimension_numbers = #tpu.dot_dimension_numbers<[1], [0], [0], [1], [0, 0, 1, 1], [], []>} : vector<256x32xf32>, vector<32x32xf32>, vector<256x32xf32> -> vector<256x32xf32>
    %92 = arith.addf %87, %91 : vector<256x32xf32>
    %93 = vector.extract_strided_slice %61 {offsets = [2, 0, 0], sizes = [16, 16, 32], strides = [1, 1, 1]} : vector<18x18x32xf32> to vector<16x16x32xf32>
    %94 = vector.shape_cast %93 : vector<16x16x32xf32> to vector<256x32xf32>
    %c192_52 = arith.constant 192 : index
    %c0_53 = arith.constant 0 : index
    %95 = vector.load %arg5[%c192_52, %c0_53] : memref<288x32xf32, #tpu.memory_space<vmem>>, vector<32x32xf32>
    %cst_54 = arith.constant dense<0.000000e+00> : vector<256x32xf32>
    %96 = tpu.matmul %94, %95, %cst_54 {dimension_numbers = #tpu.dot_dimension_numbers<[1], [0], [0], [1], [0, 0, 1, 1], [], []>} : vector<256x32xf32>, vector<32x32xf32>, vector<256x32xf32> -> vector<256x32xf32>
    %97 = arith.addf %92, %96 : vector<256x32xf32>
    %98 = vector.extract_strided_slice %61 {offsets = [2, 1, 0], sizes = [16, 16, 32], strides = [1, 1, 1]} : vector<18x18x32xf32> to vector<16x16x32xf32>
    %99 = vector.shape_cast %98 : vector<16x16x32xf32> to vector<256x32xf32>
    %c224_55 = arith.constant 224 : index
    %c0_56 = arith.constant 0 : index
    %100 = vector.load %arg5[%c224_55, %c0_56] : memref<288x32xf32, #tpu.memory_space<vmem>>, vector<32x32xf32>
    %cst_57 = arith.constant dense<0.000000e+00> : vector<256x32xf32>
    %101 = tpu.matmul %99, %100, %cst_57 {dimension_numbers = #tpu.dot_dimension_numbers<[1], [0], [0], [1], [0, 0, 1, 1], [], []>} : vector<256x32xf32>, vector<32x32xf32>, vector<256x32xf32> -> vector<256x32xf32>
    %102 = arith.addf %97, %101 : vector<256x32xf32>
    %103 = vector.extract_strided_slice %61 {offsets = [2, 2, 0], sizes = [16, 16, 32], strides = [1, 1, 1]} : vector<18x18x32xf32> to vector<16x16x32xf32>
    %104 = vector.shape_cast %103 : vector<16x16x32xf32> to vector<256x32xf32>
    %c256_58 = arith.constant 256 : index
    %c0_59 = arith.constant 0 : index
    %105 = vector.load %arg5[%c256_58, %c0_59] : memref<288x32xf32, #tpu.memory_space<vmem>>, vector<32x32xf32>
    %cst_60 = arith.constant dense<0.000000e+00> : vector<256x32xf32>
    %106 = tpu.matmul %104, %105, %cst_60 {dimension_numbers = #tpu.dot_dimension_numbers<[1], [0], [0], [1], [0, 0, 1, 1], [], []>} : vector<256x32xf32>, vector<32x32xf32>, vector<256x32xf32> -> vector<256x32xf32>
    %107 = arith.addf %102, %106 : vector<256x32xf32>
    %c0_61 = arith.constant 0 : index
    %c0_62 = arith.constant 0 : index
    %108 = vector.load %arg6[%c0_61, %c0_62] : memref<1x32xf32, #tpu.memory_space<vmem>>, vector<1x32xf32>
    %109 = vector.broadcast %108 : vector<1x32xf32> to vector<256x32xf32>
    %110 = arith.mulf %107, %109 : vector<256x32xf32>
    %c0_63 = arith.constant 0 : index
    %c0_64 = arith.constant 0 : index
    %111 = vector.load %arg7[%c0_63, %c0_64] : memref<1x32xf32, #tpu.memory_space<vmem>>, vector<1x32xf32>
    %112 = vector.broadcast %111 : vector<1x32xf32> to vector<256x32xf32>
    %113 = arith.addf %110, %112 : vector<256x32xf32>
    %114 = vector.extract_strided_slice %4 {offsets = [1, 1, 0], sizes = [16, 16, 32], strides = [1, 1, 1]} : vector<18x18x32xf32> to vector<16x16x32xf32>
    %115 = vector.shape_cast %114 : vector<16x16x32xf32> to vector<256x32xf32>
    %116 = arith.addf %113, %115 : vector<256x32xf32>
    %cst_65 = arith.constant 0.000000e+00 : f32
    %117 = vector.broadcast %cst_65 : f32 to vector<256x32xf32>
    %118 = arith.maximumf %116, %117 : vector<256x32xf32>
    %119 = vector.shape_cast %118 : vector<256x32xf32> to vector<1x16x16x32xf32>
    %c0_66 = arith.constant 0 : index
    %c0_67 = arith.constant 0 : index
    %c0_68 = arith.constant 0 : index
    %c0_69 = arith.constant 0 : index
    %120 = vector.load %arg8[%c0_66, %c0_67, %c0_68, %c0_69] : memref<1x16x16x32xf32, #tpu.memory_space<vmem>>, vector<1x16x16x32xf32>
    tpu.vector_store %arg8[%c0_66, %c0_67, %c0_68, %c0_69], %119 {strides = array<i32>} : memref<1x16x16x32xf32, #tpu.memory_space<vmem>>, vector<1x16x16x32xf32>,
    return
  }
  func.func @transform_0(%arg0: i32) -> (i32, i32, i32, i32) {
    %c0_i32 = arith.constant 0 : i32
    %c0_i32_0 = arith.constant 0 : i32
    %c0_i32_1 = arith.constant 0 : i32
    %c0_i32_2 = arith.constant 0 : i32
    return %arg0, %c0_i32, %c0_i32_0, %c0_i32_1 : i32, i32, i32, i32
  }
  func.func @transform_1(%arg0: i32) -> (i32, i32) {
    %c0_i32 = arith.constant 0 : i32
    %c0_i32_0 = arith.constant 0 : i32
    %c0_i32_1 = arith.constant 0 : i32
    return %c0_i32, %c0_i32_0 : i32, i32
  }
  func.func @transform_2(%arg0: i32) -> (i32, i32) {
    %c0_i32 = arith.constant 0 : i32
    %c0_i32_0 = arith.constant 0 : i32
    %c0_i32_1 = arith.constant 0 : i32
    return %c0_i32, %c0_i32_0 : i32, i32
  }
  func.func @transform_3(%arg0: i32) -> (i32, i32) {
    %c0_i32 = arith.constant 0 : i32
    %c0_i32_0 = arith.constant 0 : i32
    %c0_i32_1 = arith.constant 0 : i32
    return %c0_i32, %c0_i32_0 : i32, i32
  }
  func.func @transform_4(%arg0: i32) -> (i32, i32) {
    %c0_i32 = arith.constant 0 : i32
    %c0_i32_0 = arith.constant 0 : i32
    %c0_i32_1 = arith.constant 0 : i32
    return %c0_i32, %c0_i32_0 : i32, i32
  }
  func.func @transform_5(%arg0: i32) -> (i32, i32) {
    %c0_i32 = arith.constant 0 : i32
    %c0_i32_0 = arith.constant 0 : i32
    %c0_i32_1 = arith.constant 0 : i32
    return %c0_i32, %c0_i32_0 : i32, i32
  }
  func.func @transform_6(%arg0: i32) -> (i32, i32) {
    %c0_i32 = arith.constant 0 : i32
    %c0_i32_0 = arith.constant 0 : i32
    %c0_i32_1 = arith.constant 0 : i32
    return %c0_i32, %c0_i32_0 : i32, i32
  }
  func.func @transform_7(%arg0: i32) -> (i32, i32, i32, i32) {
    %c0_i32 = arith.constant 0 : i32
    %c0_i32_0 = arith.constant 0 : i32
    %c0_i32_1 = arith.constant 0 : i32
    %c0_i32_2 = arith.constant 0 : i32
    return %arg0, %c0_i32, %c0_i32_0, %c0_i32_1 : i32, i32, i32, i32
  }
}

</mosaic_0001>

<bundles_post_ra>
// kernel: tpu_custom_call.1
= control target key start
LH: loop header
LB: loop body
LE: loop exit
PB: predicated region body
PF: predicated region fallthrough
CT: control target
= control target key end

     0   :  { %12 = vsyncpa [#allocation4], 0  ;;  %s12080_s0 = inlined_call_operand.vmem [shape: f32[2,18,18,32], index: 0, kind: input, shape index: {}]   ;;  %s12081_s1 = inlined_call_operand.vmem [shape: f32[288,32], index: 1, kind: input, shape index: {}]   ;;  %s12082_s2 = inlined_call_operand.vmem [shape: f32[1,32], index: 2, kind: input, shape index: {}]   ;;  %s12083_s3 = inlined_call_operand.vmem [shape: f32[1,32], index: 3, kind: input, shape index: {}]   ;;  %s12084_s4 = inlined_call_operand.vmem [shape: f32[288,32], index: 4, kind: input, shape index: {}]   ;;  %s12085_s5 = inlined_call_operand.vmem [shape: f32[1,32], index: 5, kind: input, shape index: {}]   ;;  %s12086_s6 = inlined_call_operand.vmem [shape: f32[1,32], index: 6, kind: input, shape index: {}]   ;;  %s12087_s7 = inlined_call_operand.hbm [shape: f32[2,16,16,32], index: 7, kind: output, shape index: {}]  }
   0x1   :  { %14 = vsyncpa [#allocation4 + $0x1], 0  ;;  %s9407_s24 = smov 0   ;;  %s9409_s25 = smov 0  }
   0x2   :  { %s9411_s26 = smov 0   ;;  %s9413_s27 = smov 0  }
   0x3 LB: > { %s9428_s28 = sadd.s32 4294967295, %s9361_s27   ;;  %s6343_s29 = sadd.s32 4294967294, %s9361_s27   ;;  %s9361_s27 = sphi %s9413_s27, %s12505_s27   ;;  %s9357_s26 = sphi %s9411_s26, %s12504_s26   ;;  %s9353_s25 = sphi %s9409_s25, %s12503_s25   ;;  %s9349_s24 = sphi %s9407_s24, %s12502_s24  }
   0x4   : > { %s9432_s30 = sadd.s32 1, %s9361_s27   ;;  %s179_s8 = sadd.s32 1, %s9357_s26 }
   0x5   : > { %s176_s9 = ssub.s32 %s9361_s27, %s9432_s30  ;;  %p189_p0 = scmp.ne.s32.totalorder %s9357_s26, %s9353_s25 }
   0x6   : > { %p177_p1 = scmp.eq.s32.totalorder %s176_s9, 0  ;;  %p190_p2 = scmp.eq.s32.totalorder %s9428_s28, 1 }
   0x7   : > { %p195_p3 = scmp.ne.s32.totalorder %s9353_s25, %s9349_s24  ;;  %p196_p4 = scmp.eq.s32.totalorder %s6343_s29, 1 }
   0x8   : > { %s9443_s10 = scalar_select %p177_p1, %s9357_s26, %s179_s8  }
   0x9   : > { %p9445_p5 = por %p190_p2, %p189_p0  ;;  %p9449_p6 = por %p196_p4, %p195_p3 }
   0xa   : > { %p6346_p7 = scmp.ge.s32.totalorder %s9361_s27, 1  ;;  %p240_p8 = scmp.lt.s32.totalorder %s9361_s27, 3 }
   0xc   : > { %p241_p9 = pnand %p6346_p7, %p240_p8 }
   0xe   : > { %244 = sbr.rel (%p241_p9) target bundleno = 1611 (0x64b), region = 48 }
  0x15   : > { %s269_s13 = sand.u32 1, %s9353_s25   ;;  %p272_p10 = scmp.lt.s32.totalorder %s9428_s28, 1 }
  0x16   : > { %s6347_s14 = sshll.u32 %s269_s13, 8  ;;  %p6349_p11 = scmp.ne.s32.totalorder %s9428_s28, 0 }
  0x17   : > { %s273_s15 = scalar_select %p272_p10, %s9428_s28, 1 }
  0x18   : > { %s9465_s20 = scalar_lea.vmem [#allocation3], %s6347_s14  ;;  %280 = sbr.rel (%p6349_p11) target bundleno = 52 (0x34), region = 52  ;;  %vm281_vm0 = vcmask (!%p6349_p11), 261120   ;;  %vm284_vm1 = vcmask (!%p6349_p11), 254976   ;;  %v9363_v0 = vmov (!%p6349_p11), 0.0  }
  0x19   : > { %s9248_s16 = smul.u32 432, %s273_s15  ;;  %282 = vst.msk [vmem:[#allocation2] sm:$0xff] (!%p6349_p11), %vm281_vm0, %v9363_v0  ;;  %283 = vst.msk [vmem:[#allocation2 + $0x8] sm:$0xff] (!%p6349_p11), %vm281_vm0, %v9363_v0 }
  0x1a   : > { %286 = vst.msk [vmem:[#allocation2 + $0x18] sm:$0xff] (!%p6349_p11), %vm281_vm0, %v9363_v0  ;;  %287 = vst.msk [vmem:[#allocation2 + $0x20] sm:$0xff] (!%p6349_p11), %vm281_vm0, %v9363_v0 }
  0x1b   : > { %s9463_s19 = scalar_lea.vmem %s12080_s0, %s9248_s16  ;;  %289 = vst.msk [vmem:[#allocation2 + $0x30] sm:$0xff] (!%p6349_p11), %vm281_vm0, %v9363_v0  ;;  %290 = vst.msk [vmem:[#allocation2 + $0x38] sm:$0xff] (!%p6349_p11), %vm281_vm0, %v9363_v0 }
  0x1c   : > { %292 = vst.msk [vmem:[#allocation2 + $0x48] sm:$0xff] (!%p6349_p11), %vm281_vm0, %v9363_v0  ;;  %293 = vst.msk [vmem:[#allocation2 + $0x50] sm:$0xff] (!%p6349_p11), %vm281_vm0, %v9363_v0 }
  0x1d   : > { %295 = vst.msk [vmem:[#allocation2 + $0x60] sm:$0xff] (!%p6349_p11), %vm281_vm0, %v9363_v0  ;;  %296 = vst.msk [vmem:[#allocation2 + $0x68] sm:$0xff] (!%p6349_p11), %vm281_vm0, %v9363_v0 }
  0x1e   : > { %298 = vst.msk [vmem:[#allocation2 + $0x78] sm:$0xff] (!%p6349_p11), %vm281_vm0, %v9363_v0  ;;  %299 = vst.msk [vmem:[#allocation2 + $0x80] sm:$0xff] (!%p6349_p11), %vm281_vm0, %v9363_v0 }
  0x1f   : > { %301 = vst.msk [vmem:[#allocation2 + $0x90] sm:$0xff] %vm281_vm0, %v9363_v0  ;;  %302 = vst.msk [vmem:[#allocation2 + $0x98] sm:$0xff] %vm281_vm0, %v9363_v0 }
  0x20   : > { %304 = vst.msk [vmem:[#allocation2 + $0xa8] sm:$0xff] %vm281_vm0, %v9363_v0  ;;  %305 = vst.msk [vmem:[#allocation2 + $0xb0] sm:$0xff] %vm281_vm0, %v9363_v0 }
  0x21   : > { %307 = vst.msk [vmem:[#allocation2 + $0xc0] sm:$0xff] %vm281_vm0, %v9363_v0  ;;  %308 = vst.msk [vmem:[#allocation2 + $0xc8] sm:$0xff] %vm281_vm0, %v9363_v0 }
  0x22   : > { %310 = vst.msk [vmem:[#allocation2 + $0xd8] sm:$0xff] %vm281_vm0, %v9363_v0  ;;  %311 = vst.msk [vmem:[#allocation2 + $0xe0] sm:$0xff] %vm281_vm0, %v9363_v0 }
  0x23   : > { %313 = vst.msk [vmem:[#allocation2 + $0xf0] sm:$0xff] %vm281_vm0, %v9363_v0  ;;  %314 = vst.msk [vmem:[#allocation2 + $0xf8] sm:$0xff] %vm281_vm0, %v9363_v0 }
  0x24   : > { %316 = vst.msk [vmem:[#allocation2 + $0x108] sm:$0xff] %vm281_vm0, %v9363_v0  ;;  %317 = vst.msk [vmem:[#allocation2 + $0x110] sm:$0xff] %vm281_vm0, %v9363_v0 }
  0x25   : > { %319 = vst.msk [vmem:[#allocation2 + $0x120] sm:$0xff] %vm281_vm0, %v9363_v0  ;;  %320 = vst.msk [vmem:[#allocation2 + $0x128] sm:$0xff] %vm281_vm0, %v9363_v0 }
  0x26   : > { %322 = vst.msk [vmem:[#allocation2 + $0x138] sm:$0xff] %vm281_vm0, %v9363_v0  ;;  %323 = vst.msk [vmem:[#allocation2 + $0x140] sm:$0xff] %vm281_vm0, %v9363_v0 }
  0x27   : > { %325 = vst.msk [vmem:[#allocation2 + $0x150] sm:$0xff] %vm281_vm0, %v9363_v0  ;;  %326 = vst.msk [vmem:[#allocation2 + $0x158] sm:$0xff] %vm281_vm0, %v9363_v0 }
  0x28   : > { %328 = vst.msk [vmem:[#allocation2 + $0x168] sm:$0xff] %vm281_vm0, %v9363_v0  ;;  %329 = vst.msk [vmem:[#allocation2 + $0x170] sm:$0xff] %vm281_vm0, %v9363_v0 }
  0x29   : > { %331 = vst.msk [vmem:[#allocation2 + $0x180] sm:$0xff] %vm281_vm0, %v9363_v0  ;;  %332 = vst.msk [vmem:[#allocation2 + $0x188] sm:$0xff] %vm281_vm0, %v9363_v0 }
  0x2a   : > { %334 = vst.msk [vmem:[#allocation2 + $0x198] sm:$0xff] %vm281_vm0, %v9363_v0  ;;  %335 = vst.msk [vmem:[#allocation2 + $0x1a0] sm:$0xff] %vm281_vm0, %v9363_v0 }
  0x2b   : > { %285 = vst.msk [vmem:[#allocation2 + $0x10] sm:$0x3] %vm284_vm1, %v9363_v0  ;;  %288 = vst.msk [vmem:[#allocation2 + $0x28] sm:$0x3] %vm284_vm1, %v9363_v0 }
  0x2c   : > { %291 = vst.msk [vmem:[#allocation2 + $0x40] sm:$0x3] %vm284_vm1, %v9363_v0  ;;  %294 = vst.msk [vmem:[#allocation2 + $0x58] sm:$0x3] %vm284_vm1, %v9363_v0 }
  0x2d   : > { %297 = vst.msk [vmem:[#allocation2 + $0x70] sm:$0x3] %vm284_vm1, %v9363_v0  ;;  %300 = vst.msk [vmem:[#allocation2 + $0x88] sm:$0x3] %vm284_vm1, %v9363_v0 }
  0x2e   : > { %303 = vst.msk [vmem:[#allocation2 + $0xa0] sm:$0x3] %vm284_vm1, %v9363_v0  ;;  %306 = vst.msk [vmem:[#allocation2 + $0xb8] sm:$0x3] %vm284_vm1, %v9363_v0 }
  0x2f   : > { %309 = vst.msk [vmem:[#allocation2 + $0xd0] sm:$0x3] %vm284_vm1, %v9363_v0  ;;  %312 = vst.msk [vmem:[#allocation2 + $0xe8] sm:$0x3] %vm284_vm1, %v9363_v0 }
  0x30   : > { %315 = vst.msk [vmem:[#allocation2 + $0x100] sm:$0x3] %vm284_vm1, %v9363_v0  ;;  %318 = vst.msk [vmem:[#allocation2 + $0x118] sm:$0x3] %vm284_vm1, %v9363_v0 }
  0x31   : > { %321 = vst.msk [vmem:[#allocation2 + $0x130] sm:$0x3] %vm284_vm1, %v9363_v0  ;;  %324 = vst.msk [vmem:[#allocation2 + $0x148] sm:$0x3] %vm284_vm1, %v9363_v0 }
  0x32   : > { %327 = vst.msk [vmem:[#allocation2 + $0x160] sm:$0x3] %vm284_vm1, %v9363_v0  ;;  %330 = vst.msk [vmem:[#allocation2 + $0x178] sm:$0x3] %vm284_vm1, %v9363_v0 }
  0x33   : > { %333 = vst.msk [vmem:[#allocation2 + $0x190] sm:$0x3] %vm284_vm1, %v9363_v0  ;;  %336 = vst.msk [vmem:[#allocation2 + $0x1a8] sm:$0x3] %vm284_vm1, %v9363_v0 }
  0x34 PF: > { %v524_v1 = vld [vmem:[%s12081_s1 + $0x20] sm:$0xff]  ;;  %v525_v2 = vld [vmem:[%s12081_s1 + $0x28] sm:$0xff]  ;;  %v526_v3 = vld [vmem:[%s12081_s1 + $0x30] sm:$0xff]  ;;  %vm443_vm2 = vcmask 1046528   ;;  %vm528_vm3 = vcmask 261120   ;;  %vm1107_vm4 = vcmask 1045504  }
  0x35   : > { %v8592_v4 = vpack.c.bf16 %v525_v2, %v524_v1  ;;  %v527_v5 = vld [vmem:[%s12081_s1 + $0x38] sm:$0xff]  ;;  %v9535_v6 = vld [vmem:[%s9463_s19] sm:$0xff]  ;;  %v9538_v7 = vld [vmem:[%s9463_s19 + $0x8] sm:$0xff]  ;;  %s6935_s23 = sshll.u32 %s9428_s28, 12  ;;  %s6281_s29 = sshll.u32 %s9465_s20, 4  ;;  %s12031_s29 = int_to_ptr.vmem [resolvable:$true] %s6281_s29 }
  0x36   : > { %v8596_v8 = vpack.c.bf16 %v527_v5, %v526_v3  ;;  %v444_v9 = vrot.slane %v9535_v6, 1  ;;  %v445_v10 = vrot.slane %v9538_v7, 1  ;;  %v9543_v11 = vld [vmem:[%s9463_s19 + $0x10] sm:$0x3]  ;;  %v391_v12 = vld [vmem:[%s12081_s1] sm:$0xff]  ;;  %v392_v13 = vld [vmem:[%s12081_s1 + $0x8] sm:$0xff] }
  0x37   : > { %8593 = vmatprep.subr.bf16.mxu0 %v8592_v4  ;;  %v9552_v14 = vld [vmem:[%s9463_s19 + $0x18] sm:$0xff]  ;;  %v9555_v15 = vld [vmem:[%s9463_s19 + $0x20] sm:$0xff]  ;;  %v447_v17 = vrot.slane %v9543_v11, 1  ;;  %v8600_v18 = vpack.c.bf16 %v392_v13, %v391_v12  ;;  %v9563_v21 = vld [vmem:[%s9463_s19 + $0x28] sm:$0x3]  ;;  %s12039_s28 = scalar_lea.sflag [#allocation4], %s269_s13 }
  0x38   : > { %8595 = vmatpush3.bf16.msra.mxu0 %v8592_v4  ;;  %v446_v16 = vsel %vm443_vm2, %v444_v9, %v445_v10  ;;  %v449_v19 = vrot.slane %v9552_v14, 1  ;;  %v450_v20 = vrot.slane %v9555_v15, 1  ;;  %v9566_v22 = vld [vmem:[%s9463_s19 + $0x30] sm:$0xff]  ;;  %v9569_v23 = vld [vmem:[%s9463_s19 + $0x38] sm:$0xff]  ;;  %v452_v25 = vrot.slane %v9563_v21, 1  ;;  %v9582_v30 = vld [vmem:[%s9463_s19 + $0x48] sm:$0xff] }
  0x39   : > { %8597 = vmatprep.subr.bf16.mxu0 %v8596_v8  ;;  %7592 = vmatprep.mubr.msk.f32.mxu0 %vm528_vm3, %v446_v16  ;;  %v448_v24 = vsel %vm443_vm2, %v445_v10, %v447_v17  ;;  %v454_v27 = vrot.slane %v9566_v22, 1  ;;  %v455_v28 = vrot.slane %v9569_v23, 1  ;;  %v9579_v29 = vld [vmem:[%s9463_s19 + $0x40] sm:$0x3]  ;;  %v9585_v31 = vld [vmem:[%s9463_s19 + $0x50] sm:$0xff]  ;;  %v394_v35 = vld [vmem:[%s12081_s1 + $0x18] sm:$0xff] }
  0x3a   : > { %v9574_v26 = vsel %vm443_vm2, %v449_v19, %v450_v20  ;;  %v9591_v32 = vsel %vm443_vm2, %v450_v20, %v452_v25  ;;  %v457_v33 = vrot.slane %v9579_v29, 1  ;;  %v393_v34 = vld [vmem:[%s12081_s1 + $0x10] sm:$0xff]  ;;  %v459_v37 = vrot.slane %v9582_v30, 1  ;;  %v9606_v39 = vld [vmem:[%s9463_s19 + $0x58] sm:$0x3]  ;;  %v9609_v41 = vld [vmem:[%s9463_s19 + $0x60] sm:$0xff] }
  0x3b   : > { %12251 = vst [vmem:[#allocation6_spill] sm:$0xff] %v9574_v26  ;;  %12252 = vst [vmem:[#allocation7_spill] sm:$0xff] %v9591_v32  ;;  %v9601_v36 = vsel %vm443_vm2, %v454_v27, %v455_v28  ;;  %v460_v38 = vrot.slane %v9585_v31, 1  ;;  %v8604_v40 = vpack.c.bf16 %v394_v35, %v393_v34  ;;  %v9612_v42 = vld [vmem:[%s9463_s19 + $0x68] sm:$0xff]  ;;  %v462_v44 = vrot.slane %v9606_v39, 1  ;;  %v9631_v49 = vld [vmem:[%s9463_s19 + $0x78] sm:$0xff] }
  0x3c   : > { %8599 = vmatpush3.bf16.msra.mxu0 %v8596_v8  ;;  %12253 = vst [vmem:[#allocation8_spill] sm:$0xff] %v9601_v36  ;;  %v9619_v43 = vsel %vm443_vm2, %v455_v28, %v457_v33  ;;  %v464_v46 = vrot.slane %v9609_v41, 1  ;;  %v465_v47 = vrot.slane %v9612_v42, 1  ;;  %v9628_v48 = vld [vmem:[%s9463_s19 + $0x70] sm:$0x3]  ;;  %v9634_v50 = vld [vmem:[%s9463_s19 + $0x80] sm:$0xff] }
  0x3d   : > { %8601 = vmatprep.subr.bf16.mxu0 %v8600_v18  ;;  %12254 = vst [vmem:[#allocation9_spill] sm:$0xff] %v9619_v43  ;;  %v9623_v45 = vsel %vm443_vm2, %v459_v37, %v460_v38  ;;  %v9641_v51 = vsel %vm443_vm2, %v460_v38, %v462_v44  ;;  %v467_v52 = vrot.slane %v9628_v48, 1  ;;  %v1188_v53 = vld [vmem:[%s12081_s1 + $0x40] sm:$0xff]  ;;  %v1189_v54 = vld [vmem:[%s12081_s1 + $0x48] sm:$0xff]  ;;  %v469_v56 = vrot.slane %v9631_v49, 1  ;;  %v9659_v59 = vld [vmem:[%s9463_s19 + $0x90] sm:$0xff] }
  0x3e   : > { %12255 = vst [vmem:[#allocation10_spill] sm:$0xff] %v9623_v45  ;;  %12256 = vst [vmem:[#allocation11_spill] sm:$0xff] %v9641_v51  ;;  %v9651_v55 = vsel %vm443_vm2, %v464_v46, %v465_v47  ;;  %v470_v57 = vrot.slane %v9634_v50, 1  ;;  %v9656_v58 = vld [vmem:[%s9463_s19 + $0x88] sm:$0x3]  ;;  %v9662_v60 = vld [vmem:[%s9463_s19 + $0x98] sm:$0xff]  ;;  %v9664_v61 = vpack.c.bf16 %v1189_v54, %v1188_v53 }
  0x3f   : > { %7593 = vmatmul.mubr.msk.f32.vlgmr.msra.gmra.mrb[0].mxu0 %vm528_vm3, %v448_v24  ;;  %12257 = vst [vmem:[#allocation12_spill] sm:$0xff] %v9651_v55  ;;  %v9671_v62 = vsel %vm443_vm2, %v465_v47, %v467_v52  ;;  %v472_v63 = vrot.slane %v9656_v58, 1  ;;  %v474_v1 = vrot.slane %v9659_v59, 1  ;;  %v475_v2 = vrot.slane %v9662_v60, 1  ;;  %v9681_v3 = vld [vmem:[%s9463_s19 + $0xa0] sm:$0x3] }
  0x40   : > { %8603 = vmatpush3.bf16.msra.mxu0 %v8600_v18  ;;  %7595 = vmatprep.mubr.msk.f32.mxu0 %vm528_vm3, %v9574_v26  ;;  %12258 = vst [vmem:[#allocation13_spill] sm:$0xff] %v9671_v62  ;;  %v9676_v0 = vsel %vm443_vm2, %v469_v56, %v470_v57  ;;  %v9684_v4 = vld [vmem:[%s9463_s19 + $0xa8] sm:$0xff]  ;;  %v9687_v5 = vld [vmem:[%s9463_s19 + $0xb0] sm:$0xff]  ;;  %v477_v9 = vrot.slane %v9681_v3, 1  ;;  %v9703_v16 = vld [vmem:[%s9463_s19 + $0xb8] sm:$0x3] }
  0x41   : > { %8605 = vmatprep.subr.bf16.mxu0 %v8604_v40  ;;  %12259 = vst [vmem:[#allocation14_spill] sm:$0xff] %v9676_v0  ;;  %v9694_v8 = vsel %vm443_vm2, %v470_v57, %v472_v63  ;;  %v9698_v10 = vsel %vm443_vm2, %v474_v1, %v475_v2  ;;  %v479_v12 = vrot.slane %v9684_v4, 1  ;;  %v480_v13 = vrot.slane %v9687_v5, 1  ;;  %v9706_v17 = vld [vmem:[%s9463_s19 + $0xc0] sm:$0xff]  ;;  %v9709_v18 = vld [vmem:[%s9463_s19 + $0xc8] sm:$0xff]  ;;  %v9728_v33 = vld [vmem:[%s9463_s19 + $0xd8] sm:$0xff] }
  0x42   : > { %12260 = vst [vmem:[#allocation15_spill] sm:$0xff] %v9694_v8  ;;  %12261 = vst [vmem:[#allocation16_spill] sm:$0xff] %v9698_v10  ;;  %v9716_v19 = vsel %vm443_vm2, %v475_v2, %v477_v9  ;;  %v482_v20 = vrot.slane %v9703_v16, 1  ;;  %v484_v25 = vrot.slane %v9706_v17, 1  ;;  %v485_v27 = vrot.slane %v9709_v18, 1  ;;  %v9731_v34 = vld [vmem:[%s9463_s19 + $0xe0] sm:$0xff] }
  0x43   : > { %7596 = vmatmul.mubr.msk.f32.gmra.mrb[2].mxu0 %vm528_vm3, %v9591_v32  ;;  %12262 = vst [vmem:[#allocation17_spill] sm:$0xff] %v9716_v19  ;;  %v9720_v24 = vsel %vm443_vm2, %v479_v12, %v480_v13  ;;  %v9725_v28 = vld [vmem:[%s9463_s19 + $0xd0] sm:$0x3]  ;;  %v490_v44 = vrot.slane %v9731_v34, 1  ;;  %v9747_v46 = vld [vmem:[%s9463_s19 + $0xe8] sm:$0x3] }
  0x44   : > { %7598 = vmatprep.mubr.msk.f32.mxu0 %vm528_vm3, %v9601_v36  ;;  %8607 = vmatpush3.bf16.msra.mxu0 %v8604_v40  ;;  %12263 = vst [vmem:[#allocation18_spill] sm:$0xff] %v9720_v24  ;;  %v9738_v35 = vsel %vm443_vm2, %v480_v13, %v482_v20  ;;  %v487_v37 = vrot.slane %v9725_v28, 1  ;;  %v9742_v38 = vsel %vm443_vm2, %v484_v25, %v485_v27  ;;  %v489_v40 = vrot.slane %v9728_v33, 1  ;;  %v9750_v47 = vld [vmem:[%s9463_s19 + $0xf0] sm:$0xff]  ;;  %v9753_v52 = vld [vmem:[%s9463_s19 + $0xf8] sm:$0xff]  ;;  %v9772_v2 = vld [vmem:[%s9463_s19 + $0x108] sm:$0xff] }
  0x45   : > { %8609 = vmatprep.subr.bf16.mxu0 %v9664_v61  ;;  %12264 = vst [vmem:[#allocation19_spill] sm:$0xff] %v9738_v35  ;;  %12265 = vst [vmem:[#allocation20_spill] sm:$0xff] %v9742_v38  ;;  %v492_v54 = vrot.slane %v9747_v46, 1  ;;  %v494_v57 = vrot.slane %v9750_v47, 1  ;;  %v495_v63 = vrot.slane %v9753_v52, 1  ;;  %v9775_v9 = vld [vmem:[%s9463_s19 + $0x110] sm:$0xff] }
  0x46   : > { %v9760_v53 = vsel %vm443_vm2, %v485_v27, %v487_v37  ;;  %v9764_v56 = vsel %vm443_vm2, %v489_v40, %v490_v44  ;;  %v9769_v1 = vld [vmem:[%s9463_s19 + $0x100] sm:$0x3]  ;;  %v499_v25 = vrot.slane %v9772_v2, 1  ;;  %v500_v27 = vrot.slane %v9775_v9, 1  ;;  %v9791_v37 = vld [vmem:[%s9463_s19 + $0x118] sm:$0x3] }
  0x47   : > { %7599 = vmatmul.mubr.msk.f32.gmra.mrb[4].mxu0 %vm528_vm3, %v9619_v43  ;;  %12266 = vst [vmem:[#allocation21_spill] sm:$0xff] %v9760_v53  ;;  %12267 = vst [vmem:[#allocation22_spill] sm:$0xff] %v9764_v56  ;;  %v9782_v12 = vsel %vm443_vm2, %v490_v44, %v492_v54  ;;  %v497_v13 = vrot.slane %v9769_v1, 1  ;;  %v9786_v20 = vsel %vm443_vm2, %v494_v57, %v495_v63  ;;  %v9794_v40 = vld [vmem:[%s9463_s19 + $0x120] sm:$0xff]  ;;  %v502_v54 = vrot.slane %v9791_v37, 1  ;;  %s9299_s14 = scalar_lea.vmem %s12031_s29, 4096 }
  0x48   : > { %7601 = vmatprep.mubr.msk.f32.mxu0 %vm528_vm3, %v9623_v45  ;;  %12268 = vst [vmem:[#allocation23_spill] sm:$0xff] %v9782_v12  ;;  %12269 = vst [vmem:[#allocation24_spill] sm:$0xff] %v9786_v20  ;;  %v9808_v57 = vsel %vm443_vm2, %v499_v25, %v500_v27  ;;  %v9879_v45 = vld [vmem:[%s9463_s19 + $0x178] sm:$0x3]  ;;  %p9300_p12 = scmp.ne.s32.totalorder %s12031_s29, %s9299_s14  ;;  %s9364_s15 = smov [#allocation3]  }
  0x49   : > { %v9804_v44 = vsel %vm443_vm2, %v495_v63, %v497_v13  ;;  %12271 = vst [vmem:[#allocation26_spill] sm:$0xff] %v9808_v57  ;;  %v9826_v63 = vsel %vm443_vm2, %v500_v27, %v502_v54  ;;  %s9303_s16 = sshll.u32 %s9364_s15, 4  ;;  %s9304_s16 = int_to_ptr.vmem [resolvable:$false] %s9303_s16 }
  0x4a   : > { %12270 = vst [vmem:[#allocation25_spill] sm:$0xff] %v9804_v44  ;;  %12272 = vst [vmem:[#allocation27_spill] sm:$0xff] %v9826_v63  ;;  %p9301_p13 = pnand %p9300_p12, %p9445_p5  ;;  %s9305_s17 = scalar_lea.vmem %s9304_s16, 8192 }
  0x4b   : > { %7602 = vmatmul.mubr.msk.f32.gmra.mrb[6].mxu0 %vm528_vm3, %v9641_v51  ;;  %p9306_p1 = scmp.lt.s32.totalorder %s12031_s29, %s9304_s16  ;;  %p9307_p2 = scmp.lt.s32.totalorder %s9305_s17, %s9299_s14 }
  0x4c   : > { %7604 = vmatprep.mubr.msk.f32.mxu0 %vm528_vm3, %v9651_v55  ;;  %v9860_v55 = vld [vmem:[%s9463_s19 + $0x168] sm:$0xff]  ;;  %p9302_p0 = pneg %p9301_p13 }
  0x4d   : > { %p9308_p3 = por %p9307_p2, %p9306_p1 }
  0x4f   : > { %7605 = vmatmul.mubr.msk.f32.gmra.mrb[8].mxu0 %vm528_vm3, %v9671_v62  ;;  %v9857_v62 = vld [vmem:[%s9463_s19 + $0x160] sm:$0x3]  ;;  %p9309_p4 = pnand %p9308_p3, %p9302_p0 }
  0x50   : > { %7607 = vmatprep.mubr.msk.f32.mxu0 %vm528_vm3, %v9676_v0 }
  0x53   : > { %7608 = vmatmul.mubr.msk.f32.gmra.mrb[10].mxu0 %vm528_vm3, %v9694_v8 }
  0x54   : > { %7610 = vmatprep.mubr.msk.f32.mxu0 %vm528_vm3, %v9698_v10  ;;  %v9835_v10 = vld [vmem:[%s9463_s19 + $0x148] sm:$0x3] }
  0x55   : > { %v512_v27 = vrot.slane %v9835_v10, 1 }
  0x57   : > { %7611 = vmatmul.mubr.msk.f32.gmra.mrb[12].mxu0 %vm528_vm3, %v9716_v19 }
  0x58   : > { %7613 = vmatprep.mubr.msk.f32.mxu0 %vm528_vm3, %v9720_v24 }
  0x5b   : > { %7614 = vmatmul.mubr.msk.f32.gmra.mrb[14].mxu0 %vm528_vm3, %v9738_v35  ;;  %v9813_v35 = vld [vmem:[%s9463_s19 + $0x130] sm:$0x3] }
  0x5c   : > { %7616 = vmatprep.mubr.msk.f32.mxu0 %vm528_vm3, %v9742_v38  ;;  %v507_v13 = vrot.slane %v9813_v35, 1 }
  0x5f   : > { %7617 = vmatmul.mubr.msk.f32.gmra.mrb[16].mxu0 %vm528_vm3, %v9760_v53  ;;  %v504_v53 = vrot.slane %v9794_v40, 1 }
  0x60   : > { %7619 = vmatprep.mubr.msk.f32.mxu0 %vm528_vm3, %v9764_v56  ;;  %v9797_v56 = vld [vmem:[%s9463_s19 + $0x128] sm:$0xff] }
  0x61   : > { %v505_v38 = vrot.slane %v9797_v56, 1 }
  0x63   : > { %7620 = vmatmul.mubr.msk.f32.gmra.mrb[18].mxu0 %vm528_vm3, %v9782_v12  ;;  %v9816_v12 = vld [vmem:[%s9463_s19 + $0x138] sm:$0xff]  ;;  %v9830_v25 = vsel %vm443_vm2, %v504_v53, %v505_v38  ;;  %v9848_v53 = vsel %vm443_vm2, %v505_v38, %v507_v13 }
  0x64   : > { %7622 = vmatprep.mubr.msk.f32.mxu0 %vm528_vm3, %v9786_v20  ;;  %v9819_v20 = vld [vmem:[%s9463_s19 + $0x140] sm:$0xff]  ;;  %12273 = vst [vmem:[#allocation28_spill] sm:$0xff] %v9830_v25  ;;  %v509_v24 = vrot.slane %v9816_v12, 1  ;;  %12274 = vst [vmem:[#allocation29_spill] sm:$0xff] %v9848_v53 }
  0x65   : > { %v510_v19 = vrot.slane %v9819_v20, 1 }
  0x67   : > { %7623 = vmatmul.mubr.msk.f32.gmra.mrb[20].mxu0 %vm528_vm3, %v9804_v44  ;;  %v9838_v44 = vld [vmem:[%s9463_s19 + $0x150] sm:$0xff]  ;;  %v9852_v54 = vsel %vm443_vm2, %v509_v24, %v510_v19  ;;  %v9870_v38 = vsel %vm443_vm2, %v510_v19, %v512_v27  ;;  %v517_v24 = vrot.slane %v9857_v62, 1  ;;  %v522_v27 = vrot.slane %v9879_v45, 1 }
  0x68   : > { %7625 = vmatprep.mubr.msk.f32.mxu0 %vm528_vm3, %v9808_v57  ;;  %v9841_v57 = vld [vmem:[%s9463_s19 + $0x158] sm:$0xff]  ;;  %12275 = vst [vmem:[#allocation30_spill] sm:$0xff] %v9852_v54  ;;  %v514_v8 = vrot.slane %v9838_v44, 1  ;;  %12276 = vst [vmem:[#allocation31_spill] sm:$0xff] %v9870_v38 }
  0x69   : > { %v515_v0 = vrot.slane %v9841_v57, 1 }
  0x6b   : > { %7626 = vmatmul.mubr.msk.f32.gmra.mrb[22].mxu0 %vm528_vm3, %v9826_v63  ;;  %v9863_v63 = vld [vmem:[%s9463_s19 + $0x170] sm:$0xff]  ;;  %v9874_v13 = vsel %vm443_vm2, %v514_v8, %v515_v0  ;;  %v9886_v19 = vsel %vm443_vm2, %v515_v0, %v517_v24  ;;  %v1191_v0 = vld [vmem:[%s12081_s1 + $0x58] sm:$0xff]  ;;  %v1514_v24 = vld [vmem:[%s12081_s1 + $0x68] sm:$0xff] }
  0x6c   : > { %7628 = vmatprep.mubr.msk.f32.mxu0 %vm528_vm3, %v9830_v25  ;;  %12277 = vst [vmem:[#allocation32_spill] sm:$0xff] %v9874_v13  ;;  %v519_v25 = vrot.slane %v9860_v55, 1  ;;  %v520_v51 = vrot.slane %v9863_v63, 1  ;;  %12278 = vst [vmem:[#allocation33_spill] sm:$0xff] %v9886_v19 }
  0x6e   : > { %v9890_v8 = vsel %vm443_vm2, %v519_v25, %v520_v51 }
  0x6f   : > { %7629 = vmatmul.mubr.msk.f32.gmra.mrb[24].mxu0 %vm528_vm3, %v9848_v53  ;;  %12279 = vst [vmem:[#allocation34_spill] sm:$0xff] %v9890_v8  ;;  %v1818_v53 = vld [vmem:[%s12081_s1 + $0x80] sm:$0xff] }
  0x70   : > { %7631 = vmatprep.mubr.msk.f32.mxu0 %vm528_vm3, %v9852_v54  ;;  %v9897_v54 = vsel %vm443_vm2, %v520_v51, %v522_v27  ;;  %v1513_v51 = vld [vmem:[%s12081_s1 + $0x60] sm:$0xff] }
  0x71   : > { %12280 = vst [vmem:[#allocation35_spill] sm:$0xff] %v9897_v54  ;;  %v8616_v27 = vpack.c.bf16 %v1514_v24, %v1513_v51  ;;  %v1113_v51 = vrot.slane %v9552_v14, 2  ;;  %v1114_v24 = vrot.slane %v9555_v15, 2 }
  0x73   : > { %7632 = vmatmul.mubr.msk.f32.gmra.mrb[26].mxu0 %vm528_vm3, %v9870_v38 }
  0x74   : > { %7634 = vmatprep.mubr.msk.f32.mxu0 %vm528_vm3, %v9874_v13  ;;  %v1190_v13 = vld [vmem:[%s12081_s1 + $0x50] sm:$0xff] }
  0x75   : > { %v8612_v25 = vpack.c.bf16 %v1191_v0, %v1190_v13  ;;  %v1109_v13 = vrot.slane %v9538_v7, 2  ;;  %v1111_v0 = vrot.slane %v9543_v11, 2 }
  0x77   : > { %7635 = vmatmul.mubr.msk.f32.gmra.mrb[28].mxu0 %vm528_vm3, %v9886_v19  ;;  %v1112_v11 = vsel %vm1107_vm4, %v1109_v13, %v1111_v0  ;;  %v1119_v19 = vrot.slane %v9569_v23, 2 }
  0x78   : > { %7637 = vmatprep.mubr.msk.f32.mxu0 %vm528_vm3, %v9890_v8  ;;  %v1118_v8 = vrot.slane %v9566_v22, 2 }
  0x7a   : > { %v10012_v0 = vsel %vm1107_vm4, %v1118_v8, %v1119_v19 }
  0x7b   : > { %7638 = vmatmul.mubr.msk.f32.gmra.mrb[30].mxu0 %vm528_vm3, %v9897_v54  ;;  %v9994_v54 = vsel %vm1107_vm4, %v1113_v51, %v1114_v24  ;;  %v1123_v51 = vrot.slane %v9582_v30, 2 }
  0x7c   : > { %7648 = vmatprep.mubr.msk.f32.mxu0 %vm528_vm3, %v9535_v6 }
  0x7f   : > { %7649 = vmatmul.mubr.msk.f32.vlgmr.msra.gmra.mrb[0].mxu0 %vm528_vm3, %v9538_v7  ;;  %v1516_v7 = vld [vmem:[%s12081_s1 + $0x78] sm:$0xff] }
  0x80   : > { %8611 = vmatpush3.bf16.msra.mxu0 %v9664_v61  ;;  %7651 = vmatprep.mubr.msk.f32.mxu0 %vm528_vm3, %v9552_v14  ;;  %v1108_v61 = vrot.slane %v9535_v6, 2  ;;  %v1515_v6 = vld [vmem:[%s12081_s1 + $0x70] sm:$0xff] }
  0x81   : > { %8613 = vmatprep.subr.bf16.mxu0 %v8612_v25  ;;  %v8620_v38 = vpack.c.bf16 %v1516_v7, %v1515_v6  ;;  %v1124_v6 = vrot.slane %v9585_v31, 2 }
  0x83   : > { %7652 = vmatmul.mubr.msk.f32.gmra.mrb[2].mxu0 %vm528_vm3, %v9555_v15  ;;  %v10027_v8 = vsel %vm1107_vm4, %v1123_v51, %v1124_v6  ;;  %v1138_v51 = vrot.slane %v9659_v59, 2 }
  0x84   : > { %7654 = vmatprep.mubr.msk.f32.mxu0 %vm528_vm3, %v9566_v22  ;;  %8615 = vmatpush3.bf16.msra.mxu0 %v8612_v25  ;;  %v1110_v25 = vsel %vm1107_vm4, %v1108_v61, %v1109_v13  ;;  %v1116_v61 = vrot.slane %v9563_v21, 2  ;;  %v1121_v13 = vrot.slane %v9579_v29, 2  ;;  %v1126_v29 = vrot.slane %v9606_v39, 2 }
  0x85   : > { %8617 = vmatprep.subr.bf16.mxu0 %v8616_v27  ;;  %v1131_v39 = vrot.slane %v9628_v48, 2 }
  0x86   : > { %v10008_v21 = vsel %vm1107_vm4, %v1114_v24, %v1116_v61  ;;  %v1128_v24 = vrot.slane %v9609_v41, 2  ;;  %v1134_v61 = vrot.slane %v9634_v50, 2 }
  0x87   : > { %7655 = vmatmul.mubr.msk.f32.gmra.mrb[4].mxu0 %vm528_vm3, %v9569_v23 }
  0x88   : > { %7657 = vmatprep.mubr.msk.f32.mxu0 %vm528_vm3, %v9582_v30 }
  0x8b   : > { %7658 = vmatmul.mubr.msk.f32.gmra.mrb[6].mxu0 %vm528_vm3, %v9585_v31 }
  0x8c   : > { %7660 = vmatprep.mubr.msk.f32.mxu0 %vm528_vm3, %v9609_v41 }
  0x8f   : > { %7661 = vmatmul.mubr.msk.f32.gmra.mrb[8].mxu0 %vm528_vm3, %v9612_v42 }
  0x90   : > { %7663 = vmatprep.mubr.msk.f32.mxu0 %vm528_vm3, %v9631_v49 }
  0x93   : > { %7664 = vmatmul.mubr.msk.f32.gmra.mrb[10].mxu0 %vm528_vm3, %v9634_v50 }
  0x94   : > { %7666 = vmatprep.mubr.msk.f32.mxu0 %vm528_vm3, %v9659_v59 }
  0x97   : > { %7667 = vmatmul.mubr.msk.f32.gmra.mrb[12].mxu0 %vm528_vm3, %v9662_v60 }
  0x98   : > { %7669 = vmatprep.mubr.msk.f32.mxu0 %vm528_vm3, %v9684_v4 }
  0x9b   : > { %7670 = vmatmul.mubr.msk.f32.gmra.mrb[14].mxu0 %vm528_vm3, %v9687_v5 }
  0x9c   : > { %7672 = vmatprep.mubr.msk.f32.mxu0 %vm528_vm3, %v9706_v17 }
  0x9f   : > { %7673 = vmatmul.mubr.msk.f32.gmra.mrb[16].mxu0 %vm528_vm3, %v9709_v18 }
  0xa0   : > { %7675 = vmatprep.mubr.msk.f32.mxu0 %vm528_vm3, %v9728_v33 }
  0xa3   : > { %7676 = vmatmul.mubr.msk.f32.gmra.mrb[18].mxu0 %vm528_vm3, %v9731_v34 }
  0xa4   : > { %7678 = vmatprep.mubr.msk.f32.mxu0 %vm528_vm3, %v9750_v47 }
  0xa7   : > { %7679 = vmatmul.mubr.msk.f32.gmra.mrb[20].mxu0 %vm528_vm3, %v9753_v52 }
  0xa8   : > { %7681 = vmatprep.mubr.msk.f32.mxu0 %vm528_vm3, %v9772_v2 }
  0xab   : > { %7682 = vmatmul.mubr.msk.f32.gmra.mrb[22].mxu0 %vm528_vm3, %v9775_v9 }
  0xac   : > { %7684 = vmatprep.mubr.msk.f32.mxu0 %vm528_vm3, %v9794_v40 }
  0xaf   : > { %7685 = vmatmul.mubr.msk.f32.gmra.mrb[24].mxu0 %vm528_vm3, %v9797_v56 }
  0xb0   : > { %7687 = vmatprep.mubr.msk.f32.mxu0 %vm528_vm3, %v9816_v12 }
  0xb3   : > { %7688 = vmatmul.mubr.msk.f32.gmra.mrb[26].mxu0 %vm528_vm3, %v9819_v20 }
  0xb4   : > { %7690 = vmatprep.mubr.msk.f32.mxu0 %vm528_vm3, %v9838_v44 }
  0xb7   : > { %7691 = vmatmul.mubr.msk.f32.gmra.mrb[28].mxu0 %vm528_vm3, %v9841_v57 }
  0xb8   : > { %7693 = vmatprep.mubr.msk.f32.mxu0 %vm528_vm3, %v9860_v55 }
  0xbb   : > { %7694 = vmatmul.mubr.msk.f32.gmra.mrb[30].mxu0 %vm528_vm3, %v9863_v63 }
  0xbc   : > { %7704 = vmatprep.mubr.msk.f32.mxu0 %vm528_vm3, %v1110_v25  ;;  %v1819_v25 = vld [vmem:[%s12081_s1 + $0x88] sm:$0xff] }
  0xbd   : > { %v10016_v7 = vpack.c.bf16 %v1819_v25, %v1818_v53  ;;  %v1129_v53 = vrot.slane %v9612_v42, 2 }
  0xbf   : > { %7705 = vmatmul.mubr.msk.f32.vlgmr.msra.gmra.mrb[0].mxu0 %vm528_vm3, %v1112_v11  ;;  %v1133_v11 = vrot.slane %v9631_v49, 2  ;;  %v10050_v25 = vsel %vm1107_vm4, %v1129_v53, %v1131_v39  ;;  %v1144_v39 = vrot.slane %v9687_v5, 2 }
  0xc0   : > { %8619 = vmatpush3.bf16.msra.mxu0 %v8616_v27  ;;  %7707 = vmatprep.mubr.msk.f32.mxu0 %vm528_vm3, %v9994_v54  ;;  %v10023_v27 = vsel %vm1107_vm4, %v1119_v19, %v1121_v13  ;;  %v10037_v19 = vsel %vm1107_vm4, %v1124_v6, %v1126_v29  ;;  %v1136_v13 = vrot.slane %v9656_v58, 2  ;;  %v1139_v6 = vrot.slane %v9662_v60, 2 }
  0xc1   : > { %8621 = vmatprep.subr.bf16.mxu0 %v8620_v38  ;;  %v10054_v48 = vsel %vm1107_vm4, %v1133_v11, %v1134_v61 }
  0xc2   : > { %v10063_v29 = vsel %vm1107_vm4, %v1134_v61, %v1136_v13  ;;  %v10067_v58 = vsel %vm1107_vm4, %v1138_v51, %v1139_v6  ;;  %v1146_v61 = vrot.slane %v9703_v16, 2  ;;  %v1148_v13 = vrot.slane %v9706_v17, 2 }
  0xc3   : > { %7708 = vmatmul.mubr.msk.f32.gmra.mrb[2].mxu0 %vm528_vm3, %v10008_v21  ;;  %12281 = vst [vmem:[#allocation36_spill] sm:$0xff] %v10067_v58  ;;  %v1149_v51 = vrot.slane %v9709_v18, 2 }
  0xc4   : > { %7710 = vmatprep.mubr.msk.f32.mxu0 %vm528_vm3, %v10012_v0  ;;  %8623 = vmatpush3.bf16.msra.mxu0 %v8620_v38  ;;  %v10041_v38 = vsel %vm1107_vm4, %v1128_v24, %v1129_v53  ;;  %v1141_v24 = vrot.slane %v9681_v3, 2  ;;  %v1143_v53 = vrot.slane %v9684_v4, 2 }
  0xc5   : > { %8625 = vmatprep.subr.bf16.mxu0 %v10016_v7  ;;  %v10093_v16 = vsel %vm1107_vm4, %v1148_v13, %v1149_v51  ;;  %v1159_v13 = vrot.slane %v9753_v52, 2 }
  0xc6   : > { %v10076_v11 = vsel %vm1107_vm4, %v1139_v6, %v1141_v24  ;;  %v10080_v3 = vsel %vm1107_vm4, %v1143_v53, %v1144_v39  ;;  %v1151_v6 = vrot.slane %v9725_v28, 2  ;;  %12283 = vst [vmem:[#allocation38_spill] sm:$0xff] %v10093_v16  ;;  %v1153_v24 = vrot.slane %v9728_v33, 2 }
  0xc7   : > { %7711 = vmatmul.mubr.msk.f32.gmra.mrb[4].mxu0 %vm528_vm3, %v10023_v27  ;;  %12282 = vst [vmem:[#allocation37_spill] sm:$0xff] %v10080_v3  ;;  %v1154_v53 = vrot.slane %v9731_v34, 2 }
  0xc8   : > { %7713 = vmatprep.mubr.msk.f32.mxu0 %vm528_vm3, %v10027_v8 }
  0xc9   : > { %v10106_v28 = vsel %vm1107_vm4, %v1153_v24, %v1154_v53  ;;  %v1164_v24 = vrot.slane %v9775_v9, 2 }
  0xca   : > { %12284 = vst [vmem:[#allocation39_spill] sm:$0xff] %v10106_v28 }
  0xcb   : > { %7714 = vmatmul.mubr.msk.f32.gmra.mrb[6].mxu0 %vm528_vm3, %v10037_v19 }
  0xcc   : > { %7716 = vmatprep.mubr.msk.f32.mxu0 %vm528_vm3, %v10041_v38 }
  0xcf   : > { %7717 = vmatmul.mubr.msk.f32.gmra.mrb[8].mxu0 %vm528_vm3, %v10050_v25 }
  0xd0   : > { %7719 = vmatprep.mubr.msk.f32.mxu0 %vm528_vm3, %v10054_v48 }
  0xd3   : > { %7720 = vmatmul.mubr.msk.f32.gmra.mrb[10].mxu0 %vm528_vm3, %v10063_v29 }
  0xd4   : > { %7722 = vmatprep.mubr.msk.f32.mxu0 %vm528_vm3, %v10067_v58  ;;  %v10089_v58 = vsel %vm1107_vm4, %v1144_v39, %v1146_v61  ;;  %v1156_v39 = vrot.slane %v9747_v46, 2  ;;  %v1158_v61 = vrot.slane %v9750_v47, 2 }
  0xd6   : > { %v10119_v46 = vsel %vm1107_vm4, %v1158_v61, %v1159_v13  ;;  %v1169_v61 = vrot.slane %v9797_v56, 2 }
  0xd7   : > { %7723 = vmatmul.mubr.msk.f32.gmra.mrb[12].mxu0 %vm528_vm3, %v10076_v11  ;;  %12285 = vst [vmem:[#allocation40_spill] sm:$0xff] %v10119_v46 }
  0xd8   : > { %7725 = vmatprep.mubr.msk.f32.mxu0 %vm528_vm3, %v10080_v3  ;;  %v10102_v3 = vsel %vm1107_vm4, %v1149_v51, %v1151_v6  ;;  %v1161_v51 = vrot.slane %v9769_v1, 2  ;;  %v1163_v6 = vrot.slane %v9772_v2, 2 }
  0xda   : > { %v10132_v1 = vsel %vm1107_vm4, %v1163_v6, %v1164_v24  ;;  %v1174_v6 = vrot.slane %v9819_v20, 2 }
  0xdb   : > { %7726 = vmatmul.mubr.msk.f32.gmra.mrb[14].mxu0 %vm528_vm3, %v10089_v58  ;;  %12287 = vst [vmem:[#allocation42_spill] sm:$0xff] %v10132_v1 }
  0xdc   : > { %7728 = vmatprep.mubr.msk.f32.mxu0 %vm528_vm3, %v10093_v16  ;;  %v10115_v16 = vsel %vm1107_vm4, %v1154_v53, %v1156_v39  ;;  %v1166_v53 = vrot.slane %v9791_v37, 2  ;;  %v1168_v39 = vrot.slane %v9794_v40, 2 }
  0xde   : > { %v10145_v37 = vsel %vm1107_vm4, %v1168_v39, %v1169_v61  ;;  %v1179_v39 = vrot.slane %v9841_v57, 2 }
  0xdf   : > { %7729 = vmatmul.mubr.msk.f32.gmra.mrb[16].mxu0 %vm528_vm3, %v10102_v3  ;;  %12288 = vst [vmem:[#allocation43_spill] sm:$0xff] %v10145_v37 }
  0xe0   : > { %7731 = vmatprep.mubr.msk.f32.mxu0 %vm528_vm3, %v10106_v28  ;;  %v10128_v28 = vsel %vm1107_vm4, %v1159_v13, %v1161_v51  ;;  %v1171_v13 = vrot.slane %v9813_v35, 2  ;;  %v1173_v51 = vrot.slane %v9816_v12, 2 }
  0xe1   : > { %12286 = vst [vmem:[#allocation41_spill] sm:$0xff] %v10128_v28 }
  0xe2   : > { %v10158_v35 = vsel %vm1107_vm4, %v1173_v51, %v1174_v6  ;;  %v1184_v51 = vrot.slane %v9863_v63, 2 }
  0xe3   : > { %7732 = vmatmul.mubr.msk.f32.gmra.mrb[18].mxu0 %vm528_vm3, %v10115_v16  ;;  %12290 = vst [vmem:[#allocation45_spill] sm:$0xff] %v10158_v35 }
  0xe4   : > { %7734 = vmatprep.mubr.msk.f32.mxu0 %vm528_vm3, %v10119_v46  ;;  %v10141_v46 = vsel %vm1107_vm4, %v1164_v24, %v1166_v53  ;;  %v1176_v24 = vrot.slane %v9835_v10, 2  ;;  %v1178_v53 = vrot.slane %v9838_v44, 2 }
  0xe6   : > { %v10171_v10 = vsel %vm1107_vm4, %v1178_v53, %v1179_v39  ;;  %v1820_v53 = vld [vmem:[%s12081_s1 + $0x90] sm:$0xff] }
  0xe7   : > { %7735 = vmatmul.mubr.msk.f32.gmra.mrb[20].mxu0 %vm528_vm3, %v10128_v28  ;;  %12291 = vst [vmem:[#allocation46_spill] sm:$0xff] %v10171_v10 }
  0xe8   : > { %7737 = vmatprep.mubr.msk.f32.mxu0 %vm528_vm3, %v10132_v1  ;;  %v10154_v1 = vsel %vm1107_vm4, %v1169_v61, %v1171_v13  ;;  %v1181_v61 = vrot.slane %v9857_v62, 2  ;;  %v1183_v13 = vrot.slane %v9860_v55, 2 }
  0xe9   : > { %12289 = vst [vmem:[#allocation44_spill] sm:$0xff] %v10154_v1 }
  0xea   : > { %v10184_v62 = vsel %vm1107_vm4, %v1183_v13, %v1184_v51  ;;  %v2089_v13 = vld [vmem:[%s12081_s1 + $0xa8] sm:$0xff] }
  0xeb   : > { %7738 = vmatmul.mubr.msk.f32.gmra.mrb[22].mxu0 %vm528_vm3, %v10141_v46 }
  0xec   : > { %7740 = vmatprep.mubr.msk.f32.mxu0 %vm528_vm3, %v10145_v37  ;;  %v10167_v37 = vsel %vm1107_vm4, %v1174_v6, %v1176_v24  ;;  %v1186_v6 = vrot.slane %v9879_v45, 2  ;;  %v1821_v45 = vld [vmem:[%s12081_s1 + $0x98] sm:$0xff] }
  0xee   : > { %v10191_v24 = vsel %vm1107_vm4, %v1184_v51, %v1186_v6  ;;  %v2091_v6 = vld [vmem:[%s12081_s1 + $0xb8] sm:$0xff] }
  0xef   : > { %7741 = vmatmul.mubr.msk.f32.gmra.mrb[24].mxu0 %vm528_vm3, %v10154_v1 }
  0xf0   : > { %7743 = vmatprep.mubr.msk.f32.mxu0 %vm528_vm3, %v10158_v35  ;;  %v10180_v35 = vsel %vm1107_vm4, %v1179_v39, %v1181_v61  ;;  %v8628_v39 = vpack.c.bf16 %v1821_v45, %v1820_v53  ;;  %v2088_v61 = vld [vmem:[%s12081_s1 + $0xa0] sm:$0xff] }
  0xf1   : > { %12292 = vst [vmem:[#allocation47_spill] sm:$0xff] %v10180_v35  ;;  %v8632_v51 = vpack.c.bf16 %v2089_v13, %v2088_v61  ;;  %v2353_v45 = vld [vmem:[%s12081_s1 + $0xc0] sm:$0xff]  ;;  %v12293_v13 = vld [vmem:[#allocation10_spill] sm:$0xff] }
  0xf3   : > { %7744 = vmatmul.mubr.msk.f32.gmra.mrb[26].mxu0 %vm528_vm3, %v10167_v37 }
  0xf4   : > { %7746 = vmatprep.mubr.msk.f32.mxu0 %vm528_vm3, %v10171_v10 }
  0xf7   : > { %7747 = vmatmul.mubr.msk.f32.gmra.mrb[28].mxu0 %vm528_vm3, %v10180_v35 }
  0xf8   : > { %7749 = vmatprep.mubr.msk.f32.mxu0 %vm528_vm3, %v10184_v62 }
  0xfb   : > { %7750 = vmatmul.mubr.msk.f32.gmra.mrb[30].mxu0 %vm528_vm3, %v10191_v24 }
  0xfc   : > { %7760 = vmatprep.mubr.msk.f32.mxu0 %vm528_vm3, %v9552_v14  ;;  %v10267_v14 = vld [vmem:[%s9463_s19 + $0x180] sm:$0xff] }
  0xff   : > { %7761 = vmatmul.mubr.msk.f32.vlgmr.msra.gmra.mrb[0].mxu0 %vm528_vm3, %v9555_v15  ;;  %v10274_v15 = vld [vmem:[%s9463_s19 + $0x188] sm:$0xff] }
 0x100   : > { %8627 = vmatpush3.bf16.msra.mxu0 %v10016_v7  ;;  %7763 = vmatprep.mubr.msk.f32.mxu0 %vm528_vm3, %v9566_v22  ;;  %v2090_v7 = vld [vmem:[%s12081_s1 + $0xb0] sm:$0xff] }
 0x101   : > { %8629 = vmatprep.subr.bf16.mxu0 %v8628_v39  ;;  %v8636_v53 = vpack.c.bf16 %v2091_v6, %v2090_v7  ;;  %v12294_v7 = vld [vmem:[#allocation11_spill] sm:$0xff]  ;;  %v12295_v6 = vld [vmem:[#allocation12_spill] sm:$0xff] }
 0x103   : > { %7764 = vmatmul.mubr.msk.f32.gmra.mrb[2].mxu0 %vm528_vm3, %v9569_v23 }
 0x104   : > { %7766 = vmatprep.mubr.msk.f32.mxu0 %vm528_vm3, %v9582_v30  ;;  %8631 = vmatpush3.bf16.msra.mxu0 %v8628_v39  ;;  %v2354_v39 = vld [vmem:[%s12081_s1 + $0xc8] sm:$0xff] }
 0x105   : > { %8633 = vmatprep.subr.bf16.mxu0 %v8632_v51  ;;  %v8640_v61 = vpack.c.bf16 %v2354_v39, %v2353_v45  ;;  %v12298_v45 = vld [vmem:[#allocation15_spill] sm:$0xff]  ;;  %v12299_v39 = vld [vmem:[#allocation16_spill] sm:$0xff] }
 0x107   : > { %7767 = vmatmul.mubr.msk.f32.gmra.mrb[4].mxu0 %vm528_vm3, %v9585_v31 }
 0x108   : > { %7769 = vmatprep.mubr.msk.f32.mxu0 %vm528_vm3, %v9609_v41 }
 0x10b   : > { %7770 = vmatmul.mubr.msk.f32.gmra.mrb[6].mxu0 %vm528_vm3, %v9612_v42 }
 0x10c   : > { %7772 = vmatprep.mubr.msk.f32.mxu0 %vm528_vm3, %v9631_v49 }
 0x10f   : > { %7773 = vmatmul.mubr.msk.f32.gmra.mrb[8].mxu0 %vm528_vm3, %v9634_v50 }
 0x110   : > { %7775 = vmatprep.mubr.msk.f32.mxu0 %vm528_vm3, %v9659_v59 }
 0x113   : > { %7776 = vmatmul.mubr.msk.f32.gmra.mrb[10].mxu0 %vm528_vm3, %v9662_v60 }
 0x114   : > { %7778 = vmatprep.mubr.msk.f32.mxu0 %vm528_vm3, %v9684_v4 }
 0x117   : > { %7779 = vmatmul.mubr.msk.f32.gmra.mrb[12].mxu0 %vm528_vm3, %v9687_v5 }
 0x118   : > { %7781 = vmatprep.mubr.msk.f32.mxu0 %vm528_vm3, %v9706_v17 }
 0x11b   : > { %7782 = vmatmul.mubr.msk.f32.gmra.mrb[14].mxu0 %vm528_vm3, %v9709_v18 }
 0x11c   : > { %7784 = vmatprep.mubr.msk.f32.mxu0 %vm528_vm3, %v9728_v33 }
 0x11f   : > { %7785 = vmatmul.mubr.msk.f32.gmra.mrb[16].mxu0 %vm528_vm3, %v9731_v34 }
 0x120   : > { %7787 = vmatprep.mubr.msk.f32.mxu0 %vm528_vm3, %v9750_v47 }
 0x123   : > { %7788 = vmatmul.mubr.msk.f32.gmra.mrb[18].mxu0 %vm528_vm3, %v9753_v52 }
 0x124   : > { %7790 = vmatprep.mubr.msk.f32.mxu0 %vm528_vm3, %v9772_v2 }
 0x127   : > { %7791 = vmatmul.mubr.msk.f32.gmra.mrb[20].mxu0 %vm528_vm3, %v9775_v9 }
 0x128   : > { %7793 = vmatprep.mubr.msk.f32.mxu0 %vm528_vm3, %v9794_v40 }
 0x12b   : > { %7794 = vmatmul.mubr.msk.f32.gmra.mrb[22].mxu0 %vm528_vm3, %v9797_v56 }
 0x12c   : > { %7796 = vmatprep.mubr.msk.f32.mxu0 %vm528_vm3, %v9816_v12 }
 0x12f   : > { %7797 = vmatmul.mubr.msk.f32.gmra.mrb[24].mxu0 %vm528_vm3, %v9819_v20 }
 0x130   : > { %7799 = vmatprep.mubr.msk.f32.mxu0 %vm528_vm3, %v9838_v44 }
 0x133   : > { %7800 = vmatmul.mubr.msk.f32.gmra.mrb[26].mxu0 %vm528_vm3, %v9841_v57 }
 0x134   : > { %7802 = vmatprep.mubr.msk.f32.mxu0 %vm528_vm3, %v9860_v55 }
 0x137   : > { %7803 = vmatmul.mubr.msk.f32.gmra.mrb[28].mxu0 %vm528_vm3, %v9863_v63 }
 0x138   : > { %7805 = vmatprep.mubr.msk.f32.mxu0 %vm528_vm3, %v10267_v14 }
 0x13b   : > { %7806 = vmatmul.mubr.msk.f32.gmra.mrb[30].mxu0 %vm528_vm3, %v10274_v15 }
 0x13c   : > { %7816 = vmatprep.mubr.msk.f32.mxu0 %vm528_vm3, %v9574_v26  ;;  %v12297_v26 = vld [vmem:[#allocation14_spill] sm:$0xff] }
 0x13f   : > { %7817 = vmatmul.mubr.msk.f32.vlgmr.msra.gmra.mrb[0].mxu0 %vm528_vm3, %v9591_v32  ;;  %v12301_v32 = vld [vmem:[#allocation18_spill] sm:$0xff] }
 0x140   : > { %8635 = vmatpush3.bf16.msra.mxu0 %v8632_v51  ;;  %7819 = vmatprep.mubr.msk.f32.mxu0 %vm528_vm3, %v9601_v36  ;;  %v12296_v51 = vld [vmem:[#allocation13_spill] sm:$0xff] }
 0x141   : > { %8637 = vmatprep.subr.bf16.mxu0 %v8636_v53 }
 0x143   : > { %7820 = vmatmul.mubr.msk.f32.gmra.mrb[2].mxu0 %vm528_vm3, %v9619_v43  ;;  %v12319_v43 = vld [vmem:[#allocation35_spill] sm:$0xff] }
 0x144   : > { %7822 = vmatprep.mubr.msk.f32.mxu0 %vm528_vm3, %v12293_v13  ;;  %8639 = vmatpush3.bf16.msra.mxu0 %v8636_v53  ;;  %v12300_v53 = vld [vmem:[#allocation17_spill] sm:$0xff] }
 0x145   : > { %8641 = vmatprep.subr.bf16.mxu0 %v8640_v61  ;;  %v12316_v13 = vld [vmem:[#allocation33_spill] sm:$0xff] }
 0x147   : > { %7823 = vmatmul.mubr.msk.f32.gmra.mrb[4].mxu0 %vm528_vm3, %v12294_v7  ;;  %v12302_v7 = vld [vmem:[#allocation19_spill] sm:$0xff] }
 0x148   : > { %7825 = vmatprep.mubr.msk.f32.mxu0 %vm528_vm3, %v12295_v6  ;;  %v12303_v6 = vld [vmem:[#allocation20_spill] sm:$0xff] }
 0x14b   : > { %7826 = vmatmul.mubr.msk.f32.gmra.mrb[6].mxu0 %vm528_vm3, %v12296_v51  ;;  %v12310_v51 = vld [vmem:[#allocation27_spill] sm:$0xff] }
 0x14c   : > { %7828 = vmatprep.mubr.msk.f32.mxu0 %vm528_vm3, %v12297_v26  ;;  %v12304_v26 = vld [vmem:[#allocation21_spill] sm:$0xff] }
 0x14f   : > { %7829 = vmatmul.mubr.msk.f32.gmra.mrb[8].mxu0 %vm528_vm3, %v12298_v45  ;;  %v12305_v45 = vld [vmem:[#allocation22_spill] sm:$0xff] }
 0x150   : > { %7831 = vmatprep.mubr.msk.f32.mxu0 %vm528_vm3, %v12299_v39  ;;  %v12306_v39 = vld [vmem:[#allocation23_spill] sm:$0xff] }
 0x153   : > { %7832 = vmatmul.mubr.msk.f32.gmra.mrb[10].mxu0 %vm528_vm3, %v12300_v53  ;;  %v12307_v53 = vld [vmem:[#allocation24_spill] sm:$0xff] }
 0x154   : > { %7834 = vmatprep.mubr.msk.f32.mxu0 %vm528_vm3, %v12301_v32  ;;  %v12308_v32 = vld [vmem:[#allocation25_spill] sm:$0xff] }
 0x157   : > { %7835 = vmatmul.mubr.msk.f32.gmra.mrb[12].mxu0 %vm528_vm3, %v12302_v7  ;;  %v12309_v7 = vld [vmem:[#allocation26_spill] sm:$0xff] }
 0x158   : > { %7837 = vmatprep.mubr.msk.f32.mxu0 %vm528_vm3, %v12303_v6  ;;  %v12311_v6 = vld [vmem:[#allocation28_spill] sm:$0xff] }
 0x15b   : > { %7838 = vmatmul.mubr.msk.f32.gmra.mrb[14].mxu0 %vm528_vm3, %v12304_v26  ;;  %v12312_v26 = vld [vmem:[#allocation29_spill] sm:$0xff] }
 0x15c   : > { %7840 = vmatprep.mubr.msk.f32.mxu0 %vm528_vm3, %v12305_v45  ;;  %v12313_v45 = vld [vmem:[#allocation30_spill] sm:$0xff] }
 0x15f   : > { %7841 = vmatmul.mubr.msk.f32.gmra.mrb[16].mxu0 %vm528_vm3, %v12306_v39  ;;  %v12314_v39 = vld [vmem:[#allocation31_spill] sm:$0xff] }
 0x160   : > { %7843 = vmatprep.mubr.msk.f32.mxu0 %vm528_vm3, %v12307_v53  ;;  %v12315_v53 = vld [vmem:[#allocation32_spill] sm:$0xff] }
 0x163   : > { %7844 = vmatmul.mubr.msk.f32.gmra.mrb[18].mxu0 %vm528_vm3, %v12308_v32  ;;  %v1782_v32 = vrot.slane %v10274_v15, 1 }
 0x164   : > { %7846 = vmatprep.mubr.msk.f32.mxu0 %vm528_vm3, %v12309_v7  ;;  %v1781_v7 = vrot.slane %v10267_v14, 1 }
 0x167   : > { %7847 = vmatmul.mubr.msk.f32.gmra.mrb[20].mxu0 %vm528_vm3, %v12310_v51  ;;  %v387_v51 = vld [vmem:[%s9463_s19 + $0x190] sm:$0x3] }
 0x168   : > { %7849 = vmatprep.mubr.msk.f32.mxu0 %vm528_vm3, %v12311_v6  ;;  %v12317_v6 = vld [vmem:[#allocation34_spill] sm:$0xff] }
 0x16b   : > { %7850 = vmatmul.mubr.msk.f32.gmra.mrb[22].mxu0 %vm528_vm3, %v12312_v26  ;;  %v1784_v26 = vrot.slane %v387_v51, 1 }
 0x16c   : > { %7852 = vmatprep.mubr.msk.f32.mxu0 %vm528_vm3, %v12313_v45  ;;  %v10352_v45 = vsel %vm443_vm2, %v1781_v7, %v1782_v32 }
 0x16d   : > { %12318 = vst [vmem:[#allocation48_spill] sm:$0xff] %v10352_v45 }
 0x16f   : > { %7853 = vmatmul.mubr.msk.f32.gmra.mrb[24].mxu0 %vm528_vm3, %v12314_v39 }
 0x170   : > { %7855 = vmatprep.mubr.msk.f32.mxu0 %vm528_vm3, %v12315_v53  ;;  %v10359_v53 = vsel %vm443_vm2, %v1782_v32, %v1784_v26  ;;  %v2626_v26 = vld [vmem:[%s12081_s1 + $0xe0] sm:$0xff]  ;;  %v2627_v32 = vld [vmem:[%s12081_s1 + $0xe8] sm:$0xff] }
 0x171   : > { %12320 = vst [vmem:[#allocation49_spill] sm:$0xff] %v10359_v53 }
 0x173   : > { %7856 = vmatmul.mubr.msk.f32.gmra.mrb[26].mxu0 %vm528_vm3, %v12316_v13  ;;  %v2355_v13 = vld [vmem:[%s12081_s1 + $0xd0] sm:$0xff] }
 0x174   : > { %7858 = vmatprep.mubr.msk.f32.mxu0 %vm528_vm3, %v12317_v6  ;;  %v2356_v6 = vld [vmem:[%s12081_s1 + $0xd8] sm:$0xff] }
 0x175   : > { %v8644_v7 = vpack.c.bf16 %v2356_v6, %v2355_v13  ;;  %v12324_v13 = vld [vmem:[#allocation39_spill] sm:$0xff]  ;;  %v12325_v6 = vld [vmem:[#allocation40_spill] sm:$0xff] }
 0x177   : > { %7859 = vmatmul.mubr.msk.f32.gmra.mrb[28].mxu0 %vm528_vm3, %v12319_v43 }
 0x178   : > { %7861 = vmatprep.mubr.msk.f32.mxu0 %vm528_vm3, %v10352_v45 }
 0x17b   : > { %7862 = vmatmul.mubr.msk.f32.gmra.mrb[30].mxu0 %vm528_vm3, %v10359_v53  ;;  %v8648_v53 = vpack.c.bf16 %v2627_v32, %v2626_v26  ;;  %v12327_v26 = vld [vmem:[#allocation43_spill] sm:$0xff]  ;;  %v12328_v32 = vld [vmem:[#allocation45_spill] sm:$0xff] }
 0x17c   : > { %7872 = vmatprep.mubr.msk.f32.mxu0 %vm528_vm3, %v9994_v54  ;;  %v12321_v54 = vld [vmem:[#allocation36_spill] sm:$0xff] }
 0x17f   : > { %7873 = vmatmul.mubr.msk.f32.vlgmr.msra.gmra.mrb[0].mxu0 %vm528_vm3, %v10008_v21  ;;  %v12322_v21 = vld [vmem:[#allocation37_spill] sm:$0xff] }
 0x180   : > { %8643 = vmatpush3.bf16.msra.mxu0 %v8640_v61  ;;  %7875 = vmatprep.mubr.msk.f32.mxu0 %vm528_vm3, %v10012_v0  ;;  %v12323_v61 = vld [vmem:[#allocation38_spill] sm:$0xff] }
 0x181   : > { %8645 = vmatprep.subr.bf16.mxu0 %v8644_v7 }
 0x183   : > { %7876 = vmatmul.mubr.msk.f32.gmra.mrb[2].mxu0 %vm528_vm3, %v10023_v27 }
 0x184   : > { %7878 = vmatprep.mubr.msk.f32.mxu0 %vm528_vm3, %v10027_v8  ;;  %8647 = vmatpush3.bf16.msra.mxu0 %v8644_v7  ;;  %v12326_v7 = vld [vmem:[#allocation42_spill] sm:$0xff] }
 0x185   : > { %8649 = vmatprep.subr.bf16.mxu0 %v8648_v53 }
 0x187   : > { %7879 = vmatmul.mubr.msk.f32.gmra.mrb[4].mxu0 %vm528_vm3, %v10037_v19 }
 0x188   : > { %7881 = vmatprep.mubr.msk.f32.mxu0 %vm528_vm3, %v10041_v38 }
 0x18b   : > { %7882 = vmatmul.mubr.msk.f32.gmra.mrb[6].mxu0 %vm528_vm3, %v10050_v25 }
 0x18c   : > { %7884 = vmatprep.mubr.msk.f32.mxu0 %vm528_vm3, %v10054_v48 }
 0x18f   : > { %7885 = vmatmul.mubr.msk.f32.gmra.mrb[8].mxu0 %vm528_vm3, %v10063_v29 }
 0x190   : > { %7887 = vmatprep.mubr.msk.f32.mxu0 %vm528_vm3, %v12321_v54 }
 0x193   : > { %7888 = vmatmul.mubr.msk.f32.gmra.mrb[10].mxu0 %vm528_vm3, %v10076_v11 }
 0x194   : > { %7890 = vmatprep.mubr.msk.f32.mxu0 %vm528_vm3, %v12322_v21 }
 0x197   : > { %7891 = vmatmul.mubr.msk.f32.gmra.mrb[12].mxu0 %vm528_vm3, %v10089_v58 }
 0x198   : > { %7893 = vmatprep.mubr.msk.f32.mxu0 %vm528_vm3, %v12323_v61 }
 0x19b   : > { %7894 = vmatmul.mubr.msk.f32.gmra.mrb[14].mxu0 %vm528_vm3, %v10102_v3 }
 0x19c   : > { %7896 = vmatprep.mubr.msk.f32.mxu0 %vm528_vm3, %v12324_v13 }
 0x19f   : > { %7897 = vmatmul.mubr.msk.f32.gmra.mrb[16].mxu0 %vm528_vm3, %v10115_v16 }
 0x1a0   : > { %7899 = vmatprep.mubr.msk.f32.mxu0 %vm528_vm3, %v12325_v6 }
 0x1a3   : > { %7900 = vmatmul.mubr.msk.f32.gmra.mrb[18].mxu0 %vm528_vm3, %v10128_v28  ;;  %v2084_v28 = vrot.slane %v10274_v15, 2 }
 0x1a4   : > { %7902 = vmatprep.mubr.msk.f32.mxu0 %vm528_vm3, %v12326_v7  ;;  %v2083_v7 = vrot.slane %v10267_v14, 2 }
 0x1a7   : > { %7903 = vmatmul.mubr.msk.f32.gmra.mrb[20].mxu0 %vm528_vm3, %v10141_v46 }
 0x1a8   : > { %7905 = vmatprep.mubr.msk.f32.mxu0 %vm528_vm3, %v12327_v26  ;;  %v10436_v26 = vsel %vm1107_vm4, %v2083_v7, %v2084_v28 }
 0x1ab   : > { %7906 = vmatmul.mubr.msk.f32.gmra.mrb[22].mxu0 %vm528_vm3, %v10154_v1  ;;  %v2086_v1 = vrot.slane %v387_v51, 2  ;;  %v2629_v51 = vld [vmem:[%s12081_s1 + $0xf8] sm:$0xff] }
 0x1ac   : > { %7908 = vmatprep.mubr.msk.f32.mxu0 %vm528_vm3, %v12328_v32 }
 0x1af   : > { %7909 = vmatmul.mubr.msk.f32.gmra.mrb[24].mxu0 %vm528_vm3, %v10167_v37 }
 0x1b0   : > { %7911 = vmatprep.mubr.msk.f32.mxu0 %vm528_vm3, %v10171_v10  ;;  %v10443_v10 = vsel %vm1107_vm4, %v2084_v28, %v2086_v1  ;;  %v2896_v28 = vld [vmem:[%s12081_s1 + $0x100] sm:$0xff]  ;;  %v2897_v1 = vld [vmem:[%s12081_s1 + $0x108] sm:$0xff] }
 0x1b1   : > { %12329 = vst [vmem:[#allocation36_spill] sm:$0xff] %v10443_v10 }
 0x1b3   : > { %7912 = vmatmul.mubr.msk.f32.gmra.mrb[26].mxu0 %vm528_vm3, %v10180_v35  ;;  %v2628_v35 = vld [vmem:[%s12081_s1 + $0xf0] sm:$0xff] }
 0x1b4   : > { %7914 = vmatprep.mubr.msk.f32.mxu0 %vm528_vm3, %v10184_v62  ;;  %v8652_v7 = vpack.c.bf16 %v2629_v51, %v2628_v35  ;;  %v12353_v35 = vld [vmem:[#allocation33_spill] sm:$0xff] }
 0x1b7   : > { %7915 = vmatmul.mubr.msk.f32.gmra.mrb[28].mxu0 %vm528_vm3, %v10191_v24 }
 0x1b8   : > { %7917 = vmatprep.mubr.msk.f32.mxu0 %vm528_vm3, %v10436_v26 }
 0x1bb   : > { %7918 = vmatmul.mubr.msk.f32.gmra.mrb[30].mxu0 %vm528_vm3, %v10443_v10  ;;  %v8656_v10 = vpack.c.bf16 %v2897_v1, %v2896_v28  ;;  %v12355_v28 = vld [vmem:[#allocation49_spill] sm:$0xff] }
 0x1bc   : > { %7928 = vmatprep.mubr.msk.f32.mxu0 %vm528_vm3, %v9566_v22  ;;  %v10518_v22 = vld [vmem:[%s9463_s19 + $0x198] sm:$0xff] }
 0x1bf   : > { %7929 = vmatmul.mubr.msk.f32.vlgmr.msra.gmra.mrb[0].mxu0 %vm528_vm3, %v9569_v23  ;;  %v10525_v23 = vld [vmem:[%s9463_s19 + $0x1a0] sm:$0xff] }
 0x1c0   : > { %8651 = vmatpush3.bf16.msra.mxu0 %v8648_v53  ;;  %7931 = vmatprep.mubr.msk.f32.mxu0 %vm528_vm3, %v9582_v30  ;;  %v2898_v30 = vld [vmem:[%s12081_s1 + $0x110] sm:$0xff]  ;;  %v390_v53 = vld [vmem:[%s9463_s19 + $0x1a8] sm:$0x3]  ;;  %s12029_s19 = scalar_lea.hbm %s12087_s7, %s6935_s23 }
 0x1c1   : > { %8653 = vmatprep.subr.bf16.mxu0 %v8652_v7  ;;  %v2624_v51 = vrot.slane %v390_v53, 1 }
 0x1c3   : > { %7932 = vmatmul.mubr.msk.f32.gmra.mrb[2].mxu0 %vm528_vm3, %v9585_v31  ;;  %v2899_v31 = vld [vmem:[%s12081_s1 + $0x118] sm:$0xff] }
 0x1c4   : > { %7934 = vmatprep.mubr.msk.f32.mxu0 %vm528_vm3, %v9609_v41  ;;  %8655 = vmatpush3.bf16.msra.mxu0 %v8652_v7  ;;  %v8660_v41 = vpack.c.bf16 %v2899_v31, %v2898_v30  ;;  %v3358_v31 = vld [vmem:[%s12084_s4] sm:$0xff] }
 0x1c5   : > { %8657 = vmatprep.subr.bf16.mxu0 %v8656_v10 }
 0x1c7   : > { %7935 = vmatmul.mubr.msk.f32.gmra.mrb[4].mxu0 %vm528_vm3, %v9612_v42  ;;  %v12330_v42 = vld [vmem:[#allocation9_spill] sm:$0xff] }
 0x1c8   : > { %7937 = vmatprep.mubr.msk.f32.mxu0 %vm528_vm3, %v9631_v49  ;;  %v12331_v49 = vld [vmem:[#allocation10_spill] sm:$0xff] }
 0x1cb   : > { %7938 = vmatmul.mubr.msk.f32.gmra.mrb[6].mxu0 %vm528_vm3, %v9634_v50  ;;  %v12332_v50 = vld [vmem:[#allocation11_spill] sm:$0xff] }
 0x1cc   : > { %7940 = vmatprep.mubr.msk.f32.mxu0 %vm528_vm3, %v9659_v59  ;;  %v12334_v59 = vld [vmem:[#allocation13_spill] sm:$0xff] }
 0x1cf   : > { %7941 = vmatmul.mubr.msk.f32.gmra.mrb[8].mxu0 %vm528_vm3, %v9662_v60  ;;  %v12335_v60 = vld [vmem:[#allocation14_spill] sm:$0xff] }
 0x1d0   : > { %7943 = vmatprep.mubr.msk.f32.mxu0 %vm528_vm3, %v9684_v4  ;;  %v12336_v4 = vld [vmem:[#allocation15_spill] sm:$0xff] }
 0x1d3   : > { %7944 = vmatmul.mubr.msk.f32.gmra.mrb[10].mxu0 %vm528_vm3, %v9687_v5  ;;  %v12337_v5 = vld [vmem:[#allocation16_spill] sm:$0xff] }
 0x1d4   : > { %7946 = vmatprep.mubr.msk.f32.mxu0 %vm528_vm3, %v9706_v17  ;;  %v12338_v17 = vld [vmem:[#allocation17_spill] sm:$0xff] }
 0x1d7   : > { %7947 = vmatmul.mubr.msk.f32.gmra.mrb[12].mxu0 %vm528_vm3, %v9709_v18  ;;  %v12339_v18 = vld [vmem:[#allocation18_spill] sm:$0xff] }
 0x1d8   : > { %7949 = vmatprep.mubr.msk.f32.mxu0 %vm528_vm3, %v9728_v33  ;;  %v12340_v33 = vld [vmem:[#allocation19_spill] sm:$0xff] }
 0x1db   : > { %7950 = vmatmul.mubr.msk.f32.gmra.mrb[14].mxu0 %vm528_vm3, %v9731_v34  ;;  %v12341_v34 = vld [vmem:[#allocation20_spill] sm:$0xff] }
 0x1dc   : > { %7952 = vmatprep.mubr.msk.f32.mxu0 %vm528_vm3, %v9750_v47  ;;  %v12342_v47 = vld [vmem:[#allocation21_spill] sm:$0xff] }
 0x1df   : > { %7953 = vmatmul.mubr.msk.f32.gmra.mrb[16].mxu0 %vm528_vm3, %v9753_v52  ;;  %v12343_v52 = vld [vmem:[#allocation22_spill] sm:$0xff] }
 0x1e0   : > { %7955 = vmatprep.mubr.msk.f32.mxu0 %vm528_vm3, %v9772_v2  ;;  %v12345_v2 = vld [vmem:[#allocation24_spill] sm:$0xff] }
 0x1e3   : > { %7956 = vmatmul.mubr.msk.f32.gmra.mrb[18].mxu0 %vm528_vm3, %v9775_v9  ;;  %v12346_v9 = vld [vmem:[#allocation25_spill] sm:$0xff] }
 0x1e4   : > { %7958 = vmatprep.mubr.msk.f32.mxu0 %vm528_vm3, %v9794_v40  ;;  %v12349_v40 = vld [vmem:[#allocation28_spill] sm:$0xff] }
 0x1e7   : > { %7959 = vmatmul.mubr.msk.f32.gmra.mrb[20].mxu0 %vm528_vm3, %v9797_v56  ;;  %v12344_v56 = vld [vmem:[#allocation23_spill] sm:$0xff] }
 0x1e8   : > { %7961 = vmatprep.mubr.msk.f32.mxu0 %vm528_vm3, %v9816_v12  ;;  %v12347_v12 = vld [vmem:[#allocation26_spill] sm:$0xff] }
 0x1eb   : > { %7962 = vmatmul.mubr.msk.f32.gmra.mrb[22].mxu0 %vm528_vm3, %v9819_v20  ;;  %v12348_v20 = vld [vmem:[#allocation27_spill] sm:$0xff] }
 0x1ec   : > { %7964 = vmatprep.mubr.msk.f32.mxu0 %vm528_vm3, %v9838_v44  ;;  %v12350_v44 = vld [vmem:[#allocation29_spill] sm:$0xff] }
 0x1ef   : > { %7965 = vmatmul.mubr.msk.f32.gmra.mrb[24].mxu0 %vm528_vm3, %v9841_v57  ;;  %v12351_v57 = vld [vmem:[#allocation30_spill] sm:$0xff] }
 0x1f0   : > { %7967 = vmatprep.mubr.msk.f32.mxu0 %vm528_vm3, %v9860_v55  ;;  %v12333_v55 = vld [vmem:[#allocation12_spill] sm:$0xff] }
 0x1f3   : > { %7968 = vmatmul.mubr.msk.f32.gmra.mrb[26].mxu0 %vm528_vm3, %v9863_v63  ;;  %v12352_v63 = vld [vmem:[#allocation32_spill] sm:$0xff] }
 0x1f4   : > { %7970 = vmatprep.mubr.msk.f32.mxu0 %vm528_vm3, %v10267_v14  ;;  %v2621_v14 = vrot.slane %v10518_v22, 1 }
 0x1f7   : > { %7971 = vmatmul.mubr.msk.f32.gmra.mrb[28].mxu0 %vm528_vm3, %v10274_v15  ;;  %v2622_v15 = vrot.slane %v10525_v23, 1 }
 0x1f8   : > { %7973 = vmatprep.mubr.msk.f32.mxu0 %vm528_vm3, %v10518_v22 }
 0x1f9   : > { %v2623_v7 = vsel %vm443_vm2, %v2621_v14, %v2622_v15  ;;  %v2625_v1 = vsel %vm443_vm2, %v2622_v15, %v2624_v51  ;;  %v3360_v15 = vld [vmem:[%s12084_s4 + $0x10] sm:$0xff] }
 0x1fb   : > { %7974 = vmatmul.mubr.msk.f32.gmra.mrb[30].mxu0 %vm528_vm3, %v10525_v23 }
 0x1fc   : > { %7984 = vmatprep.mubr.msk.f32.mxu0 %vm528_vm3, %v9601_v36 }
 0x1ff   : > { %7985 = vmatmul.mubr.msk.f32.vlgmr.msra.gmra.mrb[0].mxu0 %vm528_vm3, %v12330_v42 }
 0x200   : > { %8659 = vmatpush3.bf16.msra.mxu0 %v8656_v10  ;;  %7987 = vmatprep.mubr.msk.f32.mxu0 %vm528_vm3, %v12331_v49  ;;  %v12354_v10 = vld [vmem:[#allocation34_spill] sm:$0xff] }
 0x201   : > { %8661 = vmatprep.subr.bf16.mxu0 %v8660_v41 }
 0x203   : > { %7988 = vmatmul.mubr.msk.f32.gmra.mrb[2].mxu0 %vm528_vm3, %v12332_v50 }
 0x204   : > { %7990 = vmatprep.mubr.msk.f32.mxu0 %vm528_vm3, %v12333_v55  ;;  %8663 = vmatpush3.bf16.msra.mxu0 %v8660_v41  ;;  %v3359_v41 = vld [vmem:[%s12084_s4 + $0x8] sm:$0xff] }
 0x205   : > { %v8672_v14 = vpack.c.bf16 %v3359_v41, %v3358_v31 }
 0x207   : > { %7991 = vmatmul.mubr.msk.f32.gmra.mrb[4].mxu0 %vm528_vm3, %v12334_v59 }
 0x208   : > { %7993 = vmatprep.mubr.msk.f32.mxu0 %vm528_vm3, %v12335_v60 }
 0x20b   : > { %7994 = vmatmul.mubr.msk.f32.gmra.mrb[6].mxu0 %vm528_vm3, %v12336_v4 }
 0x20c   : > { %7996 = vmatprep.mubr.msk.f32.mxu0 %vm528_vm3, %v12337_v5 }
 0x20f   : > { %7997 = vmatmul.mubr.msk.f32.gmra.mrb[8].mxu0 %vm528_vm3, %v12338_v17 }
 0x210   : > { %7999 = vmatprep.mubr.msk.f32.mxu0 %vm528_vm3, %v12339_v18 }
 0x213   : > { %8000 = vmatmul.mubr.msk.f32.gmra.mrb[10].mxu0 %vm528_vm3, %v12340_v33 }
 0x214   : > { %8002 = vmatprep.mubr.msk.f32.mxu0 %vm528_vm3, %v12341_v34 }
 0x217   : > { %8003 = vmatmul.mubr.msk.f32.gmra.mrb[12].mxu0 %vm528_vm3, %v12342_v47 }
 0x218   : > { %8005 = vmatprep.mubr.msk.f32.mxu0 %vm528_vm3, %v12343_v52 }
 0x21b   : > { %8006 = vmatmul.mubr.msk.f32.gmra.mrb[14].mxu0 %vm528_vm3, %v12344_v56 }
 0x21c   : > { %8008 = vmatprep.mubr.msk.f32.mxu0 %vm528_vm3, %v12345_v2 }
 0x21f   : > { %8009 = vmatmul.mubr.msk.f32.gmra.mrb[16].mxu0 %vm528_vm3, %v12346_v9 }
 0x220   : > { %8011 = vmatprep.mubr.msk.f32.mxu0 %vm528_vm3, %v12347_v12 }
 0x223   : > { %8012 = vmatmul.mubr.msk.f32.gmra.mrb[18].mxu0 %vm528_vm3, %v12348_v20 }
 0x224   : > { %8014 = vmatprep.mubr.msk.f32.mxu0 %vm528_vm3, %v12349_v40 }
 0x227   : > { %8015 = vmatmul.mubr.msk.f32.gmra.mrb[20].mxu0 %vm528_vm3, %v12350_v44 }
 0x228   : > { %8017 = vmatprep.mubr.msk.f32.mxu0 %vm528_vm3, %v12351_v57 }
 0x22b   : > { %8018 = vmatmul.mubr.msk.f32.gmra.mrb[22].mxu0 %vm528_vm3, %v12314_v39 }
 0x22c   : > { %8020 = vmatprep.mubr.msk.f32.mxu0 %vm528_vm3, %v12352_v63 }
 0x22f   : > { %8021 = vmatmul.mubr.msk.f32.gmra.mrb[24].mxu0 %vm528_vm3, %v12353_v35 }
 0x230   : > { %8023 = vmatprep.mubr.msk.f32.mxu0 %vm528_vm3, %v12354_v10 }
 0x233   : > { %8024 = vmatmul.mubr.msk.f32.gmra.mrb[26].mxu0 %vm528_vm3, %v12319_v43 }
 0x234   : > { %8026 = vmatprep.mubr.msk.f32.mxu0 %vm528_vm3, %v10352_v45 }
 0x237   : > { %8027 = vmatmul.mubr.msk.f32.gmra.mrb[28].mxu0 %vm528_vm3, %v12355_v28 }
 0x238   : > { %8029 = vmatprep.mubr.msk.f32.mxu0 %vm528_vm3, %v2623_v7  ;;  %v4152_v7 = vld [vmem:[%s12084_s4 + $0x40] sm:$0xff] }
 0x23b   : > { %8030 = vmatmul.mubr.msk.f32.gmra.mrb[30].mxu0 %vm528_vm3, %v2625_v1  ;;  %v4153_v1 = vld [vmem:[%s12084_s4 + $0x48] sm:$0xff] }
 0x23c   : > { %8040 = vmatprep.mubr.msk.f32.mxu0 %vm528_vm3, %v10012_v0  ;;  %v12356_v0 = vld [vmem:[#allocation41_spill] sm:$0xff] }
 0x23f   : > { %8041 = vmatmul.mubr.msk.f32.vlgmr.msra.gmra.mrb[0].mxu0 %vm528_vm3, %v10023_v27  ;;  %v12357_v27 = vld [vmem:[#allocation42_spill] sm:$0xff] }
 0x240   : > { %8043 = vmatprep.mubr.msk.f32.mxu0 %vm528_vm3, %v10027_v8  ;;  %v12358_v8 = vld [vmem:[#allocation43_spill] sm:$0xff] }
 0x243   : > { %8044 = vmatmul.mubr.msk.f32.gmra.mrb[2].mxu0 %vm528_vm3, %v10037_v19  ;;  %v12359_v19 = vld [vmem:[#allocation44_spill] sm:$0xff] }
 0x244   : > { %8046 = vmatprep.mubr.msk.f32.mxu0 %vm528_vm3, %v10041_v38  ;;  %v12360_v38 = vld [vmem:[#allocation46_spill] sm:$0xff] }
 0x247   : > { %8047 = vmatmul.mubr.msk.f32.gmra.mrb[4].mxu0 %vm528_vm3, %v10050_v25  ;;  %v12361_v25 = vld [vmem:[#allocation47_spill] sm:$0xff] }
 0x248   : > { %8049 = vmatprep.mubr.msk.f32.mxu0 %vm528_vm3, %v10054_v48  ;;  %v2891_v48 = vrot.slane %v10518_v22, 2 }
 0x24b   : > { %8050 = vmatmul.mubr.msk.f32.gmra.mrb[6].mxu0 %vm528_vm3, %v10063_v29  ;;  %v2892_v29 = vrot.slane %v10525_v23, 2 }
 0x24c   : > { %8052 = vmatprep.mubr.msk.f32.mxu0 %vm528_vm3, %v12321_v54  ;;  %v3493_v54 = vld [vmem:[%s12084_s4 + $0x38] sm:$0xff] }
 0x24f   : > { %8053 = vmatmul.mubr.msk.f32.gmra.mrb[8].mxu0 %vm528_vm3, %v10076_v11  ;;  %v2893_v11 = vsel %vm1107_vm4, %v2891_v48, %v2892_v29 }
 0x250   : > { %8055 = vmatprep.mubr.msk.f32.mxu0 %vm528_vm3, %v12322_v21 }
 0x253   : > { %8056 = vmatmul.mubr.msk.f32.gmra.mrb[10].mxu0 %vm528_vm3, %v10089_v58  ;;  %v2894_v58 = vrot.slane %v390_v53, 2  ;;  %v3361_v53 = vld [vmem:[%s12084_s4 + $0x18] sm:$0xff] }
 0x254   : > { %8058 = vmatprep.mubr.msk.f32.mxu0 %vm528_vm3, %v12323_v61  ;;  %v10680_v61 = vld [vmem:[#allocation2] sm:$0xff]  ;;  %v8676_v51 = vpack.c.bf16 %v3361_v53, %v3360_v15 }
 0x257   : > { %8059 = vmatmul.mubr.msk.f32.gmra.mrb[12].mxu0 %vm528_vm3, %v10102_v3  ;;  %v12362_v3 = vld [vmem:[#allocation36_spill] sm:$0xff] }
 0x258   : > { %8061 = vmatprep.mubr.msk.f32.mxu0 %vm528_vm3, %v12324_v13  ;;  %v10682_v13 = vld [vmem:[#allocation2 + $0x8] sm:$0xff] }
 0x25b   : > { %8062 = vmatmul.mubr.msk.f32.gmra.mrb[14].mxu0 %vm528_vm3, %v10115_v16  ;;  %v2895_v16 = vsel %vm1107_vm4, %v2892_v29, %v2894_v58 }
 0x25c   : > { %8064 = vmatprep.mubr.msk.f32.mxu0 %vm528_vm3, %v12325_v6  ;;  %v3410_v6 = vrot.slane %v10680_v61, 1 }
 0x25f   : > { %8065 = vmatmul.mubr.msk.f32.gmra.mrb[16].mxu0 %vm528_vm3, %v12356_v0  ;;  %v10711_v0 = vpack.c.bf16 %v4153_v1, %v4152_v7 }
 0x260   : > { %8067 = vmatprep.mubr.msk.f32.mxu0 %vm528_vm3, %v12357_v27  ;;  %v10717_v27 = vld [vmem:[%s12082_s2] ss:$0 sm:$0xff] }
 0x263   : > { %8068 = vmatmul.mubr.msk.f32.gmra.mrb[18].mxu0 %vm528_vm3, %v10141_v46  ;;  %v3490_v46 = vld [vmem:[%s12084_s4 + $0x20] sm:$0xff] }
 0x264   : > { %8070 = vmatprep.mubr.msk.f32.mxu0 %vm528_vm3, %v12358_v8 }
 0x267   : > { %8071 = vmatmul.mubr.msk.f32.gmra.mrb[20].mxu0 %vm528_vm3, %v12359_v19  ;;  %v10722_v19 = vld [vmem:[%s12083_s3] ss:$0 sm:$0xff] }
 0x268   : > { %8073 = vmatprep.mubr.msk.f32.mxu0 %vm528_vm3, %v12328_v32  ;;  %v10686_v32 = vld [vmem:[#allocation2 + $0x10] sm:$0x3] }
 0x269   : > { %v3413_v22 = vrot.slane %v10686_v32, 1 }
 0x26b   : > { %8074 = vmatmul.mubr.msk.f32.gmra.mrb[22].mxu0 %vm528_vm3, %v10167_v37  ;;  %v3491_v37 = vld [vmem:[%s12084_s4 + $0x28] sm:$0xff] }
 0x26c   : > { %8076 = vmatprep.mubr.msk.f32.mxu0 %vm528_vm3, %v12360_v38 }
 0x26f   : > { %8077 = vmatmul.mubr.msk.f32.gmra.mrb[24].mxu0 %vm528_vm3, %v12361_v25 }
 0x270   : > { %8079 = vmatprep.mubr.msk.f32.mxu0 %vm528_vm3, %v10184_v62  ;;  %v8664_v62 = vpack.c.bf16 %v3491_v37, %v3490_v46 }
 0x272   : > { %8665 = vmatprep.subr.bf16.mxu1 %v8664_v62 }
 0x273   : > { %8080 = vmatmul.mubr.msk.f32.gmra.mrb[26].mxu0 %vm528_vm3, %v10191_v24  ;;  %8667 = vmatpush3.bf16.msra.mxu1 %v8664_v62  ;;  %v3492_v24 = vld [vmem:[%s12084_s4 + $0x30] sm:$0xff] }
 0x274   : > { %8082 = vmatprep.mubr.msk.f32.mxu0 %vm528_vm3, %v10436_v26  ;;  %v8668_v21 = vpack.c.bf16 %v3493_v54, %v3492_v24  ;;  %v3411_v26 = vrot.slane %v10682_v13, 1 }
 0x276   : > { %8669 = vmatprep.subr.bf16.mxu1 %v8668_v21  ;;  %v3412_v23 = vsel %vm443_vm2, %v3410_v6, %v3411_v26  ;;  %v3414_v30 = vsel %vm443_vm2, %v3411_v26, %v3413_v22 }
 0x277   : > { %8083 = vmatmul.mubr.msk.f32.gmra.mrb[28].mxu0 %vm528_vm3, %v12362_v3  ;;  %8671 = vmatpush3.bf16.msra.mxu1 %v8668_v21 }
 0x278   : > { %8085 = vmatprep.mubr.msk.f32.mxu0 %vm528_vm3, %v2893_v11  ;;  %8096 = vmatprep.mubr.msk.f32.mxu1 %vm528_vm3, %v3412_v23 }
 0x279   : > { %8673 = vmatprep.subr.bf16.mxu1 %v8672_v14 }
 0x27a   : > { %8097 = vmatmul.mubr.msk.f32.vlgmr.msra.gmra.mrb[0].mxu1 %vm528_vm3, %v3414_v30 }
 0x27b   : > { %8086 = vmatmul.mubr.msk.f32.gmra.mrb[30].mxu0 %vm528_vm3, %v2895_v16  ;;  %8675 = vmatpush3.bf16.msra.mxu1 %v8672_v14 }
 0x27c   : > { %8677 = vmatprep.subr.bf16.mxu1 %v8676_v51 }
 0x27f   : > { %8679 = vmatpush3.bf16.msra.mxu1 %v8676_v51 }
 0x280   : > { %8681 = vmatprep.subr.bf16.mxu1 %v10711_v0 }
 0x312   : > { %v8042_v8 = vpop.f32.mrb[0].mxu0 }
 0x313   : > { %v3169_v38 = vmul.f32 %v8042_v8, %v10717_v27  ;;  %v2970_v25 = vpop.f32.mrb[1].mxu0 }
 0x314   : > { %v3168_v48 = vmul.f32 %v10717_v27, %v2970_v25 }
 0x315   : > { %v3208_v29 = vadd.f32 %v10722_v19, %v3169_v38 }
 0x316   : > { %v3207_v58 = vadd.f32 %v10722_v19, %v3168_v48  ;;  %v8045_v11 = vpop.f32.mrb[2].mxu0 }
 0x317   : > { %v3240_v3 = vmax.f32 %v3208_v29, 0.0  ;;  %v3171_v16 = vmul.f32 %v8045_v11, %v10717_v27  ;;  %v2980_v46 = vpop.f32.mrb[3].mxu0 }
 0x318   : > { %v3239_v37 = vmax.f32 %v3207_v58, 0.0  ;;  %v3170_v62 = vmul.f32 %v10717_v27, %v2980_v46 }
 0x319   : > { %3273 = vst.msk [vmem:[#allocation2 + $0x21] sm:$0xff] %vm528_vm3, %v3240_v3  ;;  %v3210_v24 = vadd.f32 %v10722_v19, %v3171_v16 }
 0x31a   : > { %3272 = vst.msk [vmem:[#allocation2 + $0x19] sm:$0xff] %vm528_vm3, %v3239_v37  ;;  %v3209_v54 = vadd.f32 %v10722_v19, %v3170_v62  ;;  %v8048_v21 = vpop.f32.mrb[4].mxu0 }
 0x31b   : > { %v3242_v6 = vmax.f32 %v3210_v24, 0.0  ;;  %v3173_v26 = vmul.f32 %v8048_v21, %v10717_v27  ;;  %v2990_v22 = vpop.f32.mrb[5].mxu0 }
 0x31c   : > { %v3241_v23 = vmax.f32 %v3209_v54, 0.0  ;;  %v3172_v30 = vmul.f32 %v10717_v27, %v2990_v22 }
 0x31d   : > { %3275 = vst.msk [vmem:[#allocation2 + $0x39] sm:$0xff] %vm528_vm3, %v3242_v6  ;;  %v3212_v31 = vadd.f32 %v10722_v19, %v3173_v26 }
 0x31e   : > { %3274 = vst.msk [vmem:[#allocation2 + $0x31] sm:$0xff] %vm528_vm3, %v3241_v23  ;;  %v3211_v41 = vadd.f32 %v10722_v19, %v3172_v30  ;;  %v8051_v14 = vpop.f32.mrb[6].mxu0 }
 0x31f   : > { %v3244_v15 = vmax.f32 %v3212_v31, 0.0  ;;  %v3175_v53 = vmul.f32 %v8051_v14, %v10717_v27  ;;  %v3000_v51 = vpop.f32.mrb[7].mxu0 }
 0x320   : > { %v3243_v7 = vmax.f32 %v3211_v41, 0.0  ;;  %v3174_v1 = vmul.f32 %v10717_v27, %v3000_v51  ;;  %v10742_v8 = vld [vmem:[#allocation2 + $0x28] sm:$0x3] }
 0x321   : > { %3277 = vst.msk [vmem:[#allocation2 + $0x51] sm:$0xff] %vm528_vm3, %v3244_v15  ;;  %v3214_v38 = vadd.f32 %v10722_v19, %v3175_v53  ;;  %v10746_v25 = vld [vmem:[#allocation2 + $0x18] sm:$0xff]  ;;  %v10748_v48 = vld [vmem:[#allocation2 + $0x20] sm:$0xff]  ;;  %v3418_v29 = vrot.slane %v10742_v8, 1 }
 0x322   : > { %3276 = vst.msk [vmem:[#allocation2 + $0x49] sm:$0xff] %vm528_vm3, %v3243_v7  ;;  %v3213_v58 = vadd.f32 %v10722_v19, %v3174_v1  ;;  %v8054_v11 = vpop.f32.mrb[8].mxu0  ;;  %v3415_v3 = vrot.slane %v10746_v25, 1  ;;  %v3416_v16 = vrot.slane %v10748_v48, 1 }
 0x323   : > { %v3246_v46 = vmax.f32 %v3214_v38, 0.0  ;;  %v3177_v37 = vmul.f32 %v8054_v11, %v10717_v27  ;;  %v3010_v62 = vpop.f32.mrb[9].mxu0 }
 0x324   : > { %v3245_v24 = vmax.f32 %v3213_v58, 0.0  ;;  %v3176_v54 = vmul.f32 %v10717_v27, %v3010_v62  ;;  %v10758_v21 = vsel %vm443_vm2, %v3415_v3, %v3416_v16  ;;  %v10761_v6 = vsel %vm443_vm2, %v3416_v16, %v3418_v29  ;;  %v10763_v26 = vld [vmem:[#allocation2 + $0x40] sm:$0x3] }
 0x325   : > { %3279 = vst.msk [vmem:[#allocation2 + $0x69] sm:$0xff] %vm528_vm3, %v3246_v46  ;;  %v3216_v22 = vadd.f32 %v10722_v19, %v3177_v37  ;;  %8099 = vmatprep.mubr.msk.f32.mxu1 %vm528_vm3, %v10758_v21  ;;  %v10769_v23 = vld [vmem:[#allocation2 + $0x30] sm:$0xff]  ;;  %v10771_v30 = vld [vmem:[#allocation2 + $0x38] sm:$0xff]  ;;  %v3423_v31 = vrot.slane %v10763_v26, 1 }
 0x326   : > { %3278 = vst.msk [vmem:[#allocation2 + $0x61] sm:$0xff] %vm528_vm3, %v3245_v24  ;;  %v3215_v41 = vadd.f32 %v10722_v19, %v3176_v54  ;;  %v8057_v14 = vpop.f32.mrb[10].mxu0  ;;  %8100 = vmatmul.mubr.msk.f32.gmra.mrb[2].mxu1 %vm528_vm3, %v10761_v6  ;;  %v3420_v15 = vrot.slane %v10769_v23, 1  ;;  %v3421_v53 = vrot.slane %v10771_v30, 1 }
 0x327   : > { %v3248_v51 = vmax.f32 %v3216_v22, 0.0  ;;  %v3179_v7 = vmul.f32 %v8057_v14, %v10717_v27  ;;  %v3020_v1 = vpop.f32.mrb[11].mxu0 }
 0x328   : > { %v3247_v38 = vmax.f32 %v3215_v41, 0.0  ;;  %v3178_v29 = vmul.f32 %v10717_v27, %v3020_v1  ;;  %v10783_v58 = vsel %vm443_vm2, %v3420_v15, %v3421_v53  ;;  %v10786_v11 = vsel %vm443_vm2, %v3421_v53, %v3423_v31  ;;  %v10788_v3 = vld [vmem:[#allocation2 + $0x58] sm:$0x3] }
 0x329   : > { %3281 = vst.msk [vmem:[#allocation2 + $0x81] sm:$0xff] %vm528_vm3, %v3248_v51  ;;  %v3218_v16 = vadd.f32 %v10722_v19, %v3179_v7  ;;  %8102 = vmatprep.mubr.msk.f32.mxu1 %vm528_vm3, %v10783_v58  ;;  %v10794_v46 = vld [vmem:[#allocation2 + $0x48] sm:$0xff]  ;;  %v10796_v37 = vld [vmem:[#allocation2 + $0x50] sm:$0xff]  ;;  %v3428_v62 = vrot.slane %v10788_v3, 1 }
 0x32a   : > { %3280 = vst.msk [vmem:[#allocation2 + $0x79] sm:$0xff] %vm528_vm3, %v3247_v38  ;;  %v3217_v24 = vadd.f32 %v10722_v19, %v3178_v29  ;;  %v8060_v54 = vpop.f32.mrb[12].mxu0  ;;  %8103 = vmatmul.mubr.msk.f32.gmra.mrb[4].mxu1 %vm528_vm3, %v10786_v11  ;;  %v3425_v22 = vrot.slane %v10794_v46, 1  ;;  %v3426_v31 = vrot.slane %v10796_v37, 1 }
 0x32b   : > { %v3250_v41 = vmax.f32 %v3218_v16, 0.0  ;;  %v3181_v14 = vmul.f32 %v8060_v54, %v10717_v27  ;;  %v3030_v15 = vpop.f32.mrb[13].mxu0 }
 0x32c   : > { %v3249_v53 = vmax.f32 %v3217_v24, 0.0  ;;  %v3180_v51 = vmul.f32 %v10717_v27, %v3030_v15  ;;  %v10808_v7 = vsel %vm443_vm2, %v3425_v22, %v3426_v31  ;;  %v10811_v1 = vsel %vm443_vm2, %v3426_v31, %v3428_v62  ;;  %v10813_v38 = vld [vmem:[#allocation2 + $0x70] sm:$0x3] }
 0x32d   : > { %12363 = vst [vmem:[#allocation37_spill] sm:$0xff] %v10811_v1  ;;  %3283 = vst.msk [vmem:[#allocation2 + $0x99] sm:$0xff] %vm528_vm3, %v3250_v41  ;;  %v3220_v29 = vadd.f32 %v10722_v19, %v3181_v14  ;;  %8105 = vmatprep.mubr.msk.f32.mxu1 %vm528_vm3, %v10808_v7  ;;  %v10819_v16 = vld [vmem:[#allocation2 + $0x60] sm:$0xff]  ;;  %v10821_v24 = vld [vmem:[#allocation2 + $0x68] sm:$0xff]  ;;  %v3433_v54 = vrot.slane %v10813_v38, 1 }
 0x32e   : > { %3282 = vst.msk [vmem:[#allocation2 + $0x91] sm:$0xff] %vm528_vm3, %v3249_v53  ;;  %v3219_v62 = vadd.f32 %v10722_v19, %v3180_v51  ;;  %v8063_v22 = vpop.f32.mrb[14].mxu0  ;;  %8106 = vmatmul.mubr.msk.f32.gmra.mrb[6].mxu1 %vm528_vm3, %v10811_v1  ;;  %v3430_v31 = vrot.slane %v10819_v16, 1  ;;  %v3431_v41 = vrot.slane %v10821_v24, 1 }
 0x32f   : > { %v3252_v14 = vmax.f32 %v3220_v29, 0.0  ;;  %v3183_v15 = vmul.f32 %v8063_v22, %v10717_v27  ;;  %v3040_v45 = vpop.f32.mrb[15].mxu0 }
 0x330   : > { %v3251_v28 = vmax.f32 %v3219_v62, 0.0  ;;  %v3182_v10 = vmul.f32 %v10717_v27, %v3040_v45  ;;  %v10833_v43 = vsel %vm443_vm2, %v3430_v31, %v3431_v41  ;;  %v10836_v53 = vsel %vm443_vm2, %v3431_v41, %v3433_v54  ;;  %v10838_v51 = vld [vmem:[#allocation2 + $0x88] sm:$0x3] }
 0x331   : > { %12364 = vst [vmem:[#allocation38_spill] sm:$0xff] %v10833_v43  ;;  %12365 = vst [vmem:[#allocation39_spill] sm:$0xff] %v10836_v53  ;;  %v3222_v63 = vadd.f32 %v10722_v19, %v3183_v15  ;;  %8108 = vmatprep.mubr.msk.f32.mxu1 %vm528_vm3, %v10833_v43  ;;  %v10844_v29 = vld [vmem:[#allocation2 + $0x78] sm:$0xff]  ;;  %v10846_v62 = vld [vmem:[#allocation2 + $0x80] sm:$0xff]  ;;  %v3438_v45 = vrot.slane %v10838_v51, 1 }
 0x332   : > { %3285 = vst.msk [vmem:[#allocation2 + $0xb1] sm:$0xff] %vm528_vm3, %v3252_v14  ;;  %3284 = vst.msk [vmem:[#allocation2 + $0xa9] sm:$0xff] %vm528_vm3, %v3251_v28  ;;  %v3221_v54 = vadd.f32 %v10722_v19, %v3182_v10  ;;  %v8066_v22 = vpop.f32.mrb[16].mxu0  ;;  %8109 = vmatmul.mubr.msk.f32.gmra.mrb[8].mxu1 %vm528_vm3, %v10836_v53  ;;  %v3435_v31 = vrot.slane %v10844_v29, 1  ;;  %v3436_v41 = vrot.slane %v10846_v62, 1  ;;  %v4751_v43 = vld [vmem:[%s12084_s4 + $0x88] sm:$0xff] }
 0x333   : > { %v3254_v14 = vmax.f32 %v3222_v63, 0.0  ;;  %v3185_v15 = vmul.f32 %v8066_v22, %v10717_v27  ;;  %v3050_v35 = vpop.f32.mrb[17].mxu0 }
 0x334   : > { %v3253_v57 = vmax.f32 %v3221_v54, 0.0  ;;  %v3184_v39 = vmul.f32 %v10717_v27, %v3050_v35  ;;  %v10858_v40 = vsel %vm443_vm2, %v3435_v31, %v3436_v41  ;;  %v10861_v10 = vsel %vm443_vm2, %v3436_v41, %v3438_v45  ;;  %v10863_v28 = vld [vmem:[#allocation2 + $0xa0] sm:$0x3] }
 0x335   : > { %12366 = vst [vmem:[#allocation40_spill] sm:$0xff] %v10858_v40  ;;  %12367 = vst [vmem:[#allocation45_spill] sm:$0xff] %v10861_v10  ;;  %v3224_v44 = vadd.f32 %v10722_v19, %v3185_v15  ;;  %8111 = vmatprep.mubr.msk.f32.mxu1 %vm528_vm3, %v10858_v40  ;;  %v10869_v63 = vld [vmem:[#allocation2 + $0x90] sm:$0xff]  ;;  %v10871_v54 = vld [vmem:[#allocation2 + $0x98] sm:$0xff]  ;;  %v3443_v35 = vrot.slane %v10863_v28, 1 }
 0x336   : > { %3287 = vst.msk [vmem:[#allocation2 + $0xc9] sm:$0xff] %vm528_vm3, %v3254_v14  ;;  %3286 = vst.msk [vmem:[#allocation2 + $0xc1] sm:$0xff] %vm528_vm3, %v3253_v57  ;;  %v3223_v45 = vadd.f32 %v10722_v19, %v3184_v39  ;;  %v8069_v22 = vpop.f32.mrb[18].mxu0  ;;  %8112 = vmatmul.mubr.msk.f32.gmra.mrb[10].mxu1 %vm528_vm3, %v10861_v10  ;;  %v3440_v31 = vrot.slane %v10869_v63, 1  ;;  %v3441_v41 = vrot.slane %v10871_v54, 1 }
 0x337   : > { %v3256_v14 = vmax.f32 %v3224_v44, 0.0  ;;  %v3187_v15 = vmul.f32 %v8069_v22, %v10717_v27  ;;  %v3060_v12 = vpop.f32.mrb[19].mxu0 }
 0x338   : > { %v3255_v20 = vmax.f32 %v3223_v45, 0.0  ;;  %v3186_v2 = vmul.f32 %v10717_v27, %v3060_v12  ;;  %v10883_v9 = vsel %vm443_vm2, %v3440_v31, %v3441_v41  ;;  %v10886_v39 = vsel %vm443_vm2, %v3441_v41, %v3443_v35 }
 0x339   : > { %12368 = vst [vmem:[#allocation41_spill] sm:$0xff] %v10883_v9  ;;  %12369 = vst [vmem:[#allocation42_spill] sm:$0xff] %v10886_v39  ;;  %v10888_v57 = vld [vmem:[#allocation2 + $0xb8] sm:$0x3]  ;;  %v3226_v52 = vadd.f32 %v10722_v19, %v3187_v15  ;;  %8114 = vmatprep.mubr.msk.f32.mxu1 %vm528_vm3, %v10883_v9  ;;  %v10894_v44 = vld [vmem:[#allocation2 + $0xa8] sm:$0xff] }
 0x33a   : > { %3289 = vst.msk [vmem:[#allocation2 + $0xe1] sm:$0xff] %vm528_vm3, %v3256_v14  ;;  %v10896_v45 = vld [vmem:[#allocation2 + $0xb0] sm:$0xff]  ;;  %v3448_v12 = vrot.slane %v10888_v57, 1  ;;  %3288 = vst.msk [vmem:[#allocation2 + $0xd9] sm:$0xff] %vm528_vm3, %v3255_v20  ;;  %v3225_v35 = vadd.f32 %v10722_v19, %v3186_v2  ;;  %v8072_v22 = vpop.f32.mrb[20].mxu0  ;;  %8115 = vmatmul.mubr.msk.f32.gmra.mrb[12].mxu1 %vm528_vm3, %v10886_v39  ;;  %v3445_v31 = vrot.slane %v10894_v44, 1 }
 0x33b   : > { %v3446_v41 = vrot.slane %v10896_v45, 1  ;;  %v3258_v14 = vmax.f32 %v3226_v52, 0.0  ;;  %v3189_v15 = vmul.f32 %v8072_v22, %v10717_v27  ;;  %v3070_v56 = vpop.f32.mrb[21].mxu0 }
 0x33c   : > { %v3257_v34 = vmax.f32 %v3225_v35, 0.0  ;;  %v3188_v47 = vmul.f32 %v10717_v27, %v3070_v56 }
 0x33d   : > { %v10908_v18 = vsel %vm443_vm2, %v3445_v31, %v3446_v41  ;;  %v10911_v2 = vsel %vm443_vm2, %v3446_v41, %v3448_v12  ;;  %v10913_v20 = vld [vmem:[#allocation2 + $0xd0] sm:$0x3]  ;;  %3291 = vst.msk [vmem:[#allocation2 + $0xf9] sm:$0xff] %vm528_vm3, %v3258_v14  ;;  %v3228_v33 = vadd.f32 %v10722_v19, %v3189_v15  ;;  %v10919_v52 = vld [vmem:[#allocation2 + $0xc0] sm:$0xff]  ;;  %v10921_v35 = vld [vmem:[#allocation2 + $0xc8] sm:$0xff] }
 0x33e   : > { %12370 = vst [vmem:[#allocation43_spill] sm:$0xff] %v10908_v18  ;;  %12371 = vst [vmem:[#allocation44_spill] sm:$0xff] %v10911_v2  ;;  %8117 = vmatprep.mubr.msk.f32.mxu1 %vm528_vm3, %v10908_v18  ;;  %v3453_v56 = vrot.slane %v10913_v20, 1  ;;  %v3227_v12 = vadd.f32 %v10722_v19, %v3188_v47  ;;  %v8075_v22 = vpop.f32.mrb[22].mxu0  ;;  %v3450_v31 = vrot.slane %v10919_v52, 1  ;;  %v3451_v41 = vrot.slane %v10921_v35, 1 }
 0x33f   : > { %3290 = vst.msk [vmem:[#allocation2 + $0xf1] sm:$0xff] %vm528_vm3, %v3257_v34  ;;  %8118 = vmatmul.mubr.msk.f32.gmra.mrb[14].mxu1 %vm528_vm3, %v10911_v2  ;;  %v3260_v14 = vmax.f32 %v3228_v33, 0.0  ;;  %v3191_v15 = vmul.f32 %v8075_v22, %v10717_v27  ;;  %v3080_v5 = vpop.f32.mrb[23].mxu0 }
 0x340   : > { %v3259_v17 = vmax.f32 %v3227_v12, 0.0  ;;  %v3190_v60 = vmul.f32 %v10717_v27, %v3080_v5  ;;  %v10933_v4 = vsel %vm443_vm2, %v3450_v31, %v3451_v41  ;;  %v10936_v34 = vsel %vm443_vm2, %v3451_v41, %v3453_v56 }
 0x341   : > { %12372 = vst [vmem:[#allocation46_spill] sm:$0xff] %v10933_v4  ;;  %12373 = vst [vmem:[#allocation47_spill] sm:$0xff] %v10936_v34  ;;  %v10938_v47 = vld [vmem:[#allocation2 + $0xe8] sm:$0x3]  ;;  %v3230_v55 = vadd.f32 %v10722_v19, %v3191_v15  ;;  %8120 = vmatprep.mubr.msk.f32.mxu1 %vm528_vm3, %v10933_v4  ;;  %v10944_v33 = vld [vmem:[#allocation2 + $0xd8] sm:$0xff] }
 0x342   : > { %3293 = vst.msk [vmem:[#allocation2 + $0x111] sm:$0xff] %vm528_vm3, %v3260_v14  ;;  %v10946_v12 = vld [vmem:[#allocation2 + $0xe0] sm:$0xff]  ;;  %v3458_v5 = vrot.slane %v10938_v47, 1  ;;  %3292 = vst.msk [vmem:[#allocation2 + $0x109] sm:$0xff] %vm528_vm3, %v3259_v17  ;;  %v3229_v56 = vadd.f32 %v10722_v19, %v3190_v60  ;;  %v8078_v22 = vpop.f32.mrb[24].mxu0  ;;  %v3455_v31 = vrot.slane %v10944_v33, 1 }
 0x343   : > { %8121 = vmatmul.mubr.msk.f32.gmra.mrb[16].mxu1 %vm528_vm3, %v10936_v34  ;;  %v3456_v41 = vrot.slane %v10946_v12, 1  ;;  %v3262_v14 = vmax.f32 %v3230_v55, 0.0  ;;  %v3193_v15 = vmul.f32 %v8078_v22, %v10717_v27  ;;  %v3090_v59 = vpop.f32.mrb[25].mxu0 }
 0x344   : > { %v3261_v49 = vmax.f32 %v3229_v56, 0.0  ;;  %v3192_v50 = vmul.f32 %v10717_v27, %v3090_v59  ;;  %v10963_v17 = vld [vmem:[#allocation2 + $0x100] sm:$0x3] }
 0x345   : > { %v10958_v36 = vsel %vm443_vm2, %v3455_v31, %v3456_v41  ;;  %v10961_v60 = vsel %vm443_vm2, %v3456_v41, %v3458_v5  ;;  %3295 = vst.msk [vmem:[#allocation2 + $0x129] sm:$0xff] %vm528_vm3, %v3262_v14  ;;  %v3232_v42 = vadd.f32 %v10722_v19, %v3193_v15  ;;  %v3463_v59 = vrot.slane %v10963_v17, 1 }
 0x346   : > { %12374 = vst [vmem:[#allocation36_spill] sm:$0xff] %v10958_v36  ;;  %12375 = vst [vmem:[#allocation50_spill] sm:$0xff] %v10961_v60  ;;  %8123 = vmatprep.mubr.msk.f32.mxu1 %vm528_vm3, %v10958_v36  ;;  %v10969_v55 = vld [vmem:[#allocation2 + $0xf0] sm:$0xff]  ;;  %v10971_v56 = vld [vmem:[#allocation2 + $0xf8] sm:$0xff]  ;;  %v3231_v5 = vadd.f32 %v10722_v19, %v3192_v50  ;;  %v8081_v22 = vpop.f32.mrb[26].mxu0 }
 0x347   : > { %3294 = vst.msk [vmem:[#allocation2 + $0x121] sm:$0xff] %vm528_vm3, %v3261_v49  ;;  %8124 = vmatmul.mubr.msk.f32.gmra.mrb[18].mxu1 %vm528_vm3, %v10961_v60  ;;  %v3460_v31 = vrot.slane %v10969_v55, 1  ;;  %v3461_v41 = vrot.slane %v10971_v56, 1  ;;  %v3264_v14 = vmax.f32 %v3232_v42, 0.0  ;;  %v3195_v15 = vmul.f32 %v8081_v22, %v10717_v27  ;;  %v3100_v36 = vpop.f32.mrb[27].mxu0 }
 0x348   : > { %v3263_v34 = vmax.f32 %v3231_v5, 0.0  ;;  %v3194_v4 = vmul.f32 %v10717_v27, %v3100_v36 }
 0x349   : > { %v10983_v2 = vsel %vm443_vm2, %v3460_v31, %v3461_v41  ;;  %v10986_v49 = vsel %vm443_vm2, %v3461_v41, %v3463_v59  ;;  %v10988_v50 = vld [vmem:[#allocation2 + $0x118] sm:$0x3]  ;;  %3297 = vst.msk [vmem:[#allocation2 + $0x141] sm:$0xff] %vm528_vm3, %v3264_v14  ;;  %v3234_v60 = vadd.f32 %v10722_v19, %v3195_v15  ;;  %v10994_v42 = vld [vmem:[#allocation2 + $0x108] sm:$0xff]  ;;  %v10996_v5 = vld [vmem:[#allocation2 + $0x110] sm:$0xff] }
 0x34a   : > { %12376 = vst [vmem:[#allocation51_spill] sm:$0xff] %v10983_v2  ;;  %12377 = vst [vmem:[#allocation52_spill] sm:$0xff] %v10986_v49  ;;  %8126 = vmatprep.mubr.msk.f32.mxu1 %vm528_vm3, %v10983_v2  ;;  %v3468_v36 = vrot.slane %v10988_v50, 1  ;;  %v3233_v59 = vadd.f32 %v10722_v19, %v3194_v4  ;;  %v8084_v22 = vpop.f32.mrb[28].mxu0  ;;  %v3465_v31 = vrot.slane %v10994_v42, 1  ;;  %v3466_v41 = vrot.slane %v10996_v5, 1 }
 0x34b   : > { %3296 = vst.msk [vmem:[#allocation2 + $0x139] sm:$0xff] %vm528_vm3, %v3263_v34  ;;  %8127 = vmatmul.mubr.msk.f32.gmra.mrb[20].mxu1 %vm528_vm3, %v10986_v49  ;;  %v3266_v14 = vmax.f32 %v3234_v60, 0.0  ;;  %v3197_v15 = vmul.f32 %v8084_v22, %v10717_v27  ;;  %v3110_v2 = vpop.f32.mrb[29].mxu0 }
 0x34c   : > { %v3265_v18 = vmax.f32 %v3233_v59, 0.0  ;;  %v3196_v39 = vmul.f32 %v10717_v27, %v3110_v2  ;;  %v11008_v9 = vsel %vm443_vm2, %v3465_v31, %v3466_v41  ;;  %v11011_v4 = vsel %vm443_vm2, %v3466_v41, %v3468_v36  ;;  %v11013_v34 = vld [vmem:[#allocation2 + $0x130] sm:$0x3] }
 0x34d   : > { %12378 = vst [vmem:[#allocation53_spill] sm:$0xff] %v11008_v9  ;;  %12379 = vst [vmem:[#allocation54_spill] sm:$0xff] %v11011_v4  ;;  %v3236_v49 = vadd.f32 %v10722_v19, %v3197_v15  ;;  %8129 = vmatprep.mubr.msk.f32.mxu1 %vm528_vm3, %v11008_v9  ;;  %v3473_v2 = vrot.slane %v11013_v34, 1 }
 0x34e   : > { %3299 = vst.msk [vmem:[#allocation2 + $0x159] sm:$0xff] %vm528_vm3, %v3266_v14  ;;  %v11019_v60 = vld [vmem:[#allocation2 + $0x120] sm:$0xff]  ;;  %v11021_v59 = vld [vmem:[#allocation2 + $0x128] sm:$0xff]  ;;  %3298 = vst.msk [vmem:[#allocation2 + $0x151] sm:$0xff] %vm528_vm3, %v3265_v18  ;;  %v3235_v36 = vadd.f32 %v10722_v19, %v3196_v39  ;;  %v8087_v22 = vpop.f32.mrb[30].mxu0 }
 0x34f   : > { %8130 = vmatmul.mubr.msk.f32.gmra.mrb[22].mxu1 %vm528_vm3, %v11011_v4  ;;  %v3470_v31 = vrot.slane %v11019_v60, 1  ;;  %v3471_v41 = vrot.slane %v11021_v59, 1  ;;  %v3268_v14 = vmax.f32 %v3236_v49, 0.0  ;;  %v3199_v15 = vmul.f32 %v8087_v22, %v10717_v27  ;;  %v3120_v9 = vpop.f32.mrb[31].mxu0 }
 0x350   : > { %v3267_v10 = vmax.f32 %v3235_v36, 0.0  ;;  %v3198_v40 = vmul.f32 %v10717_v27, %v3120_v9  ;;  %v11038_v39 = vld [vmem:[#allocation2 + $0x148] sm:$0x3] }
 0x351   : > { %v11033_v53 = vsel %vm443_vm2, %v3470_v31, %v3471_v41  ;;  %v11036_v18 = vsel %vm443_vm2, %v3471_v41, %v3473_v2  ;;  %3301 = vst.msk [vmem:[#allocation2 + $0x171] sm:$0xff] %vm528_vm3, %v3268_v14  ;;  %v3238_v4 = vadd.f32 %v10722_v19, %v3199_v15  ;;  %v3478_v9 = vrot.slane %v11038_v39, 1 }
 0x352   : > { %12380 = vst [vmem:[#allocation55_spill] sm:$0xff] %v11033_v53  ;;  %12381 = vst [vmem:[#allocation56_spill] sm:$0xff] %v11036_v18  ;;  %8132 = vmatprep.mubr.msk.f32.mxu1 %vm528_vm3, %v11033_v53  ;;  %v11044_v49 = vld [vmem:[#allocation2 + $0x138] sm:$0xff]  ;;  %v11046_v36 = vld [vmem:[#allocation2 + $0x140] sm:$0xff]  ;;  %v3237_v27 = vadd.f32 %v10722_v19, %v3198_v40 }
 0x353   : > { %3300 = vst.msk [vmem:[#allocation2 + $0x169] sm:$0xff] %vm528_vm3, %v3267_v10  ;;  %8133 = vmatmul.mubr.msk.f32.gmra.mrb[24].mxu1 %vm528_vm3, %v11036_v18  ;;  %v3475_v2 = vrot.slane %v11044_v49, 1  ;;  %v3476_v22 = vrot.slane %v11046_v36, 1  ;;  %v3270_v31 = vmax.f32 %v3238_v4, 0.0  ;;  %v4750_v18 = vld [vmem:[%s12084_s4 + $0x80] sm:$0xff] }
 0x354   : > { %v3269_v41 = vmax.f32 %v3237_v27, 0.0 }
 0x355   : > { %v11056_v14 = vsel %vm443_vm2, %v3475_v2, %v3476_v22  ;;  %v11059_v15 = vsel %vm443_vm2, %v3476_v22, %v3478_v9  ;;  %v11061_v53 = vld [vmem:[#allocation2 + $0x160] sm:$0x3]  ;;  %3303 = vst.msk [vmem:[#allocation2 + $0x189] sm:$0xff] %vm528_vm3, %v3270_v31  ;;  %v11066_v40 = vld [vmem:[#allocation2 + $0x150] sm:$0xff]  ;;  %v11068_v19 = vld [vmem:[#allocation2 + $0x158] sm:$0xff] }
 0x356   : > { %12382 = vst [vmem:[#allocation57_spill] sm:$0xff] %v11056_v14  ;;  %12383 = vst [vmem:[#allocation58_spill] sm:$0xff] %v11059_v15  ;;  %8135 = vmatprep.mubr.msk.f32.mxu1 %vm528_vm3, %v11056_v14  ;;  %v3483_v10 = vrot.slane %v11061_v53, 1  ;;  %v3480_v4 = vrot.slane %v11066_v40, 1  ;;  %v3481_v9 = vrot.slane %v11068_v19, 1 }
 0x357   : > { %3302 = vst.msk [vmem:[#allocation2 + $0x181] sm:$0xff] %vm528_vm3, %v3269_v41  ;;  %8136 = vmatmul.mubr.msk.f32.gmra.mrb[26].mxu1 %vm528_vm3, %v11059_v15 }
 0x358   : > { %v11077_v27 = vsel %vm443_vm2, %v3480_v4, %v3481_v9  ;;  %v11080_v2 = vsel %vm443_vm2, %v3481_v9, %v3483_v10  ;;  %v11082_v22 = vld [vmem:[#allocation2 + $0x178] sm:$0x3] }
 0x359   : > { %12384 = vst [vmem:[#allocation59_spill] sm:$0xff] %v11077_v27  ;;  %12385 = vst [vmem:[#allocation60_spill] sm:$0xff] %v11080_v2  ;;  %8138 = vmatprep.mubr.msk.f32.mxu1 %vm528_vm3, %v11077_v27  ;;  %v3488_v15 = vrot.slane %v11082_v22, 1  ;;  %v4154_v27 = vld [vmem:[%s12084_s4 + $0x50] sm:$0xff] }
 0x35a   : > { %v11086_v31 = vld [vmem:[#allocation2 + $0x168] sm:$0xff]  ;;  %v11088_v41 = vld [vmem:[#allocation2 + $0x170] sm:$0xff] }
 0x35b   : > { %8139 = vmatmul.mubr.msk.f32.gmra.mrb[28].mxu1 %vm528_vm3, %v11080_v2  ;;  %v3485_v4 = vrot.slane %v11086_v31, 1  ;;  %v3486_v14 = vrot.slane %v11088_v41, 1  ;;  %v4155_v2 = vld [vmem:[%s12084_s4 + $0x58] sm:$0xff] }
 0x35d   : > { %v11096_v10 = vsel %vm443_vm2, %v3485_v4, %v3486_v14  ;;  %v11099_v9 = vsel %vm443_vm2, %v3486_v14, %v3488_v15  ;;  %v8684_v4 = vpack.c.bf16 %v4155_v2, %v4154_v27  ;;  %v4477_v14 = vld [vmem:[%s12084_s4 + $0x60] sm:$0xff]  ;;  %v4478_v15 = vld [vmem:[%s12084_s4 + $0x68] sm:$0xff]  ;;  %v4073_v27 = vrot.slane %v10682_v13, 2 }
 0x35e   : > { %12386 = vst [vmem:[#allocation61_spill] sm:$0xff] %v11096_v10  ;;  %12387 = vst [vmem:[#allocation62_spill] sm:$0xff] %v11099_v9  ;;  %8141 = vmatprep.mubr.msk.f32.mxu1 %vm528_vm3, %v11096_v10  ;;  %v4075_v2 = vrot.slane %v10686_v32, 2  ;;  %v4078_v32 = vrot.slane %v10748_v48, 2  ;;  %v4080_v10 = vrot.slane %v10742_v8, 2  ;;  %v11211_v8 = vpack.c.bf16 %v4751_v43, %v4750_v18 }
 0x35f   : > { %8142 = vmatmul.mubr.msk.f32.gmra.mrb[30].mxu1 %vm528_vm3, %v11099_v9  ;;  %v8688_v9 = vpack.c.bf16 %v4478_v15, %v4477_v14  ;;  %v4479_v14 = vld [vmem:[%s12084_s4 + $0x70] sm:$0xff] }
 0x360   : > { %8152 = vmatprep.mubr.msk.f32.mxu1 %vm528_vm3, %v10680_v61  ;;  %v4076_v15 = vsel %vm1107_vm4, %v4073_v27, %v4075_v2  ;;  %v11214_v2 = vsel %vm1107_vm4, %v4078_v32, %v4080_v10  ;;  %v4092_v10 = vrot.slane %v10819_v16, 2 }
 0x363   : > { %8153 = vmatmul.mubr.msk.f32.vlgmr.msra.gmra.mrb[0].mxu1 %vm528_vm3, %v10682_v13  ;;  %v4077_v13 = vrot.slane %v10746_v25, 2 }
 0x364   : > { %8155 = vmatprep.mubr.msk.f32.mxu1 %vm528_vm3, %v10746_v25  ;;  %8683 = vmatpush3.bf16.msra.mxu1 %v10711_v0  ;;  %v4072_v0 = vrot.slane %v10680_v61, 2  ;;  %v4480_v61 = vld [vmem:[%s12084_s4 + $0x78] sm:$0xff] }
 0x365   : > { %8685 = vmatprep.subr.bf16.mxu1 %v8684_v4  ;;  %v11205_v1 = vsel %vm1107_vm4, %v4077_v13, %v4078_v32  ;;  %v4087_v13 = vrot.slane %v10794_v46, 2 }
 0x367   : > { %8156 = vmatmul.mubr.msk.f32.gmra.mrb[2].mxu1 %vm528_vm3, %v10748_v48 }
 0x368   : > { %8158 = vmatprep.mubr.msk.f32.mxu1 %vm528_vm3, %v10769_v23  ;;  %8687 = vmatpush3.bf16.msra.mxu1 %v8684_v4  ;;  %v4074_v4 = vsel %vm1107_vm4, %v4072_v0, %v4073_v27  ;;  %v8692_v0 = vpack.c.bf16 %v4480_v61, %v4479_v14  ;;  %v4083_v27 = vrot.slane %v10771_v30, 2  ;;  %v4085_v14 = vrot.slane %v10763_v26, 2 }
 0x369   : > { %8689 = vmatprep.subr.bf16.mxu1 %v8688_v9  ;;  %v4090_v26 = vrot.slane %v10788_v3, 2 }
 0x36a   : > { %v11228_v43 = vsel %vm1107_vm4, %v4083_v27, %v4085_v14 }
 0x36b   : > { %8159 = vmatmul.mubr.msk.f32.gmra.mrb[4].mxu1 %vm528_vm3, %v10771_v30 }
 0x36c   : > { %8161 = vmatprep.mubr.msk.f32.mxu1 %vm528_vm3, %v10794_v46 }
 0x36f   : > { %8162 = vmatmul.mubr.msk.f32.gmra.mrb[6].mxu1 %vm528_vm3, %v10796_v37 }
 0x370   : > { %8164 = vmatprep.mubr.msk.f32.mxu1 %vm528_vm3, %v10819_v16 }
 0x373   : > { %8165 = vmatmul.mubr.msk.f32.gmra.mrb[8].mxu1 %vm528_vm3, %v10821_v24 }
 0x374   : > { %8167 = vmatprep.mubr.msk.f32.mxu1 %vm528_vm3, %v10844_v29 }
 0x377   : > { %8168 = vmatmul.mubr.msk.f32.gmra.mrb[10].mxu1 %vm528_vm3, %v10846_v62 }
 0x378   : > { %8170 = vmatprep.mubr.msk.f32.mxu1 %vm528_vm3, %v10869_v63 }
 0x37b   : > { %8171 = vmatmul.mubr.msk.f32.gmra.mrb[12].mxu1 %vm528_vm3, %v10871_v54 }
 0x37c   : > { %8173 = vmatprep.mubr.msk.f32.mxu1 %vm528_vm3, %v10894_v44 }
 0x37f   : > { %8174 = vmatmul.mubr.msk.f32.gmra.mrb[14].mxu1 %vm528_vm3, %v10896_v45 }
 0x380   : > { %8176 = vmatprep.mubr.msk.f32.mxu1 %vm528_vm3, %v10919_v52 }
 0x383   : > { %8177 = vmatmul.mubr.msk.f32.gmra.mrb[16].mxu1 %vm528_vm3, %v10921_v35 }
 0x384   : > { %8179 = vmatprep.mubr.msk.f32.mxu1 %vm528_vm3, %v10944_v33 }
 0x387   : > { %8180 = vmatmul.mubr.msk.f32.gmra.mrb[18].mxu1 %vm528_vm3, %v10946_v12 }
 0x388   : > { %8182 = vmatprep.mubr.msk.f32.mxu1 %vm528_vm3, %v10969_v55 }
 0x38b   : > { %8183 = vmatmul.mubr.msk.f32.gmra.mrb[20].mxu1 %vm528_vm3, %v10971_v56 }
 0x38c   : > { %8185 = vmatprep.mubr.msk.f32.mxu1 %vm528_vm3, %v10994_v42 }
 0x38f   : > { %8186 = vmatmul.mubr.msk.f32.gmra.mrb[22].mxu1 %vm528_vm3, %v10996_v5 }
 0x390   : > { %8188 = vmatprep.mubr.msk.f32.mxu1 %vm528_vm3, %v11019_v60 }
 0x393   : > { %8189 = vmatmul.mubr.msk.f32.gmra.mrb[24].mxu1 %vm528_vm3, %v11021_v59 }
 0x394   : > { %8191 = vmatprep.mubr.msk.f32.mxu1 %vm528_vm3, %v11044_v49 }
 0x397   : > { %8192 = vmatmul.mubr.msk.f32.gmra.mrb[26].mxu1 %vm528_vm3, %v11046_v36 }
 0x398   : > { %8194 = vmatprep.mubr.msk.f32.mxu1 %vm528_vm3, %v11066_v40 }
 0x39b   : > { %8195 = vmatmul.mubr.msk.f32.gmra.mrb[28].mxu1 %vm528_vm3, %v11068_v19 }
 0x39c   : > { %8197 = vmatprep.mubr.msk.f32.mxu1 %vm528_vm3, %v11086_v31 }
 0x39f   : > { %8198 = vmatmul.mubr.msk.f32.gmra.mrb[30].mxu1 %vm528_vm3, %v11088_v41 }
 0x3a0   : > { %8208 = vmatprep.mubr.msk.f32.mxu1 %vm528_vm3, %v4074_v4  ;;  %v4082_v4 = vrot.slane %v10769_v23, 2 }
 0x3a2   : > { %v11220_v61 = vsel %vm1107_vm4, %v4082_v4, %v4083_v27  ;;  %v4097_v4 = vrot.slane %v10844_v29, 2  ;;  %v4098_v27 = vrot.slane %v10846_v62, 2 }
 0x3a3   : > { %8209 = vmatmul.mubr.msk.f32.vlgmr.msra.gmra.mrb[0].mxu1 %vm528_vm3, %v4076_v15  ;;  %v4088_v15 = vrot.slane %v10796_v37, 2 }
 0x3a4   : > { %8211 = vmatprep.mubr.msk.f32.mxu1 %vm528_vm3, %v11205_v1  ;;  %8691 = vmatpush3.bf16.msra.mxu1 %v8688_v9  ;;  %v4093_v9 = vrot.slane %v10821_v24, 2 }
 0x3a5   : > { %8693 = vmatprep.subr.bf16.mxu1 %v8692_v0  ;;  %v11234_v18 = vsel %vm1107_vm4, %v4087_v13, %v4088_v15  ;;  %v11241_v32 = vsel %vm1107_vm4, %v4088_v15, %v4090_v26  ;;  %v4100_v13 = vrot.slane %v10838_v51, 2  ;;  %v4102_v15 = vrot.slane %v10869_v63, 2 }
 0x3a6   : > { %v11247_v3 = vsel %vm1107_vm4, %v4092_v10, %v4093_v9  ;;  %v4103_v26 = vrot.slane %v10871_v54, 2 }
 0x3a7   : > { %8212 = vmatmul.mubr.msk.f32.gmra.mrb[2].mxu1 %vm528_vm3, %v11214_v2  ;;  %v11267_v10 = vsel %vm1107_vm4, %v4098_v27, %v4100_v13  ;;  %v4112_v13 = vrot.slane %v10919_v52, 2 }
 0x3a8   : > { %8214 = vmatprep.mubr.msk.f32.mxu1 %vm528_vm3, %v11220_v61  ;;  %8695 = vmatpush3.bf16.msra.mxu1 %v8692_v0  ;;  %v4095_v0 = vrot.slane %v10813_v38, 2  ;;  %v11260_v38 = vsel %vm1107_vm4, %v4097_v4, %v4098_v27  ;;  %v11273_v51 = vsel %vm1107_vm4, %v4102_v15, %v4103_v26  ;;  %v4108_v4 = vrot.slane %v10896_v45, 2 }
 0x3a9   : > { %8697 = vmatprep.subr.bf16.mxu1 %v11211_v8  ;;  %12388 = vst [vmem:[#allocation63_spill] sm:$0xff] %v11260_v38  ;;  %12389 = vst [vmem:[#allocation64_spill] sm:$0xff] %v11273_v51  ;;  %v4110_v27 = vrot.slane %v10888_v57, 2  ;;  %v4113_v15 = vrot.slane %v10921_v35, 2 }
 0x3aa   : > { %v11254_v14 = vsel %vm1107_vm4, %v4093_v9, %v4095_v0  ;;  %v4105_v9 = vrot.slane %v10863_v28, 2  ;;  %v4107_v0 = vrot.slane %v10894_v44, 2 }
 0x3ab   : > { %8215 = vmatmul.mubr.msk.f32.gmra.mrb[4].mxu1 %vm528_vm3, %v11228_v43  ;;  %v11299_v57 = vsel %vm1107_vm4, %v4112_v13, %v4113_v15  ;;  %v4123_v13 = vrot.slane %v10971_v56, 2 }
 0x3ac   : > { %8217 = vmatprep.mubr.msk.f32.mxu1 %vm528_vm3, %v11234_v18  ;;  %v11286_v28 = vsel %vm1107_vm4, %v4107_v0, %v4108_v4  ;;  %12391 = vst [vmem:[#allocation66_spill] sm:$0xff] %v11299_v57  ;;  %v4118_v0 = vrot.slane %v10946_v12, 2 }
 0x3ad   : > { %12390 = vst [vmem:[#allocation65_spill] sm:$0xff] %v11286_v28 }
 0x3af   : > { %8218 = vmatmul.mubr.msk.f32.gmra.mrb[6].mxu1 %vm528_vm3, %v11241_v32 }
 0x3b0   : > { %8220 = vmatprep.mubr.msk.f32.mxu1 %vm528_vm3, %v11247_v3 }
 0x3b3   : > { %8221 = vmatmul.mubr.msk.f32.gmra.mrb[8].mxu1 %vm528_vm3, %v11254_v14 }
 0x3b4   : > { %8223 = vmatprep.mubr.msk.f32.mxu1 %vm528_vm3, %v11260_v38  ;;  %v11280_v38 = vsel %vm1107_vm4, %v4103_v26, %v4105_v9  ;;  %v4115_v26 = vrot.slane %v10913_v20, 2  ;;  %v4117_v9 = vrot.slane %v10944_v33, 2 }
 0x3b6   : > { %v11312_v20 = vsel %vm1107_vm4, %v4117_v9, %v4118_v0  ;;  %v4128_v9 = vrot.slane %v10996_v5, 2 }
 0x3b7   : > { %8224 = vmatmul.mubr.msk.f32.gmra.mrb[10].mxu1 %vm528_vm3, %v11267_v10  ;;  %12392 = vst [vmem:[#allocation67_spill] sm:$0xff] %v11312_v20 }
 0x3b8   : > { %8226 = vmatprep.mubr.msk.f32.mxu1 %vm528_vm3, %v11273_v51  ;;  %v11293_v51 = vsel %vm1107_vm4, %v4108_v4, %v4110_v27  ;;  %v4120_v4 = vrot.slane %v10938_v47, 2  ;;  %v4122_v27 = vrot.slane %v10969_v55, 2 }
 0x3ba   : > { %v11325_v47 = vsel %vm1107_vm4, %v4122_v27, %v4123_v13  ;;  %v4133_v27 = vrot.slane %v11021_v59, 2 }
 0x3bb   : > { %8227 = vmatmul.mubr.msk.f32.gmra.mrb[12].mxu1 %vm528_vm3, %v11280_v38  ;;  %12393 = vst [vmem:[#allocation68_spill] sm:$0xff] %v11325_v47 }
 0x3bc   : > { %8229 = vmatprep.mubr.msk.f32.mxu1 %vm528_vm3, %v11286_v28  ;;  %v11306_v28 = vsel %vm1107_vm4, %v4113_v15, %v4115_v26  ;;  %v4125_v15 = vrot.slane %v10963_v17, 2  ;;  %v4127_v26 = vrot.slane %v10994_v42, 2 }
 0x3be   : > { %v11338_v17 = vsel %vm1107_vm4, %v4127_v26, %v4128_v9  ;;  %v4138_v26 = vrot.slane %v11046_v36, 2 }
 0x3bf   : > { %8230 = vmatmul.mubr.msk.f32.gmra.mrb[14].mxu1 %vm528_vm3, %v11293_v51  ;;  %12395 = vst [vmem:[#allocation70_spill] sm:$0xff] %v11338_v17 }
 0x3c0   : > { %8232 = vmatprep.mubr.msk.f32.mxu1 %vm528_vm3, %v11299_v57  ;;  %v11319_v57 = vsel %vm1107_vm4, %v4118_v0, %v4120_v4  ;;  %v4130_v0 = vrot.slane %v10988_v50, 2  ;;  %v4132_v4 = vrot.slane %v11019_v60, 2 }
 0x3c2   : > { %v11351_v50 = vsel %vm1107_vm4, %v4132_v4, %v4133_v27  ;;  %v4143_v4 = vrot.slane %v11068_v19, 2 }
 0x3c3   : > { %8233 = vmatmul.mubr.msk.f32.gmra.mrb[16].mxu1 %vm528_vm3, %v11306_v28  ;;  %12396 = vst [vmem:[#allocation71_spill] sm:$0xff] %v11351_v50 }
 0x3c4   : > { %8235 = vmatprep.mubr.msk.f32.mxu1 %vm528_vm3, %v11312_v20  ;;  %v11332_v20 = vsel %vm1107_vm4, %v4123_v13, %v4125_v15  ;;  %v4135_v13 = vrot.slane %v11013_v34, 2  ;;  %v4137_v15 = vrot.slane %v11044_v49, 2 }
 0x3c5   : > { %12394 = vst [vmem:[#allocation69_spill] sm:$0xff] %v11332_v20 }
 0x3c6   : > { %v11364_v34 = vsel %vm1107_vm4, %v4137_v15, %v4138_v26  ;;  %v4148_v15 = vrot.slane %v11088_v41, 2 }
 0x3c7   : > { %8236 = vmatmul.mubr.msk.f32.gmra.mrb[18].mxu1 %vm528_vm3, %v11319_v57  ;;  %12398 = vst [vmem:[#allocation73_spill] sm:$0xff] %v11364_v34 }
 0x3c8   : > { %8238 = vmatprep.mubr.msk.f32.mxu1 %vm528_vm3, %v11325_v47  ;;  %v11345_v47 = vsel %vm1107_vm4, %v4128_v9, %v4130_v0  ;;  %v4140_v9 = vrot.slane %v11038_v39, 2  ;;  %v4142_v0 = vrot.slane %v11066_v40, 2 }
 0x3ca   : > { %v11377_v39 = vsel %vm1107_vm4, %v4142_v0, %v4143_v4  ;;  %v4752_v0 = vld [vmem:[%s12084_s4 + $0x90] sm:$0xff] }
 0x3cb   : > { %8239 = vmatmul.mubr.msk.f32.gmra.mrb[20].mxu1 %vm528_vm3, %v11332_v20  ;;  %12400 = vst [vmem:[#allocation75_spill] sm:$0xff] %v11377_v39 }
 0x3cc   : > { %8241 = vmatprep.mubr.msk.f32.mxu1 %vm528_vm3, %v11338_v17  ;;  %v11358_v17 = vsel %vm1107_vm4, %v4133_v27, %v4135_v13  ;;  %v4145_v27 = vrot.slane %v11061_v53, 2  ;;  %v4147_v13 = vrot.slane %v11086_v31, 2 }
 0x3cd   : > { %12397 = vst [vmem:[#allocation72_spill] sm:$0xff] %v11358_v17 }
 0x3ce   : > { %v11390_v53 = vsel %vm1107_vm4, %v4147_v13, %v4148_v15  ;;  %v5021_v13 = vld [vmem:[%s12084_s4 + $0xa8] sm:$0xff] }
 0x3cf   : > { %8242 = vmatmul.mubr.msk.f32.gmra.mrb[22].mxu1 %vm528_vm3, %v11345_v47  ;;  %12402 = vst [vmem:[#allocation77_spill] sm:$0xff] %v11390_v53 }
 0x3d0   : > { %8244 = vmatprep.mubr.msk.f32.mxu1 %vm528_vm3, %v11351_v50  ;;  %v11371_v50 = vsel %vm1107_vm4, %v4138_v26, %v4140_v9  ;;  %v4150_v26 = vrot.slane %v11082_v22, 2  ;;  %v4753_v22 = vld [vmem:[%s12084_s4 + $0x98] sm:$0xff] }
 0x3d1   : > { %12399 = vst [vmem:[#allocation74_spill] sm:$0xff] %v11371_v50 }
 0x3d2   : > { %v11395_v9 = vsel %vm1107_vm4, %v4148_v15, %v4150_v26  ;;  %v12409_v26 = vld [vmem:[#allocation41_spill] sm:$0xff] }
 0x3d3   : > { %8245 = vmatmul.mubr.msk.f32.gmra.mrb[24].mxu1 %vm528_vm3, %v11358_v17  ;;  %12403 = vst [vmem:[#allocation78_spill] sm:$0xff] %v11395_v9 }
 0x3d4   : > { %8247 = vmatprep.mubr.msk.f32.mxu1 %vm528_vm3, %v11364_v34  ;;  %v11384_v34 = vsel %vm1107_vm4, %v4143_v4, %v4145_v27  ;;  %v8700_v4 = vpack.c.bf16 %v4753_v22, %v4752_v0  ;;  %v5020_v27 = vld [vmem:[%s12084_s4 + $0xa0] sm:$0xff]  ;;  %v12410_v0 = vld [vmem:[#allocation42_spill] sm:$0xff]  ;;  %v12411_v22 = vld [vmem:[#allocation43_spill] sm:$0xff] }
 0x3d5   : > { %12401 = vst [vmem:[#allocation76_spill] sm:$0xff] %v11384_v34  ;;  %v8704_v15 = vpack.c.bf16 %v5021_v13, %v5020_v27  ;;  %v12413_v27 = vld [vmem:[#allocation46_spill] sm:$0xff]  ;;  %v12414_v13 = vld [vmem:[#allocation47_spill] sm:$0xff] }
 0x3d7   : > { %8248 = vmatmul.mubr.msk.f32.gmra.mrb[26].mxu1 %vm528_vm3, %v11371_v50 }
 0x3d8   : > { %8250 = vmatprep.mubr.msk.f32.mxu1 %vm528_vm3, %v11377_v39 }
 0x3db   : > { %8251 = vmatmul.mubr.msk.f32.gmra.mrb[28].mxu1 %vm528_vm3, %v11384_v34 }
 0x3dc   : > { %8253 = vmatprep.mubr.msk.f32.mxu1 %vm528_vm3, %v11390_v53 }
 0x3df   : > { %8254 = vmatmul.mubr.msk.f32.gmra.mrb[30].mxu1 %vm528_vm3, %v11395_v9 }
 0x3e0   : > { %8264 = vmatprep.mubr.msk.f32.mxu1 %vm528_vm3, %v10746_v25  ;;  %v11472_v25 = vld [vmem:[#allocation2 + $0x180] sm:$0xff] }
 0x3e3   : > { %8265 = vmatmul.mubr.msk.f32.vlgmr.msra.gmra.mrb[0].mxu1 %vm528_vm3, %v10748_v48  ;;  %v11476_v48 = vld [vmem:[#allocation2 + $0x188] sm:$0xff] }
 0x3e4   : > { %8267 = vmatprep.mubr.msk.f32.mxu1 %vm528_vm3, %v10769_v23  ;;  %8699 = vmatpush3.bf16.msra.mxu1 %v11211_v8  ;;  %v5022_v23 = vld [vmem:[%s12084_s4 + $0xb0] sm:$0xff]  ;;  %v12408_v8 = vld [vmem:[#allocation45_spill] sm:$0xff] }
 0x3e5   : > { %8701 = vmatprep.subr.bf16.mxu1 %v8700_v4 }
 0x3e7   : > { %8268 = vmatmul.mubr.msk.f32.gmra.mrb[2].mxu1 %vm528_vm3, %v10771_v30  ;;  %v5023_v30 = vld [vmem:[%s12084_s4 + $0xb8] sm:$0xff] }
 0x3e8   : > { %8270 = vmatprep.mubr.msk.f32.mxu1 %vm528_vm3, %v10794_v46  ;;  %8703 = vmatpush3.bf16.msra.mxu1 %v8700_v4  ;;  %v8708_v46 = vpack.c.bf16 %v5023_v30, %v5022_v23  ;;  %v12412_v4 = vld [vmem:[#allocation44_spill] sm:$0xff]  ;;  %v12416_v23 = vld [vmem:[#allocation50_spill] sm:$0xff]  ;;  %v12417_v30 = vld [vmem:[#allocation51_spill] sm:$0xff] }
 0x3e9   : > { %8705 = vmatprep.subr.bf16.mxu1 %v8704_v15 }
 0x3eb   : > { %8271 = vmatmul.mubr.msk.f32.gmra.mrb[4].mxu1 %vm528_vm3, %v10796_v37  ;;  %v5285_v37 = vld [vmem:[%s12084_s4 + $0xc0] sm:$0xff] }
 0x3ec   : > { %8273 = vmatprep.mubr.msk.f32.mxu1 %vm528_vm3, %v10819_v16  ;;  %v5286_v16 = vld [vmem:[%s12084_s4 + $0xc8] sm:$0xff] }
 0x3ef   : > { %8274 = vmatmul.mubr.msk.f32.gmra.mrb[6].mxu1 %vm528_vm3, %v10821_v24  ;;  %v8712_v24 = vpack.c.bf16 %v5286_v16, %v5285_v37  ;;  %v12419_v37 = vld [vmem:[#allocation53_spill] sm:$0xff]  ;;  %v12420_v16 = vld [vmem:[#allocation54_spill] sm:$0xff] }
 0x3f0   : > { %8276 = vmatprep.mubr.msk.f32.mxu1 %vm528_vm3, %v10844_v29  ;;  %v12405_v29 = vld [vmem:[#allocation38_spill] sm:$0xff] }
 0x3f3   : > { %8277 = vmatmul.mubr.msk.f32.gmra.mrb[8].mxu1 %vm528_vm3, %v10846_v62  ;;  %v12407_v62 = vld [vmem:[#allocation40_spill] sm:$0xff] }
 0x3f4   : > { %8279 = vmatprep.mubr.msk.f32.mxu1 %vm528_vm3, %v10869_v63 }
 0x3f7   : > { %8280 = vmatmul.mubr.msk.f32.gmra.mrb[10].mxu1 %vm528_vm3, %v10871_v54 }
 0x3f8   : > { %8282 = vmatprep.mubr.msk.f32.mxu1 %vm528_vm3, %v10894_v44 }
 0x3fb   : > { %8283 = vmatmul.mubr.msk.f32.gmra.mrb[12].mxu1 %vm528_vm3, %v10896_v45 }
 0x3fc   : > { %8285 = vmatprep.mubr.msk.f32.mxu1 %vm528_vm3, %v10919_v52 }
 0x3ff   : > { %8286 = vmatmul.mubr.msk.f32.gmra.mrb[14].mxu1 %vm528_vm3, %v10921_v35 }
 0x400   : > { %8288 = vmatprep.mubr.msk.f32.mxu1 %vm528_vm3, %v10944_v33 }
 0x403   : > { %8289 = vmatmul.mubr.msk.f32.gmra.mrb[16].mxu1 %vm528_vm3, %v10946_v12 }
 0x404   : > { %8291 = vmatprep.mubr.msk.f32.mxu1 %vm528_vm3, %v10969_v55 }
 0x407   : > { %8292 = vmatmul.mubr.msk.f32.gmra.mrb[18].mxu1 %vm528_vm3, %v10971_v56 }
 0x408   : > { %8294 = vmatprep.mubr.msk.f32.mxu1 %vm528_vm3, %v10994_v42 }
 0x40b   : > { %8295 = vmatmul.mubr.msk.f32.gmra.mrb[20].mxu1 %vm528_vm3, %v10996_v5 }
 0x40c   : > { %8297 = vmatprep.mubr.msk.f32.mxu1 %vm528_vm3, %v11019_v60 }
 0x40f   : > { %8298 = vmatmul.mubr.msk.f32.gmra.mrb[22].mxu1 %vm528_vm3, %v11021_v59 }
 0x410   : > { %8300 = vmatprep.mubr.msk.f32.mxu1 %vm528_vm3, %v11044_v49 }
 0x413   : > { %8301 = vmatmul.mubr.msk.f32.gmra.mrb[24].mxu1 %vm528_vm3, %v11046_v36 }
 0x414   : > { %8303 = vmatprep.mubr.msk.f32.mxu1 %vm528_vm3, %v11066_v40 }
 0x417   : > { %8304 = vmatmul.mubr.msk.f32.gmra.mrb[26].mxu1 %vm528_vm3, %v11068_v19 }
 0x418   : > { %8306 = vmatprep.mubr.msk.f32.mxu1 %vm528_vm3, %v11086_v31 }
 0x41b   : > { %8307 = vmatmul.mubr.msk.f32.gmra.mrb[28].mxu1 %vm528_vm3, %v11088_v41 }
 0x41c   : > { %8309 = vmatprep.mubr.msk.f32.mxu1 %vm528_vm3, %v11472_v25 }
 0x41f   : > { %8310 = vmatmul.mubr.msk.f32.gmra.mrb[30].mxu1 %vm528_vm3, %v11476_v48 }
 0x420   : > { %8320 = vmatprep.mubr.msk.f32.mxu1 %vm528_vm3, %v10758_v21  ;;  %v12404_v21 = vld [vmem:[#allocation37_spill] sm:$0xff] }
 0x423   : > { %8321 = vmatmul.mubr.msk.f32.vlgmr.msra.gmra.mrb[0].mxu1 %vm528_vm3, %v10761_v6  ;;  %v12406_v6 = vld [vmem:[#allocation39_spill] sm:$0xff] }
 0x424   : > { %8323 = vmatprep.mubr.msk.f32.mxu1 %vm528_vm3, %v10783_v58  ;;  %8707 = vmatpush3.bf16.msra.mxu1 %v8704_v15  ;;  %v12415_v15 = vld [vmem:[#allocation36_spill] sm:$0xff] }
 0x425   : > { %8709 = vmatprep.subr.bf16.mxu1 %v8708_v46 }
 0x427   : > { %8324 = vmatmul.mubr.msk.f32.gmra.mrb[2].mxu1 %vm528_vm3, %v10786_v11 }
 0x428   : > { %8326 = vmatprep.mubr.msk.f32.mxu1 %vm528_vm3, %v10808_v7  ;;  %8711 = vmatpush3.bf16.msra.mxu1 %v8708_v46  ;;  %v12418_v46 = vld [vmem:[#allocation52_spill] sm:$0xff] }
 0x429   : > { %8713 = vmatprep.subr.bf16.mxu1 %v8712_v24 }
 0x42b   : > { %8327 = vmatmul.mubr.msk.f32.gmra.mrb[4].mxu1 %vm528_vm3, %v12404_v21 }
 0x42c   : > { %8329 = vmatprep.mubr.msk.f32.mxu1 %vm528_vm3, %v12405_v29 }
 0x42f   : > { %8330 = vmatmul.mubr.msk.f32.gmra.mrb[6].mxu1 %vm528_vm3, %v12406_v6 }
 0x430   : > { %8332 = vmatprep.mubr.msk.f32.mxu1 %vm528_vm3, %v12407_v62 }
 0x433   : > { %8333 = vmatmul.mubr.msk.f32.gmra.mrb[8].mxu1 %vm528_vm3, %v12408_v8 }
 0x434   : > { %8335 = vmatprep.mubr.msk.f32.mxu1 %vm528_vm3, %v12409_v26 }
 0x437   : > { %8336 = vmatmul.mubr.msk.f32.gmra.mrb[10].mxu1 %vm528_vm3, %v12410_v0 }
 0x438   : > { %8338 = vmatprep.mubr.msk.f32.mxu1 %vm528_vm3, %v12411_v22  ;;  %v12428_v22 = vld [vmem:[#allocation62_spill] sm:$0xff] }
 0x43b   : > { %8339 = vmatmul.mubr.msk.f32.gmra.mrb[12].mxu1 %vm528_vm3, %v12412_v4  ;;  %v12427_v4 = vld [vmem:[#allocation61_spill] sm:$0xff] }
 0x43c   : > { %8341 = vmatprep.mubr.msk.f32.mxu1 %vm528_vm3, %v12413_v27  ;;  %v12421_v27 = vld [vmem:[#allocation55_spill] sm:$0xff] }
 0x43f   : > { %8342 = vmatmul.mubr.msk.f32.gmra.mrb[14].mxu1 %vm528_vm3, %v12414_v13  ;;  %v12422_v13 = vld [vmem:[#allocation56_spill] sm:$0xff] }
 0x440   : > { %8344 = vmatprep.mubr.msk.f32.mxu1 %vm528_vm3, %v12415_v15  ;;  %v12423_v15 = vld [vmem:[#allocation57_spill] sm:$0xff] }
 0x443   : > { %8345 = vmatmul.mubr.msk.f32.gmra.mrb[16].mxu1 %vm528_vm3, %v12416_v23  ;;  %v12424_v23 = vld [vmem:[#allocation58_spill] sm:$0xff] }
 0x444   : > { %8347 = vmatprep.mubr.msk.f32.mxu1 %vm528_vm3, %v12417_v30  ;;  %v12425_v30 = vld [vmem:[#allocation59_spill] sm:$0xff] }
 0x447   : > { %8348 = vmatmul.mubr.msk.f32.gmra.mrb[18].mxu1 %vm528_vm3, %v12418_v46  ;;  %v4746_v46 = vrot.slane %v11476_v48, 1 }
 0x448   : > { %8350 = vmatprep.mubr.msk.f32.mxu1 %vm528_vm3, %v12419_v37  ;;  %v4745_v37 = vrot.slane %v11472_v25, 1 }
 0x44b   : > { %8351 = vmatmul.mubr.msk.f32.gmra.mrb[20].mxu1 %vm528_vm3, %v12420_v16  ;;  %v12426_v16 = vld [vmem:[#allocation60_spill] sm:$0xff] }
 0x44c   : > { %8353 = vmatprep.mubr.msk.f32.mxu1 %vm528_vm3, %v12421_v27  ;;  %v3354_v27 = vld [vmem:[#allocation2 + $0x190] sm:$0x3] }
 0x44f   : > { %8354 = vmatmul.mubr.msk.f32.gmra.mrb[22].mxu1 %vm528_vm3, %v12422_v13  ;;  %v4748_v13 = vrot.slane %v3354_v27, 1 }
 0x450   : > { %8356 = vmatprep.mubr.msk.f32.mxu1 %vm528_vm3, %v12423_v15 }
 0x453   : > { %8357 = vmatmul.mubr.msk.f32.gmra.mrb[24].mxu1 %vm528_vm3, %v12424_v23  ;;  %v11555_v23 = vsel %vm443_vm2, %v4745_v37, %v4746_v46 }
 0x454   : > { %8359 = vmatprep.mubr.msk.f32.mxu1 %vm528_vm3, %v12425_v30  ;;  %v11560_v30 = vsel %vm443_vm2, %v4746_v46, %v4748_v13  ;;  %v5558_v13 = vld [vmem:[%s12084_s4 + $0xe0] sm:$0xff]  ;;  %v5559_v46 = vld [vmem:[%s12084_s4 + $0xe8] sm:$0xff] }
 0x455   : > { %12429 = vst [vmem:[#allocation37_spill] sm:$0xff] %v11560_v30 }
 0x457   : > { %8360 = vmatmul.mubr.msk.f32.gmra.mrb[26].mxu1 %vm528_vm3, %v12426_v16  ;;  %v5287_v16 = vld [vmem:[%s12084_s4 + $0xd0] sm:$0xff] }
 0x458   : > { %8362 = vmatprep.mubr.msk.f32.mxu1 %vm528_vm3, %v12427_v4  ;;  %v5288_v4 = vld [vmem:[%s12084_s4 + $0xd8] sm:$0xff] }
 0x459   : > { %v8716_v37 = vpack.c.bf16 %v5288_v4, %v5287_v16  ;;  %v12433_v4 = vld [vmem:[#allocation66_spill] sm:$0xff]  ;;  %v12434_v16 = vld [vmem:[#allocation67_spill] sm:$0xff] }
 0x45b   : > { %8363 = vmatmul.mubr.msk.f32.gmra.mrb[28].mxu1 %vm528_vm3, %v12428_v22 }
 0x45c   : > { %8365 = vmatprep.mubr.msk.f32.mxu1 %vm528_vm3, %v11555_v23 }
 0x45f   : > { %8366 = vmatmul.mubr.msk.f32.gmra.mrb[30].mxu1 %vm528_vm3, %v11560_v30  ;;  %v8720_v30 = vpack.c.bf16 %v5559_v46, %v5558_v13  ;;  %v12436_v13 = vld [vmem:[#allocation70_spill] sm:$0xff]  ;;  %v12437_v46 = vld [vmem:[#allocation71_spill] sm:$0xff] }
 0x460   : > { %8376 = vmatprep.mubr.msk.f32.mxu1 %vm528_vm3, %v11205_v1  ;;  %v12430_v1 = vld [vmem:[#allocation63_spill] sm:$0xff] }
 0x463   : > { %8377 = vmatmul.mubr.msk.f32.vlgmr.msra.gmra.mrb[0].mxu1 %vm528_vm3, %v11214_v2  ;;  %v12431_v2 = vld [vmem:[#allocation64_spill] sm:$0xff] }
 0x464   : > { %8379 = vmatprep.mubr.msk.f32.mxu1 %vm528_vm3, %v11220_v61  ;;  %8715 = vmatpush3.bf16.msra.mxu1 %v8712_v24  ;;  %v12432_v24 = vld [vmem:[#allocation65_spill] sm:$0xff] }
 0x465   : > { %8717 = vmatprep.subr.bf16.mxu1 %v8716_v37 }
 0x467   : > { %8380 = vmatmul.mubr.msk.f32.gmra.mrb[2].mxu1 %vm528_vm3, %v11228_v43 }
 0x468   : > { %8382 = vmatprep.mubr.msk.f32.mxu1 %vm528_vm3, %v11234_v18  ;;  %8719 = vmatpush3.bf16.msra.mxu1 %v8716_v37  ;;  %v12435_v37 = vld [vmem:[#allocation68_spill] sm:$0xff] }
 0x469   : > { %8721 = vmatprep.subr.bf16.mxu1 %v8720_v30 }
 0x46b   : > { %8383 = vmatmul.mubr.msk.f32.gmra.mrb[4].mxu1 %vm528_vm3, %v11241_v32 }
 0x46c   : > { %8385 = vmatprep.mubr.msk.f32.mxu1 %vm528_vm3, %v11247_v3 }
 0x46f   : > { %8386 = vmatmul.mubr.msk.f32.gmra.mrb[6].mxu1 %vm528_vm3, %v11254_v14 }
 0x470   : > { %8388 = vmatprep.mubr.msk.f32.mxu1 %vm528_vm3, %v12430_v1 }
 0x473   : > { %8389 = vmatmul.mubr.msk.f32.gmra.mrb[8].mxu1 %vm528_vm3, %v11267_v10 }
 0x474   : > { %8391 = vmatprep.mubr.msk.f32.mxu1 %vm528_vm3, %v12431_v2 }
 0x477   : > { %8392 = vmatmul.mubr.msk.f32.gmra.mrb[10].mxu1 %vm528_vm3, %v11280_v38 }
 0x478   : > { %8394 = vmatprep.mubr.msk.f32.mxu1 %vm528_vm3, %v12432_v24 }
 0x47b   : > { %8395 = vmatmul.mubr.msk.f32.gmra.mrb[12].mxu1 %vm528_vm3, %v11293_v51 }
 0x47c   : > { %8397 = vmatprep.mubr.msk.f32.mxu1 %vm528_vm3, %v12433_v4 }
 0x47f   : > { %8398 = vmatmul.mubr.msk.f32.gmra.mrb[14].mxu1 %vm528_vm3, %v11306_v28 }
 0x480   : > { %8400 = vmatprep.mubr.msk.f32.mxu1 %vm528_vm3, %v12434_v16  ;;  %v12438_v16 = vld [vmem:[#allocation73_spill] sm:$0xff] }
 0x483   : > { %8401 = vmatmul.mubr.msk.f32.gmra.mrb[16].mxu1 %vm528_vm3, %v11319_v57 }
 0x484   : > { %8403 = vmatprep.mubr.msk.f32.mxu1 %vm528_vm3, %v12435_v37 }
 0x487   : > { %8404 = vmatmul.mubr.msk.f32.gmra.mrb[18].mxu1 %vm528_vm3, %v11332_v20  ;;  %v5016_v20 = vrot.slane %v11476_v48, 2 }
 0x488   : > { %8406 = vmatprep.mubr.msk.f32.mxu1 %vm528_vm3, %v12436_v13  ;;  %v5015_v13 = vrot.slane %v11472_v25, 2 }
 0x48b   : > { %8407 = vmatmul.mubr.msk.f32.gmra.mrb[20].mxu1 %vm528_vm3, %v11345_v47 }
 0x48c   : > { %8409 = vmatprep.mubr.msk.f32.mxu1 %vm528_vm3, %v12437_v46 }
 0x48f   : > { %8410 = vmatmul.mubr.msk.f32.gmra.mrb[22].mxu1 %vm528_vm3, %v11358_v17  ;;  %v5018_v17 = vrot.slane %v3354_v27, 2  ;;  %v5561_v27 = vld [vmem:[%s12084_s4 + $0xf8] sm:$0xff] }
 0x490   : > { %8412 = vmatprep.mubr.msk.f32.mxu1 %vm528_vm3, %v12438_v16  ;;  %v11639_v16 = vsel %vm1107_vm4, %v5015_v13, %v5016_v20 }
 0x491   : > { %12439 = vst [vmem:[#allocation38_spill] sm:$0xff] %v11639_v16 }
 0x493   : > { %8413 = vmatmul.mubr.msk.f32.gmra.mrb[24].mxu1 %vm528_vm3, %v11371_v50  ;;  %v9294_v50 = vld [vmem:[#allocation2 + $0x50] sm:$0xff] }
 0x494   : > { %8415 = vmatprep.mubr.msk.f32.mxu1 %vm528_vm3, %v11377_v39  ;;  %v11644_v39 = vsel %vm1107_vm4, %v5016_v20, %v5018_v17  ;;  %v5828_v20 = vld [vmem:[%s12084_s4 + $0x100] sm:$0xff]  ;;  %v5829_v17 = vld [vmem:[%s12084_s4 + $0x108] sm:$0xff] }
 0x495   : > { %12440 = vst [vmem:[#allocation39_spill] sm:$0xff] %v11644_v39 }
 0x497   : > { %8416 = vmatmul.mubr.msk.f32.gmra.mrb[26].mxu1 %vm528_vm3, %v11384_v34  ;;  %v5560_v34 = vld [vmem:[%s12084_s4 + $0xf0] sm:$0xff] }
 0x498   : > { %8418 = vmatprep.mubr.msk.f32.mxu1 %vm528_vm3, %v11390_v53  ;;  %v8724_v13 = vpack.c.bf16 %v5561_v27, %v5560_v34  ;;  %v9293_v53 = vld [vmem:[#allocation2 + $0x48] sm:$0xff]  ;;  %v9295_v34 = vld [vmem:[#allocation2 + $0x60] sm:$0xff]  ;;  %v9297_v27 = vld [vmem:[#allocation2 + $0x78] sm:$0xff] }
 0x49b   : > { %8419 = vmatmul.mubr.msk.f32.gmra.mrb[28].mxu1 %vm528_vm3, %v11395_v9  ;;  %v9291_v9 = vld [vmem:[#allocation2 + $0x30] sm:$0xff] }
 0x49c   : > { %8421 = vmatprep.mubr.msk.f32.mxu1 %vm528_vm3, %v11639_v16  ;;  %v9292_v16 = vld [vmem:[#allocation2 + $0x38] sm:$0xff] }
 0x49f   : > { %8422 = vmatmul.mubr.msk.f32.gmra.mrb[30].mxu1 %vm528_vm3, %v11644_v39  ;;  %v8728_v39 = vpack.c.bf16 %v5829_v17, %v5828_v20  ;;  %v12471_v20 = vld [vmem:[#allocation6_spill] sm:$0xff] }
 0x4a0   : > { %8432 = vmatprep.mubr.msk.f32.mxu1 %vm528_vm3, %v9291_v9  ;;  %v9296_v9 = vld [vmem:[#allocation2 + $0x68] sm:$0xff] }
 0x4a3   : > { %8433 = vmatmul.mubr.msk.f32.vlgmr.msra.gmra.mrb[0].mxu1 %vm528_vm3, %v9292_v16  ;;  %v9298_v16 = vld [vmem:[#allocation2 + $0x80] sm:$0xff] }
 0x4a4   : > { %8435 = vmatprep.mubr.msk.f32.mxu1 %vm528_vm3, %v9293_v53  ;;  %8723 = vmatpush3.bf16.msra.mxu1 %v8720_v30 }
 0x4a5   : > { %8725 = vmatprep.subr.bf16.mxu1 %v8724_v13 }
 0x4a7   : > { %8436 = vmatmul.mubr.msk.f32.gmra.mrb[2].mxu1 %vm528_vm3, %v9294_v50  ;;  %v3357_v50 = vld [vmem:[#allocation2 + $0x1a8] sm:$0x3] }
 0x4a8   : > { %8438 = vmatprep.mubr.msk.f32.mxu1 %vm528_vm3, %v9295_v34  ;;  %8727 = vmatpush3.bf16.msra.mxu1 %v8724_v13 }
 0x4a9   : > { %8729 = vmatprep.subr.bf16.mxu1 %v8728_v39 }
 0x4ab   : > { %8439 = vmatmul.mubr.msk.f32.gmra.mrb[4].mxu1 %vm528_vm3, %v9296_v9 }
 0x4ac   : > { %8441 = vmatprep.mubr.msk.f32.mxu1 %vm528_vm3, %v9297_v27 }
 0x4af   : > { %8442 = vmatmul.mubr.msk.f32.gmra.mrb[6].mxu1 %vm528_vm3, %v9298_v16 }
 0x4b0   : > { %8444 = vmatprep.mubr.msk.f32.mxu1 %vm528_vm3, %v10869_v63  ;;  %v11710_v63 = vld [vmem:[#allocation2 + $0x198] sm:$0xff] }
 0x4b3   : > { %8445 = vmatmul.mubr.msk.f32.gmra.mrb[8].mxu1 %vm528_vm3, %v10871_v54  ;;  %v11716_v54 = vld [vmem:[#allocation2 + $0x1a0] sm:$0xff] }
 0x4b4   : > { %8447 = vmatprep.mubr.msk.f32.mxu1 %vm528_vm3, %v10894_v44  ;;  %v5830_v44 = vld [vmem:[%s12084_s4 + $0x110] sm:$0xff] }
 0x4b7   : > { %8448 = vmatmul.mubr.msk.f32.gmra.mrb[10].mxu1 %vm528_vm3, %v10896_v45  ;;  %v5831_v45 = vld [vmem:[%s12084_s4 + $0x118] sm:$0xff] }
 0x4b8   : > { %8450 = vmatprep.mubr.msk.f32.mxu1 %vm528_vm3, %v10919_v52  ;;  %v8732_v52 = vpack.c.bf16 %v5831_v45, %v5830_v44  ;;  %v12472_v44 = vld [vmem:[#allocation9_spill] sm:$0xff] }
 0x4bb   : > { %8451 = vmatmul.mubr.msk.f32.gmra.mrb[12].mxu1 %vm528_vm3, %v10921_v35  ;;  %v12444_v35 = vld [vmem:[#allocation47_spill] sm:$0xff] }
 0x4bc   : > { %8453 = vmatprep.mubr.msk.f32.mxu1 %vm528_vm3, %v10944_v33  ;;  %v12445_v33 = vld [vmem:[#allocation36_spill] sm:$0xff] }
 0x4bf   : > { %8454 = vmatmul.mubr.msk.f32.gmra.mrb[14].mxu1 %vm528_vm3, %v10946_v12  ;;  %v12446_v12 = vld [vmem:[#allocation50_spill] sm:$0xff] }
 0x4c0   : > { %8456 = vmatprep.mubr.msk.f32.mxu1 %vm528_vm3, %v10969_v55  ;;  %v12447_v55 = vld [vmem:[#allocation51_spill] sm:$0xff] }
 0x4c3   : > { %8457 = vmatmul.mubr.msk.f32.gmra.mrb[16].mxu1 %vm528_vm3, %v10971_v56  ;;  %v12448_v56 = vld [vmem:[#allocation52_spill] sm:$0xff] }
 0x4c4   : > { %8459 = vmatprep.mubr.msk.f32.mxu1 %vm528_vm3, %v10994_v42  ;;  %v12449_v42 = vld [vmem:[#allocation53_spill] sm:$0xff] }
 0x4c7   : > { %8460 = vmatmul.mubr.msk.f32.gmra.mrb[18].mxu1 %vm528_vm3, %v10996_v5  ;;  %v12450_v5 = vld [vmem:[#allocation54_spill] sm:$0xff] }
 0x4c8   : > { %8462 = vmatprep.mubr.msk.f32.mxu1 %vm528_vm3, %v11019_v60  ;;  %v12451_v60 = vld [vmem:[#allocation55_spill] sm:$0xff] }
 0x4cb   : > { %8463 = vmatmul.mubr.msk.f32.gmra.mrb[20].mxu1 %vm528_vm3, %v11021_v59  ;;  %v12452_v59 = vld [vmem:[#allocation56_spill] sm:$0xff] }
 0x4cc   : > { %8465 = vmatprep.mubr.msk.f32.mxu1 %vm528_vm3, %v11044_v49  ;;  %v12453_v49 = vld [vmem:[#allocation58_spill] sm:$0xff] }
 0x4cf   : > { %8466 = vmatmul.mubr.msk.f32.gmra.mrb[22].mxu1 %vm528_vm3, %v11046_v36  ;;  %v12454_v36 = vld [vmem:[#allocation59_spill] sm:$0xff] }
 0x4d0   : > { %8468 = vmatprep.mubr.msk.f32.mxu1 %vm528_vm3, %v11066_v40  ;;  %v12455_v40 = vld [vmem:[#allocation60_spill] sm:$0xff] }
 0x4d3   : > { %8469 = vmatmul.mubr.msk.f32.gmra.mrb[24].mxu1 %vm528_vm3, %v11068_v19  ;;  %v12456_v19 = vld [vmem:[#allocation61_spill] sm:$0xff] }
 0x4d4   : > { %8471 = vmatprep.mubr.msk.f32.mxu1 %vm528_vm3, %v11086_v31  ;;  %v5553_v31 = vrot.slane %v11710_v63, 1 }
 0x4d7   : > { %8472 = vmatmul.mubr.msk.f32.gmra.mrb[26].mxu1 %vm528_vm3, %v11088_v41  ;;  %v5554_v41 = vrot.slane %v11716_v54, 1 }
 0x4d8   : > { %8474 = vmatprep.mubr.msk.f32.mxu1 %vm528_vm3, %v11472_v25  ;;  %v12457_v25 = vld [vmem:[#allocation37_spill] sm:$0xff] }
 0x4d9   : > { %v5555_v53 = vsel %vm443_vm2, %v5553_v31, %v5554_v41 }
 0x4db   : > { %8475 = vmatmul.mubr.msk.f32.gmra.mrb[28].mxu1 %vm528_vm3, %v11476_v48 }
 0x4dc   : > { %8477 = vmatprep.mubr.msk.f32.mxu1 %vm528_vm3, %v11710_v63 }
 0x4df   : > { %8478 = vmatmul.mubr.msk.f32.gmra.mrb[30].mxu1 %vm528_vm3, %v11716_v54 }
 0x4e0   : > { %8488 = vmatprep.mubr.msk.f32.mxu1 %vm528_vm3, %v10783_v58  ;;  %v12441_v58 = vld [vmem:[#allocation43_spill] sm:$0xff] }
 0x4e3   : > { %8489 = vmatmul.mubr.msk.f32.vlgmr.msra.gmra.mrb[0].mxu1 %vm528_vm3, %v10786_v11  ;;  %v12442_v11 = vld [vmem:[#allocation44_spill] sm:$0xff] }
 0x4e4   : > { %8491 = vmatprep.mubr.msk.f32.mxu1 %vm528_vm3, %v10808_v7  ;;  %8731 = vmatpush3.bf16.msra.mxu1 %v8728_v39  ;;  %v12443_v7 = vld [vmem:[#allocation46_spill] sm:$0xff]  ;;  %v5556_v39 = vrot.slane %v3357_v50, 1 }
 0x4e5   : > { %8733 = vmatprep.subr.bf16.mxu1 %v8732_v52 }
 0x4e6   : > { %v5557_v48 = vsel %vm443_vm2, %v5554_v41, %v5556_v39 }
 0x4e7   : > { %8492 = vmatmul.mubr.msk.f32.gmra.mrb[2].mxu1 %vm528_vm3, %v12404_v21  ;;  %v12468_v21 = vld [vmem:[#allocation38_spill] sm:$0xff] }
 0x4e8   : > { %8494 = vmatprep.mubr.msk.f32.mxu1 %vm528_vm3, %v12405_v29  ;;  %8735 = vmatpush3.bf16.msra.mxu1 %v8732_v52  ;;  %v5826_v29 = vrot.slane %v3357_v50, 2 }
 0x4eb   : > { %8495 = vmatmul.mubr.msk.f32.gmra.mrb[4].mxu1 %vm528_vm3, %v12406_v6 }
 0x4ec   : > { %8497 = vmatprep.mubr.msk.f32.mxu1 %vm528_vm3, %v12407_v62  ;;  %v12469_v62 = vld [vmem:[#allocation39_spill] sm:$0xff] }
 0x4ef   : > { %8498 = vmatmul.mubr.msk.f32.gmra.mrb[6].mxu1 %vm528_vm3, %v12408_v8 }
 0x4f0   : > { %8500 = vmatprep.mubr.msk.f32.mxu1 %vm528_vm3, %v12409_v26  ;;  %v11861_v26 = vld [vmem:[%s12085_s5] ss:$0 sm:$0xff] }
 0x4f3   : > { %8501 = vmatmul.mubr.msk.f32.gmra.mrb[8].mxu1 %vm528_vm3, %v12410_v0 }
 0x4f4   : > { %8503 = vmatprep.mubr.msk.f32.mxu1 %vm528_vm3, %v12441_v58 }
 0x4f7   : > { %8504 = vmatmul.mubr.msk.f32.gmra.mrb[10].mxu1 %vm528_vm3, %v12442_v11  ;;  %v12473_v11 = vld [vmem:[#allocation8_spill] sm:$0xff] }
 0x4f8   : > { %8506 = vmatprep.mubr.msk.f32.mxu1 %vm528_vm3, %v12443_v7 }
 0x4fb   : > { %8507 = vmatmul.mubr.msk.f32.gmra.mrb[12].mxu1 %vm528_vm3, %v12444_v35 }
 0x4fc   : > { %8509 = vmatprep.mubr.msk.f32.mxu1 %vm528_vm3, %v12445_v33 }
 0x4ff   : > { %8510 = vmatmul.mubr.msk.f32.gmra.mrb[14].mxu1 %vm528_vm3, %v12446_v12 }
 0x500   : > { %8512 = vmatprep.mubr.msk.f32.mxu1 %vm528_vm3, %v12447_v55 }
 0x503   : > { %8513 = vmatmul.mubr.msk.f32.gmra.mrb[16].mxu1 %vm528_vm3, %v12448_v56 }
 0x504   : > { %8515 = vmatprep.mubr.msk.f32.mxu1 %vm528_vm3, %v12449_v42 }
 0x507   : > { %8516 = vmatmul.mubr.msk.f32.gmra.mrb[18].mxu1 %vm528_vm3, %v12450_v5  ;;  %v12474_v5 = vld [vmem:[#allocation11_spill] sm:$0xff] }
 0x508   : > { %8518 = vmatprep.mubr.msk.f32.mxu1 %vm528_vm3, %v12451_v60 }
 0x50b   : > { %8519 = vmatmul.mubr.msk.f32.gmra.mrb[20].mxu1 %vm528_vm3, %v12452_v59 }
 0x50c   : > { %8521 = vmatprep.mubr.msk.f32.mxu1 %vm528_vm3, %v12423_v15 }
 0x50f   : > { %8522 = vmatmul.mubr.msk.f32.gmra.mrb[22].mxu1 %vm528_vm3, %v12453_v49 }
 0x510   : > { %8524 = vmatprep.mubr.msk.f32.mxu1 %vm528_vm3, %v12454_v36  ;;  %v12475_v36 = vld [vmem:[#allocation10_spill] sm:$0xff] }
 0x513   : > { %8525 = vmatmul.mubr.msk.f32.gmra.mrb[24].mxu1 %vm528_vm3, %v12455_v40 }
 0x514   : > { %8527 = vmatprep.mubr.msk.f32.mxu1 %vm528_vm3, %v12456_v19 }
 0x517   : > { %8528 = vmatmul.mubr.msk.f32.gmra.mrb[26].mxu1 %vm528_vm3, %v12428_v22  ;;  %v11866_v22 = vld [vmem:[%s12086_s6] ss:$0 sm:$0xff] }
 0x518   : > { %8530 = vmatprep.mubr.msk.f32.mxu1 %vm528_vm3, %v11555_v23 }
 0x51b   : > { %8531 = vmatmul.mubr.msk.f32.gmra.mrb[28].mxu1 %vm528_vm3, %v12457_v25  ;;  %v12476_v25 = vld [vmem:[#allocation13_spill] sm:$0xff] }
 0x51c   : > { %8533 = vmatprep.mubr.msk.f32.mxu1 %vm528_vm3, %v5555_v53 }
 0x51f   : > { %8534 = vmatmul.mubr.msk.f32.gmra.mrb[30].mxu1 %vm528_vm3, %v5557_v48 }
 0x520   : > { %8544 = vmatprep.mubr.msk.f32.mxu1 %vm528_vm3, %v11220_v61  ;;  %v12458_v61 = vld [vmem:[#allocation67_spill] sm:$0xff] }
 0x523   : > { %8545 = vmatmul.mubr.msk.f32.vlgmr.msra.gmra.mrb[0].mxu1 %vm528_vm3, %v11228_v43  ;;  %v12459_v43 = vld [vmem:[#allocation69_spill] sm:$0xff] }
 0x524   : > { %8547 = vmatprep.mubr.msk.f32.mxu1 %vm528_vm3, %v11234_v18  ;;  %v12460_v18 = vld [vmem:[#allocation70_spill] sm:$0xff] }
 0x527   : > { %8548 = vmatmul.mubr.msk.f32.gmra.mrb[2].mxu1 %vm528_vm3, %v11241_v32  ;;  %v12461_v32 = vld [vmem:[#allocation72_spill] sm:$0xff] }
 0x528   : > { %8550 = vmatprep.mubr.msk.f32.mxu1 %vm528_vm3, %v11247_v3  ;;  %v12462_v3 = vld [vmem:[#allocation73_spill] sm:$0xff] }
 0x52b   : > { %8551 = vmatmul.mubr.msk.f32.gmra.mrb[4].mxu1 %vm528_vm3, %v11254_v14  ;;  %v12463_v14 = vld [vmem:[#allocation74_spill] sm:$0xff] }
 0x52c   : > { %8553 = vmatprep.mubr.msk.f32.mxu1 %vm528_vm3, %v12430_v1 }
 0x52f   : > { %8554 = vmatmul.mubr.msk.f32.gmra.mrb[6].mxu1 %vm528_vm3, %v11267_v10  ;;  %v12465_v10 = vld [vmem:[#allocation76_spill] sm:$0xff] }
 0x530   : > { %8556 = vmatprep.mubr.msk.f32.mxu1 %vm528_vm3, %v12431_v2 }
 0x533   : > { %8557 = vmatmul.mubr.msk.f32.gmra.mrb[8].mxu1 %vm528_vm3, %v11280_v38  ;;  %v12464_v38 = vld [vmem:[#allocation75_spill] sm:$0xff] }
 0x534   : > { %8559 = vmatprep.mubr.msk.f32.mxu1 %vm528_vm3, %v12432_v24 }
 0x537   : > { %8560 = vmatmul.mubr.msk.f32.gmra.mrb[10].mxu1 %vm528_vm3, %v11293_v51  ;;  %v12466_v51 = vld [vmem:[#allocation77_spill] sm:$0xff] }
 0x538   : > { %8562 = vmatprep.mubr.msk.f32.mxu1 %vm528_vm3, %v12433_v4  ;;  %v12470_v4 = vld [vmem:[#allocation7_spill] sm:$0xff] }
 0x53b   : > { %8563 = vmatmul.mubr.msk.f32.gmra.mrb[12].mxu1 %vm528_vm3, %v11306_v28  ;;  %v5823_v28 = vrot.slane %v11710_v63, 2 }
 0x53c   : > { %8565 = vmatprep.mubr.msk.f32.mxu1 %vm528_vm3, %v12458_v61 }
 0x53f   : > { %8566 = vmatmul.mubr.msk.f32.gmra.mrb[14].mxu1 %vm528_vm3, %v11319_v57  ;;  %v5824_v57 = vrot.slane %v11716_v54, 2 }
 0x540   : > { %8568 = vmatprep.mubr.msk.f32.mxu1 %vm528_vm3, %v12435_v37 }
 0x541   : > { %v5825_v6 = vsel %vm1107_vm4, %v5823_v28, %v5824_v57  ;;  %v5827_v8 = vsel %vm1107_vm4, %v5824_v57, %v5826_v29  ;;  %v12478_v57 = vld [vmem:[#allocation15_spill] sm:$0xff] }
 0x543   : > { %8569 = vmatmul.mubr.msk.f32.gmra.mrb[16].mxu1 %vm528_vm3, %v12459_v43 }
 0x544   : > { %8571 = vmatprep.mubr.msk.f32.mxu1 %vm528_vm3, %v12460_v18  ;;  %v12477_v18 = vld [vmem:[#allocation12_spill] sm:$0xff] }
 0x547   : > { %8572 = vmatmul.mubr.msk.f32.gmra.mrb[18].mxu1 %vm528_vm3, %v11345_v47  ;;  %v12467_v47 = vld [vmem:[#allocation78_spill] sm:$0xff] }
 0x548   : > { %8574 = vmatprep.mubr.msk.f32.mxu1 %vm528_vm3, %v12437_v46 }
 0x54b   : > { %8575 = vmatmul.mubr.msk.f32.gmra.mrb[20].mxu1 %vm528_vm3, %v12461_v32 }
 0x54c   : > { %8577 = vmatprep.mubr.msk.f32.mxu1 %vm528_vm3, %v12462_v3 }
 0x54f   : > { %8578 = vmatmul.mubr.msk.f32.gmra.mrb[22].mxu1 %vm528_vm3, %v12463_v14 }
 0x550   : > { %8580 = vmatprep.mubr.msk.f32.mxu1 %vm528_vm3, %v12464_v38 }
 0x553   : > { %8581 = vmatmul.mubr.msk.f32.gmra.mrb[24].mxu1 %vm528_vm3, %v12465_v10 }
 0x554   : > { %8583 = vmatprep.mubr.msk.f32.mxu1 %vm528_vm3, %v12466_v51 }
 0x557   : > { %8584 = vmatmul.mubr.msk.f32.gmra.mrb[26].mxu1 %vm528_vm3, %v12467_v47 }
 0x558   : > { %8586 = vmatprep.mubr.msk.f32.mxu1 %vm528_vm3, %v12468_v21 }
 0x55b   : > { %8587 = vmatmul.mubr.msk.f32.gmra.mrb[28].mxu1 %vm528_vm3, %v12469_v62 }
 0x55c   : > { %8589 = vmatprep.mubr.msk.f32.mxu1 %vm528_vm3, %v5825_v6  ;;  %v12479_v6 = vld [vmem:[#allocation14_spill] sm:$0xff] }
 0x55f   : > { %8590 = vmatmul.mubr.msk.f32.gmra.mrb[30].mxu1 %vm528_vm3, %v5827_v8 }
 0x5f6   : > { %v8546_v0 = vpop.f32.mrb[0].mxu1 }
 0x5f7   : > { %v6101_v15 = vmul.f32 %v8546_v0, %v11861_v26  ;;  %v5902_v23 = vpop.f32.mrb[1].mxu1 }
 0x5f8   : > { %v6100_v30 = vmul.f32 %v11861_v26, %v5902_v23 }
 0x5f9   : > { %v6140_v1 = vadd.f32 %v11866_v22, %v6101_v15 }
 0x5fa   : > { %v6139_v2 = vadd.f32 %v11866_v22, %v6100_v30  ;;  %v8549_v24 = vpop.f32.mrb[2].mxu1 }
 0x5fb   : > { %v6172_v37 = vadd.f32 %v6140_v1, %v12470_v4  ;;  %v6103_v46 = vmul.f32 %v8549_v24, %v11861_v26  ;;  %v5912_v13 = vpop.f32.mrb[3].mxu1 }
 0x5fc   : > { %v6171_v17 = vadd.f32 %v6139_v2, %v12471_v20  ;;  %v6102_v34 = vmul.f32 %v11861_v26, %v5912_v13  ;;  %v12480_v2 = vld [vmem:[#allocation17_spill] sm:$0xff] }
 0x5fd   : > { %v6204_v9 = vmax.f32 %v6172_v37, 0.0  ;;  %v6142_v27 = vadd.f32 %v11866_v22, %v6103_v46  ;;  %v12481_v46 = vld [vmem:[#allocation16_spill] sm:$0xff] }
 0x5fe   : > { %v6203_v16 = vmax.f32 %v6171_v17, 0.0  ;;  %v6141_v63 = vadd.f32 %v11866_v22, %v6102_v34  ;;  %v8552_v54 = vpop.f32.mrb[4].mxu1 }
 0x5ff   : > { %6236 = vst.msk [vmem:[%s9465_s20 + $0x8] sm:$0xff] %vm528_vm3, %v6204_v9  ;;  %v6174_v45 = vadd.f32 %v6142_v27, %v12472_v44  ;;  %v6105_v52 = vmul.f32 %v8552_v54, %v11861_v26  ;;  %v5922_v58 = vpop.f32.mrb[5].mxu1 }
 0x600   : > { %6235 = vst.msk [vmem:[%s9465_s20] sm:$0xff] %vm528_vm3, %v6203_v16  ;;  %v6173_v7 = vadd.f32 %v6141_v63, %v12473_v11  ;;  %v6104_v35 = vmul.f32 %v11861_v26, %v5922_v58  ;;  %v12482_v63 = vld [vmem:[#allocation19_spill] sm:$0xff] }
 0x601   : > { %v6206_v33 = vmax.f32 %v6174_v45, 0.0  ;;  %v6144_v12 = vadd.f32 %v11866_v22, %v6105_v52  ;;  %v12483_v52 = vld [vmem:[#allocation18_spill] sm:$0xff] }
 0x602   : > { %v6205_v55 = vmax.f32 %v6173_v7, 0.0  ;;  %v6143_v56 = vadd.f32 %v11866_v22, %v6104_v35  ;;  %v8555_v42 = vpop.f32.mrb[6].mxu1 }
 0x603   : > { %6238 = vst.msk [vmem:[%s9465_s20 + $0x18] sm:$0xff] %vm528_vm3, %v6206_v33  ;;  %v6176_v60 = vadd.f32 %v6144_v12, %v12474_v5  ;;  %v6107_v59 = vmul.f32 %v8555_v42, %v11861_v26  ;;  %v5932_v49 = vpop.f32.mrb[7].mxu1 }
 0x604   : > { %6237 = vst.msk [vmem:[%s9465_s20 + $0x10] sm:$0xff] %vm528_vm3, %v6205_v55  ;;  %v6175_v40 = vadd.f32 %v6143_v56, %v12475_v36  ;;  %v6106_v19 = vmul.f32 %v11861_v26, %v5932_v49  ;;  %v12484_v56 = vld [vmem:[#allocation21_spill] sm:$0xff] }
 0x605   : > { %v6208_v31 = vmax.f32 %v6176_v60, 0.0  ;;  %v6146_v41 = vadd.f32 %v11866_v22, %v6107_v59  ;;  %v12485_v59 = vld [vmem:[#allocation20_spill] sm:$0xff] }
 0x606   : > { %v6207_v50 = vmax.f32 %v6175_v40, 0.0  ;;  %v6145_v39 = vadd.f32 %v11866_v22, %v6106_v19  ;;  %v8558_v53 = vpop.f32.mrb[8].mxu1 }
 0x607   : > { %6240 = vst.msk [vmem:[%s9465_s20 + $0x28] sm:$0xff] %vm528_vm3, %v6208_v31  ;;  %v6178_v48 = vadd.f32 %v6146_v41, %v12476_v25  ;;  %v6109_v61 = vmul.f32 %v8558_v53, %v11861_v26  ;;  %v5942_v43 = vpop.f32.mrb[9].mxu1 }
 0x608   : > { %6239 = vst.msk [vmem:[%s9465_s20 + $0x20] sm:$0xff] %vm528_vm3, %v6207_v50  ;;  %v6177_v32 = vadd.f32 %v6145_v39, %v12477_v18  ;;  %v6108_v3 = vmul.f32 %v11861_v26, %v5942_v43  ;;  %v12486_v39 = vld [vmem:[#allocation23_spill] sm:$0xff] }
 0x609   : > { %v6210_v14 = vmax.f32 %v6178_v48, 0.0  ;;  %v6148_v38 = vadd.f32 %v11866_v22, %v6109_v61  ;;  %v12487_v61 = vld [vmem:[#allocation22_spill] sm:$0xff] }
 0x60a   : > { %v6209_v10 = vmax.f32 %v6177_v32, 0.0  ;;  %v6147_v51 = vadd.f32 %v11866_v22, %v6108_v3  ;;  %v8561_v28 = vpop.f32.mrb[10].mxu1 }
 0x60b   : > { %6242 = vst.msk [vmem:[%s9465_s20 + $0x38] sm:$0xff] %vm528_vm3, %v6210_v14  ;;  %v6180_v47 = vadd.f32 %v6148_v38, %v12478_v57  ;;  %v6111_v21 = vmul.f32 %v8561_v28, %v11861_v26  ;;  %v5952_v29 = vpop.f32.mrb[11].mxu1 }
 0x60c   : > { %6241 = vst.msk [vmem:[%s9465_s20 + $0x30] sm:$0xff] %vm528_vm3, %v6209_v10  ;;  %v6179_v62 = vadd.f32 %v6147_v51, %v12479_v6  ;;  %v6110_v8 = vmul.f32 %v11861_v26, %v5952_v29  ;;  %v12488_v51 = vld [vmem:[#allocation25_spill] sm:$0xff] }
 0x60d   : > { %v6212_v0 = vmax.f32 %v6180_v47, 0.0  ;;  %v6150_v15 = vadd.f32 %v11866_v22, %v6111_v21  ;;  %v12489_v21 = vld [vmem:[#allocation24_spill] sm:$0xff] }
 0x60e   : > { %v6211_v23 = vmax.f32 %v6179_v62, 0.0  ;;  %v6149_v30 = vadd.f32 %v11866_v22, %v6110_v8  ;;  %v8564_v1 = vpop.f32.mrb[12].mxu1 }
 0x60f   : > { %6244 = vst.msk [vmem:[%s9465_s20 + $0x48] sm:$0xff] %vm528_vm3, %v6212_v0  ;;  %v6182_v24 = vadd.f32 %v6150_v15, %v12480_v2  ;;  %v6113_v4 = vmul.f32 %v8564_v1, %v11861_v26  ;;  %v5962_v37 = vpop.f32.mrb[13].mxu1 }
 0x610   : > { %6243 = vst.msk [vmem:[%s9465_s20 + $0x40] sm:$0xff] %vm528_vm3, %v6211_v23  ;;  %v6181_v13 = vadd.f32 %v6149_v30, %v12481_v46  ;;  %v6112_v20 = vmul.f32 %v11861_v26, %v5962_v37  ;;  %v12490_v30 = vld [vmem:[#allocation27_spill] sm:$0xff] }
 0x611   : > { %v6214_v17 = vmax.f32 %v6182_v24, 0.0  ;;  %v6152_v34 = vadd.f32 %v11866_v22, %v6113_v4  ;;  %v12491_v4 = vld [vmem:[#allocation26_spill] sm:$0xff] }
 0x612   : > { %v6213_v9 = vmax.f32 %v6181_v13, 0.0  ;;  %v6151_v27 = vadd.f32 %v11866_v22, %v6112_v20  ;;  %v8567_v16 = vpop.f32.mrb[14].mxu1 }
 0x613   : > { %6246 = vst.msk [vmem:[%s9465_s20 + $0x58] sm:$0xff] %vm528_vm3, %v6214_v17  ;;  %v6184_v54 = vadd.f32 %v6152_v34, %v12482_v63  ;;  %v6115_v44 = vmul.f32 %v8567_v16, %v11861_v26  ;;  %v5972_v45 = vpop.f32.mrb[15].mxu1 }
 0x614   : > { %6245 = vst.msk [vmem:[%s9465_s20 + $0x50] sm:$0xff] %vm528_vm3, %v6213_v9  ;;  %v6183_v58 = vadd.f32 %v6151_v27, %v12483_v52  ;;  %v6114_v11 = vmul.f32 %v11861_v26, %v5972_v45  ;;  %v12492_v27 = vld [vmem:[#allocation29_spill] sm:$0xff] }
 0x615   : > { %v6216_v7 = vmax.f32 %v6184_v54, 0.0  ;;  %v6154_v35 = vadd.f32 %v11866_v22, %v6115_v44  ;;  %v12493_v44 = vld [vmem:[#allocation28_spill] sm:$0xff] }
 0x616   : > { %v6215_v33 = vmax.f32 %v6183_v58, 0.0  ;;  %v6153_v12 = vadd.f32 %v11866_v22, %v6114_v11  ;;  %v8570_v55 = vpop.f32.mrb[16].mxu1 }
 0x617   : > { %6248 = vst.msk [vmem:[%s9465_s20 + $0x68] sm:$0xff] %vm528_vm3, %v6216_v7  ;;  %v6186_v42 = vadd.f32 %v6154_v35, %v12484_v56  ;;  %v6117_v5 = vmul.f32 %v8570_v55, %v11861_v26  ;;  %v5982_v60 = vpop.f32.mrb[17].mxu1 }
 0x618   : > { %6247 = vst.msk [vmem:[%s9465_s20 + $0x60] sm:$0xff] %vm528_vm3, %v6215_v33  ;;  %v6185_v49 = vadd.f32 %v6153_v12, %v12485_v59  ;;  %v6116_v36 = vmul.f32 %v11861_v26, %v5982_v60  ;;  %v12494_v12 = vld [vmem:[#allocation31_spill] sm:$0xff] }
 0x619   : > { %v6218_v40 = vmax.f32 %v6186_v42, 0.0  ;;  %v6156_v19 = vadd.f32 %v11866_v22, %v6117_v5  ;;  %v12495_v5 = vld [vmem:[#allocation30_spill] sm:$0xff] }
 0x61a   : > { %v6217_v31 = vmax.f32 %v6185_v49, 0.0  ;;  %v6155_v41 = vadd.f32 %v11866_v22, %v6116_v36  ;;  %v8573_v50 = vpop.f32.mrb[18].mxu1 }
 0x61b   : > { %6250 = vst.msk [vmem:[%s9465_s20 + $0x78] sm:$0xff] %vm528_vm3, %v6218_v40  ;;  %v6188_v53 = vadd.f32 %v6156_v19, %v12486_v39  ;;  %v6119_v25 = vmul.f32 %v8573_v50, %v11861_v26  ;;  %v5992_v48 = vpop.f32.mrb[19].mxu1 }
 0x61c   : > { %6249 = vst.msk [vmem:[%s9465_s20 + $0x70] sm:$0xff] %vm528_vm3, %v6217_v31  ;;  %v6187_v43 = vadd.f32 %v6155_v41, %v12487_v61  ;;  %v6118_v18 = vmul.f32 %v11861_v26, %v5992_v48  ;;  %v12496_v41 = vld [vmem:[#allocation33_spill] sm:$0xff] }
 0x61d   : > { %v6220_v32 = vmax.f32 %v6188_v53, 0.0  ;;  %v6158_v3 = vadd.f32 %v11866_v22, %v6119_v25  ;;  %v12497_v25 = vld [vmem:[#allocation32_spill] sm:$0xff] }
 0x61e   : > { %v6219_v14 = vmax.f32 %v6187_v43, 0.0  ;;  %v6157_v38 = vadd.f32 %v11866_v22, %v6118_v18  ;;  %v8576_v10 = vpop.f32.mrb[20].mxu1 }
 0x61f   : > { %6252 = vst.msk [vmem:[%s9465_s20 + $0x88] sm:$0xff] %vm528_vm3, %v6220_v32  ;;  %v6190_v28 = vadd.f32 %v6158_v3, %v12488_v51  ;;  %v6121_v57 = vmul.f32 %v8576_v10, %v11861_v26  ;;  %v6002_v47 = vpop.f32.mrb[21].mxu1 }
 0x620   : > { %6251 = vst.msk [vmem:[%s9465_s20 + $0x80] sm:$0xff] %vm528_vm3, %v6219_v14  ;;  %v6189_v29 = vadd.f32 %v6157_v38, %v12489_v21  ;;  %v6120_v6 = vmul.f32 %v11861_v26, %v6002_v47  ;;  %v12498_v38 = vld [vmem:[#allocation35_spill] sm:$0xff] }
 0x621   : > { %v6222_v62 = vmax.f32 %v6190_v28, 0.0  ;;  %v6160_v8 = vadd.f32 %v11866_v22, %v6121_v57  ;;  %v12499_v57 = vld [vmem:[#allocation34_spill] sm:$0xff] }
 0x622   : > { %v6221_v0 = vmax.f32 %v6189_v29, 0.0  ;;  %v6159_v15 = vadd.f32 %v11866_v22, %v6120_v6  ;;  %v8579_v23 = vpop.f32.mrb[22].mxu1 }
 0x623   : > { %6254 = vst.msk [vmem:[%s9465_s20 + $0x98] sm:$0xff] %vm528_vm3, %v6222_v62  ;;  %v6192_v1 = vadd.f32 %v6160_v8, %v12490_v30  ;;  %v6123_v2 = vmul.f32 %v8579_v23, %v11861_v26  ;;  %v6012_v24 = vpop.f32.mrb[23].mxu1  ;;  %v12501_v23 = vld [vmem:[#allocation48_spill] sm:$0xff] }
 0x624   : > { %6253 = vst.msk [vmem:[%s9465_s20 + $0x90] sm:$0xff] %vm528_vm3, %v6221_v0  ;;  %v6191_v37 = vadd.f32 %v6159_v15, %v12491_v4  ;;  %v6122_v46 = vmul.f32 %v11861_v26, %v6012_v24  ;;  %v12500_v0 = vld [vmem:[#allocation49_spill] sm:$0xff] }
 0x625   : > { %v6224_v13 = vmax.f32 %v6192_v1, 0.0  ;;  %v6162_v20 = vadd.f32 %v11866_v22, %v6123_v2 }
 0x626   : > { %v6223_v17 = vmax.f32 %v6191_v37, 0.0  ;;  %v6161_v34 = vadd.f32 %v11866_v22, %v6122_v46  ;;  %v8582_v9 = vpop.f32.mrb[24].mxu1 }
 0x627   : > { %6256 = vst.msk [vmem:[%s9465_s20 + $0xa8] sm:$0xff] %vm528_vm3, %v6224_v13  ;;  %v6194_v16 = vadd.f32 %v6162_v20, %v12492_v27  ;;  %v6125_v63 = vmul.f32 %v8582_v9, %v11861_v26  ;;  %v6022_v54 = vpop.f32.mrb[25].mxu1 }
 0x628   : > { %6255 = vst.msk [vmem:[%s9465_s20 + $0xa0] sm:$0xff] %vm528_vm3, %v6223_v17  ;;  %v6193_v45 = vadd.f32 %v6161_v34, %v12493_v44  ;;  %v6124_v52 = vmul.f32 %v11861_v26, %v6022_v54 }
 0x629   : > { %v6226_v58 = vmax.f32 %v6194_v16, 0.0  ;;  %v6164_v11 = vadd.f32 %v11866_v22, %v6125_v63 }
 0x62a   : > { %v6225_v7 = vmax.f32 %v6193_v45, 0.0  ;;  %v6163_v35 = vadd.f32 %v11866_v22, %v6124_v52  ;;  %v8585_v33 = vpop.f32.mrb[26].mxu1 }
 0x62b   : > { %6258 = vst.msk [vmem:[%s9465_s20 + $0xb8] sm:$0xff] %vm528_vm3, %v6226_v58  ;;  %v6196_v55 = vadd.f32 %v6164_v11, %v12494_v12  ;;  %v6127_v56 = vmul.f32 %v8585_v33, %v11861_v26  ;;  %v6032_v42 = vpop.f32.mrb[27].mxu1 }
 0x62c   : > { %6257 = vst.msk [vmem:[%s9465_s20 + $0xb0] sm:$0xff] %vm528_vm3, %v6225_v7  ;;  %v6195_v60 = vadd.f32 %v6163_v35, %v12495_v5  ;;  %v6126_v59 = vmul.f32 %v11861_v26, %v6032_v42 }
 0x62d   : > { %v6228_v49 = vmax.f32 %v6196_v55, 0.0  ;;  %v6166_v36 = vadd.f32 %v11866_v22, %v6127_v56 }
 0x62e   : > { %v6227_v40 = vmax.f32 %v6195_v60, 0.0  ;;  %v6165_v19 = vadd.f32 %v11866_v22, %v6126_v59  ;;  %v8588_v31 = vpop.f32.mrb[28].mxu1 }
 0x62f   : > { %6260 = vst.msk [vmem:[%s9465_s20 + $0xc8] sm:$0xff] %vm528_vm3, %v6228_v49  ;;  %v6198_v50 = vadd.f32 %v6166_v36, %v12496_v41  ;;  %v6129_v39 = vmul.f32 %v8588_v31, %v11861_v26  ;;  %v6042_v53 = vpop.f32.mrb[29].mxu1 }
 0x630   : > { %6259 = vst.msk [vmem:[%s9465_s20 + $0xc0] sm:$0xff] %vm528_vm3, %v6227_v40  ;;  %v6197_v48 = vadd.f32 %v6165_v19, %v12497_v25  ;;  %v6128_v61 = vmul.f32 %v11861_v26, %v6042_v53 }
 0x631   : > { %v6230_v43 = vmax.f32 %v6198_v50, 0.0  ;;  %v6168_v18 = vadd.f32 %v11866_v22, %v6129_v39 }
 0x632   : > { %v6229_v32 = vmax.f32 %v6197_v48, 0.0  ;;  %v6167_v3 = vadd.f32 %v11866_v22, %v6128_v61  ;;  %v8591_v14 = vpop.f32.mrb[30].mxu1 }
 0x633   : > { %6262 = vst.msk [vmem:[%s9465_s20 + $0xd8] sm:$0xff] %vm528_vm3, %v6230_v43  ;;  %v6200_v10 = vadd.f32 %v6168_v18, %v12498_v38  ;;  %v6131_v51 = vmul.f32 %v8591_v14, %v11861_v26  ;;  %v6052_v28 = vpop.f32.mrb[31].mxu1 }
 0x634   : > { %6261 = vst.msk [vmem:[%s9465_s20 + $0xd0] sm:$0xff] %vm528_vm3, %v6229_v32  ;;  %v6199_v47 = vadd.f32 %v6167_v3, %v12499_v57  ;;  %v6130_v21 = vmul.f32 %v11861_v26, %v6052_v28 }
 0x635   : > { %v6232_v29 = vmax.f32 %v6200_v10, 0.0  ;;  %v6170_v6 = vadd.f32 %v11866_v22, %v6131_v51 }
 0x636   : > { %v6231_v62 = vmax.f32 %v6199_v47, 0.0  ;;  %v6169_v8 = vadd.f32 %v11866_v22, %v6130_v21 }
 0x637   : > { %6264 = vst.msk [vmem:[%s9465_s20 + $0xe8] sm:$0xff] %vm528_vm3, %v6232_v29  ;;  %v6202_v15 = vadd.f32 %v6170_v6, %v12500_v0 }
 0x638   : > { %6263 = vst.msk [vmem:[%s9465_s20 + $0xe0] sm:$0xff] %vm528_vm3, %v6231_v62  ;;  %v6201_v30 = vadd.f32 %v6169_v8, %v12501_v23 }
 0x639   : > { %v6234_v26 = vmax.f32 %v6202_v15, 0.0 }
 0x63a   : > { %v6233_v22 = vmax.f32 %v6201_v30, 0.0 }
 0x63b   : > { %6266 = vst.msk [vmem:[%s9465_s20 + $0xf8] sm:$0xff] %vm528_vm3, %v6234_v26 }
 0x63c   : > { %6265 = vst.msk [vmem:[%s9465_s20 + $0xf0] sm:$0xff] %vm528_vm3, %v6233_v22 }
 0x63d   : > { %9312 = shalt.err (!%p9309_p4)
}
 0x63e   : > { %s9313_s13 = scalar_lea.hbm %s12029_s19, 4096  ;;  %s9317_s21 = scalar_lea.hbm %s12087_s7, 8192 }
 0x63f   : > { %p9314_p7 = scmp.ne.s32.totalorder %s12029_s19, %s9313_s13  ;;  %p9318_p10 = scmp.lt.u32.totalorder %s12029_s19, %s12087_s7 }
 0x640   : > { %p9319_p11 = scmp.lt.u32.totalorder %s9317_s21, %s9313_s13  ;;  %p9321_p13 = scmp.lt.u32.totalorder %s9313_s13, %s12029_s19 }
 0x641   : > { %p9315_p8 = pnand %p9314_p7, %p9445_p5 }
 0x642   : > { %p9320_p12 = por %p9319_p11, %p9318_p10 }
 0x643   : > { %p9316_p9 = pneg %p9315_p8 }
 0x644   : > { %p9322_p0 = por %p9321_p13, %p9320_p12 }
 0x646   : > { %p9323_p1 = pnand %p9322_p0, %p9316_p9 }
 0x648   : > { %9326 = shalt.err (!%p9323_p1)
}
 0x649   : > { %s9365_s8 = smov 128   ;;  %s9366_s9 = smov 8  }
 0x64a   : > { %9249 = dma.vmem_to_hbm [thread:$0]  (%p9445_p5), %s12031_s29, 4096, %s12029_s19, %s12039_s28, %s9365_s8, %s9365_s8, %s9366_s9  }
 0x64b PF: > { %p9255_p2 = scmp.ge.s32.totalorder %s9361_s27, 2  ;;  %s6296_s14 = sand.u32 1, %s9349_s24  }
 0x64c   : > { %s6297_s15 = scalar_lea.sflag [#allocation4], %s6296_s14 }
 0x64d   : > { %p9252_p3 = pnand %p9255_p2, %p9449_p6 }
 0x64f   : > { %9344 = dma.done.wait (!%p9252_p3), %s6297_s15, 4096  }
 0x650   : > { %9346 = vsyncadd (!%p9252_p3), %s6297_s15, 4294963200  ;;  %p17_p4 = scmp.ge.s32.totalorder %s9432_s30, 4   ;;  %s12502_s24 = smov %s9353_s25 }
 0x651   : > { %s12503_s25 = smov %s9357_s26  ;;  %s12504_s26 = smov %s9443_s10 }
 0x652   : > { %s12505_s27 = smov %s9432_s30  ;;  %19 = sbr.rel (!%p17_p4) target bundleno = 3 (0x3), region = 88 }
 0x659   :  { %6302 = vsyncpa [#allocation4], 1 }
 0x65a   :  { %6304 = vsyncpa [#allocation4 + $0x1], 1 }

</bundles_post_ra>
